<compile_context>
chip_gen: v5e
topology: v5e:2x2
jax: 0.10.0
libtpu: 0.0.40
codegen_flags: <defaults>
</compile_context>

<pallas_src>
import jax
import jax.numpy as jnp
from jax.experimental import pallas as pl
from jax.experimental.pallas import tpu as pltpu


def _round_up(x, m):
    return ((x + m - 1) // m) * m


def _make_mlp_kernel(num_layers):
    """Kernel for `num_layers` bias-free linear layers (relu on all but last).

    Refs:
      x_ref : VMEM [in_feat, rb, 128] -- feature channels of one batch slab
      w_i   : SMEM [out_i, in_i]      -- torch [out, in] weights (scalars folded)
      o_ref : VMEM [rb, 128]          -- dense output slab
    """
    def kernel(*refs):
        x_ref = refs[0]
        w_refs = refs[1:1 + num_layers]
        o_ref = refs[1 + num_layers]

        # Feature channels as dense [rb, 128] slabs (batch on sublanes + lanes).
        h = [x_ref[k] for k in range(x_ref.shape[0])]

        # Hidden layers on the VPU: each output channel is a scalar-weight
        # broadcast mul/add chain.  The tiny K=3/10 contractions would pad to
        # a 128/256-wide MXU tile (~1% utilization) if expressed as jnp.dot.
        for li in range(num_layers - 1):
            w = w_refs[li]
            out_dim, in_dim = w.shape
            nxt = []
            for u in range(out_dim):
                acc = w[u, 0] * h[0]
                for k in range(1, in_dim):
                    acc = acc + w[u, k] * h[k]
                nxt.append(jnp.maximum(acc, 0.0))
            h = nxt

        # Final layer: single output channel, no relu.
        w = w_refs[-1]
        acc = w[0, 0] * h[0]
        for k in range(1, w.shape[1]):
            acc = acc + w[0, k] * h[k]
        o_ref[...] = acc

    return kernel


def mlp_forward(x, weights, scalars, block_n=32768):
    """x: [N, 3] f32; weights: torch nn.Linear [out, in] matrices.

    Returns [N] f32, matching `(scalar * last_layer(h)).view(-1)`.
    """
    n, in_feat = x.shape

    # Fold the scalar multipliers into the weights (identity for param=False;
    # algebraically exact for param=True as well since relu(s*Wx) = relu((sW)x)
    # for s produced by get_scalar, which is initialized to 1.0).
    ws = [jnp.asarray(s, jnp.float32) * w.astype(jnp.float32)
          for s, w in zip(scalars, weights)]
    num_layers = len(ws)

    # Dense slab layout: pad N to a multiple of 1024 (one full 8x128 granule).
    n_pad = _round_up(n, 1024)
    rows = n_pad // 128                       # multiple of 8
    rb = min(max(block_n // 128, 8), rows)    # block sublane-rows, multiple of 8
    # v7x has 2 TensorCores: keep >= 2 parallel grid steps when possible.
    if rb == rows and rows >= 16:
        rb = _round_up(rows // 2, 8)
    grid = (pl.cdiv(rows, rb),)               # ragged last block handled by Pallas

    # Relayout x to [in_feat, rows, 128] feature-channel slabs.
    # TODO(synk): keep x in [3, N] layout upstream to avoid this extra HBM pass.
    xt = jnp.pad(x.astype(jnp.float32), ((0, n_pad - n), (0, 0)))
    xt = xt.T.reshape(in_feat, rows, 128)

    kernel = _make_mlp_kernel(num_layers)
    w_specs = [pl.BlockSpec(memory_space=pltpu.MemorySpace.SMEM) for _ in ws]

    out = pl.pallas_call(
        kernel,
        out_shape=jax.ShapeDtypeStruct((rows, 128), jnp.float32),
        grid=grid,
        in_specs=[pl.BlockSpec((in_feat, rb, 128), lambda i: (0, i, 0))] + w_specs,
        out_specs=pl.BlockSpec((rb, 128), lambda i: (i, 0)),
        compiler_params=pltpu.CompilerParams(
            dimension_semantics=("parallel",)),
    )(xt, *ws)

    # .view(-1) in the PyTorch forward (drop padded elements).
    return out.reshape(-1)[:n]


def init_weights(key, units=10, n_layers=2):
    """normal(0, 0.1) then Frobenius-normalized (Model._initialize_weights)."""
    shapes = [(units, 3)] + [(units, units)] * n_layers + [(1, units)]
    keys = jax.random.split(key, len(shapes))
    ws = []
    for k, s in zip(keys, shapes):
        w = 0.1 * jax.random.normal(k, s, dtype=jnp.float32)
        w = w / jnp.linalg.norm(w)            # normalize(): v / v.norm()
        ws.append(w)
    return ws


def reference_forward(x, weights, scalars):
    h = x
    for i, w in enumerate(weights[:-1]):
        h = jnp.maximum(scalars[i] * (h @ w.T), 0.0)
    return (scalars[-1] * (h @ weights[-1].T)).reshape(-1)


if __name__ == "__main__":
    key = jax.random.PRNGKey(0)
    k_x, k_w, k_x2, k_x3 = jax.random.split(key, 4)

    N, UNITS, N_LAYERS = 8, 10, 2
    x = jax.random.normal(k_x, (N, 3), dtype=jnp.float32)
    weights = init_weights(k_w, units=UNITS, n_layers=N_LAYERS)
    # param=False -> get_scalar returns the Python int 1 for every scalar
    scalars = [1.0] * (N_LAYERS + 2)

    out = jax.block_until_ready(mlp_forward(x, weights, scalars))
    ref = reference_forward(x, weights, scalars)
    assert out.shape == (N,)
    assert jnp.allclose(out, ref, atol=1e-5, rtol=1e-5)

    # Non-multiple batch + multi-step grid (small block) exercising padding.
    N2 = 2500
    x2 = jax.random.normal(k_x2, (N2, 3), dtype=jnp.float32)
    out2 = jax.block_until_ready(mlp_forward(x2, weights, scalars, block_n=1024))
    ref2 = reference_forward(x2, weights, scalars)
    assert out2.shape == (N2,)
    assert jnp.allclose(out2, ref2, atol=1e-5, rtol=1e-5)

    # Default block size with the 2-step megacore split and a ragged last block.
    N3 = 2500
    x3 = jax.random.normal(k_x3, (N3, 3), dtype=jnp.float32)
    out3 = jax.block_until_ready(mlp_forward(x3, weights, scalars))
    ref3 = reference_forward(x3, weights, scalars)
    assert out3.shape == (N3,)
    assert jnp.allclose(out3, ref3, atol=1e-5, rtol=1e-5)

    print("KERNEL_OK")
</pallas_src>

<mosaic_0001>
module attributes {stable_mosaic.version = 11 : i64} {
  func.func @kernel(%arg0: i32, %arg1: memref<3x8x128xf32, #tpu.memory_space<vmem>>, %arg2: memref<10x3xf32, #tpu.memory_space<smem>>, %arg3: memref<10x10xf32, #tpu.memory_space<smem>>, %arg4: memref<10x10xf32, #tpu.memory_space<smem>>, %arg5: memref<1x10xf32, #tpu.memory_space<smem>>, %arg6: memref<8x128xf32, #tpu.memory_space<vmem>>) attributes {dimension_semantics = [#tpu.dimension_semantics<parallel>], iteration_bounds = array<i64: 1>, scalar_prefetch = 0 : i64, scratch_operands = 0 : i64, tpu.core_type = #tpu.core_type<tc>, window_params = [{transform_indices = @transform_0, window_bounds = array<i64: 3, 8, 128>}, {transform_indices = @transform_1, window_bounds = array<i64: 10, 3>}, {transform_indices = @transform_2, window_bounds = array<i64: 10, 10>}, {transform_indices = @transform_3, window_bounds = array<i64: 10, 10>}, {transform_indices = @transform_4, window_bounds = array<i64: 1, 10>}, {transform_indices = @transform_5, window_bounds = array<i64: 8, 128>}]} {
    %c0 = arith.constant 0 : index
    %c0_0 = arith.constant 0 : index
    %c0_1 = arith.constant 0 : index
    %0 = vector.load %arg1[%c0, %c0_0, %c0_1] : memref<3x8x128xf32, #tpu.memory_space<vmem>>, vector<1x8x128xf32>
    %1 = vector.shape_cast %0 : vector<1x8x128xf32> to vector<8x128xf32>
    %c1 = arith.constant 1 : index
    %c0_2 = arith.constant 0 : index
    %c0_3 = arith.constant 0 : index
    %2 = vector.load %arg1[%c1, %c0_2, %c0_3] : memref<3x8x128xf32, #tpu.memory_space<vmem>>, vector<1x8x128xf32>
    %3 = vector.shape_cast %2 : vector<1x8x128xf32> to vector<8x128xf32>
    %c2 = arith.constant 2 : index
    %c0_4 = arith.constant 0 : index
    %c0_5 = arith.constant 0 : index
    %4 = vector.load %arg1[%c2, %c0_4, %c0_5] : memref<3x8x128xf32, #tpu.memory_space<vmem>>, vector<1x8x128xf32>
    %5 = vector.shape_cast %4 : vector<1x8x128xf32> to vector<8x128xf32>
    %c0_6 = arith.constant 0 : index
    %c0_7 = arith.constant 0 : index
    %6 = memref.load %arg2[%c0_6, %c0_7] : memref<10x3xf32, #tpu.memory_space<smem>>
    %7 = vector.broadcast %6 : f32 to vector<8x128xf32>
    %8 = arith.mulf %7, %1 : vector<8x128xf32>
    %c0_8 = arith.constant 0 : index
    %c1_9 = arith.constant 1 : index
    %9 = memref.load %arg2[%c0_8, %c1_9] : memref<10x3xf32, #tpu.memory_space<smem>>
    %10 = vector.broadcast %9 : f32 to vector<8x128xf32>
    %11 = arith.mulf %10, %3 : vector<8x128xf32>
    %12 = arith.addf %8, %11 : vector<8x128xf32>
    %c0_10 = arith.constant 0 : index
    %c2_11 = arith.constant 2 : index
    %13 = memref.load %arg2[%c0_10, %c2_11] : memref<10x3xf32, #tpu.memory_space<smem>>
    %14 = vector.broadcast %13 : f32 to vector<8x128xf32>
    %15 = arith.mulf %14, %5 : vector<8x128xf32>
    %16 = arith.addf %12, %15 : vector<8x128xf32>
    %cst = arith.constant 0.000000e+00 : f32
    %17 = vector.broadcast %cst : f32 to vector<8x128xf32>
    %18 = arith.maximumf %16, %17 : vector<8x128xf32>
    %c1_12 = arith.constant 1 : index
    %c0_13 = arith.constant 0 : index
    %19 = memref.load %arg2[%c1_12, %c0_13] : memref<10x3xf32, #tpu.memory_space<smem>>
    %20 = vector.broadcast %19 : f32 to vector<8x128xf32>
    %21 = arith.mulf %20, %1 : vector<8x128xf32>
    %c1_14 = arith.constant 1 : index
    %c1_15 = arith.constant 1 : index
    %22 = memref.load %arg2[%c1_14, %c1_15] : memref<10x3xf32, #tpu.memory_space<smem>>
    %23 = vector.broadcast %22 : f32 to vector<8x128xf32>
    %24 = arith.mulf %23, %3 : vector<8x128xf32>
    %25 = arith.addf %21, %24 : vector<8x128xf32>
    %c1_16 = arith.constant 1 : index
    %c2_17 = arith.constant 2 : index
    %26 = memref.load %arg2[%c1_16, %c2_17] : memref<10x3xf32, #tpu.memory_space<smem>>
    %27 = vector.broadcast %26 : f32 to vector<8x128xf32>
    %28 = arith.mulf %27, %5 : vector<8x128xf32>
    %29 = arith.addf %25, %28 : vector<8x128xf32>
    %cst_18 = arith.constant 0.000000e+00 : f32
    %30 = vector.broadcast %cst_18 : f32 to vector<8x128xf32>
    %31 = arith.maximumf %29, %30 : vector<8x128xf32>
    %c2_19 = arith.constant 2 : index
    %c0_20 = arith.constant 0 : index
    %32 = memref.load %arg2[%c2_19, %c0_20] : memref<10x3xf32, #tpu.memory_space<smem>>
    %33 = vector.broadcast %32 : f32 to vector<8x128xf32>
    %34 = arith.mulf %33, %1 : vector<8x128xf32>
    %c2_21 = arith.constant 2 : index
    %c1_22 = arith.constant 1 : index
    %35 = memref.load %arg2[%c2_21, %c1_22] : memref<10x3xf32, #tpu.memory_space<smem>>
    %36 = vector.broadcast %35 : f32 to vector<8x128xf32>
    %37 = arith.mulf %36, %3 : vector<8x128xf32>
    %38 = arith.addf %34, %37 : vector<8x128xf32>
    %c2_23 = arith.constant 2 : index
    %c2_24 = arith.constant 2 : index
    %39 = memref.load %arg2[%c2_23, %c2_24] : memref<10x3xf32, #tpu.memory_space<smem>>
    %40 = vector.broadcast %39 : f32 to vector<8x128xf32>
    %41 = arith.mulf %40, %5 : vector<8x128xf32>
    %42 = arith.addf %38, %41 : vector<8x128xf32>
    %cst_25 = arith.constant 0.000000e+00 : f32
    %43 = vector.broadcast %cst_25 : f32 to vector<8x128xf32>
    %44 = arith.maximumf %42, %43 : vector<8x128xf32>
    %c3 = arith.constant 3 : index
    %c0_26 = arith.constant 0 : index
    %45 = memref.load %arg2[%c3, %c0_26] : memref<10x3xf32, #tpu.memory_space<smem>>
    %46 = vector.broadcast %45 : f32 to vector<8x128xf32>
    %47 = arith.mulf %46, %1 : vector<8x128xf32>
    %c3_27 = arith.constant 3 : index
    %c1_28 = arith.constant 1 : index
    %48 = memref.load %arg2[%c3_27, %c1_28] : memref<10x3xf32, #tpu.memory_space<smem>>
    %49 = vector.broadcast %48 : f32 to vector<8x128xf32>
    %50 = arith.mulf %49, %3 : vector<8x128xf32>
    %51 = arith.addf %47, %50 : vector<8x128xf32>
    %c3_29 = arith.constant 3 : index
    %c2_30 = arith.constant 2 : index
    %52 = memref.load %arg2[%c3_29, %c2_30] : memref<10x3xf32, #tpu.memory_space<smem>>
    %53 = vector.broadcast %52 : f32 to vector<8x128xf32>
    %54 = arith.mulf %53, %5 : vector<8x128xf32>
    %55 = arith.addf %51, %54 : vector<8x128xf32>
    %cst_31 = arith.constant 0.000000e+00 : f32
    %56 = vector.broadcast %cst_31 : f32 to vector<8x128xf32>
    %57 = arith.maximumf %55, %56 : vector<8x128xf32>
    %c4 = arith.constant 4 : index
    %c0_32 = arith.constant 0 : index
    %58 = memref.load %arg2[%c4, %c0_32] : memref<10x3xf32, #tpu.memory_space<smem>>
    %59 = vector.broadcast %58 : f32 to vector<8x128xf32>
    %60 = arith.mulf %59, %1 : vector<8x128xf32>
    %c4_33 = arith.constant 4 : index
    %c1_34 = arith.constant 1 : index
    %61 = memref.load %arg2[%c4_33, %c1_34] : memref<10x3xf32, #tpu.memory_space<smem>>
    %62 = vector.broadcast %61 : f32 to vector<8x128xf32>
    %63 = arith.mulf %62, %3 : vector<8x128xf32>
    %64 = arith.addf %60, %63 : vector<8x128xf32>
    %c4_35 = arith.constant 4 : index
    %c2_36 = arith.constant 2 : index
    %65 = memref.load %arg2[%c4_35, %c2_36] : memref<10x3xf32, #tpu.memory_space<smem>>
    %66 = vector.broadcast %65 : f32 to vector<8x128xf32>
    %67 = arith.mulf %66, %5 : vector<8x128xf32>
    %68 = arith.addf %64, %67 : vector<8x128xf32>
    %cst_37 = arith.constant 0.000000e+00 : f32
    %69 = vector.broadcast %cst_37 : f32 to vector<8x128xf32>
    %70 = arith.maximumf %68, %69 : vector<8x128xf32>
    %c5 = arith.constant 5 : index
    %c0_38 = arith.constant 0 : index
    %71 = memref.load %arg2[%c5, %c0_38] : memref<10x3xf32, #tpu.memory_space<smem>>
    %72 = vector.broadcast %71 : f32 to vector<8x128xf32>
    %73 = arith.mulf %72, %1 : vector<8x128xf32>
    %c5_39 = arith.constant 5 : index
    %c1_40 = arith.constant 1 : index
    %74 = memref.load %arg2[%c5_39, %c1_40] : memref<10x3xf32, #tpu.memory_space<smem>>
    %75 = vector.broadcast %74 : f32 to vector<8x128xf32>
    %76 = arith.mulf %75, %3 : vector<8x128xf32>
    %77 = arith.addf %73, %76 : vector<8x128xf32>
    %c5_41 = arith.constant 5 : index
    %c2_42 = arith.constant 2 : index
    %78 = memref.load %arg2[%c5_41, %c2_42] : memref<10x3xf32, #tpu.memory_space<smem>>
    %79 = vector.broadcast %78 : f32 to vector<8x128xf32>
    %80 = arith.mulf %79, %5 : vector<8x128xf32>
    %81 = arith.addf %77, %80 : vector<8x128xf32>
    %cst_43 = arith.constant 0.000000e+00 : f32
    %82 = vector.broadcast %cst_43 : f32 to vector<8x128xf32>
    %83 = arith.maximumf %81, %82 : vector<8x128xf32>
    %c6 = arith.constant 6 : index
    %c0_44 = arith.constant 0 : index
    %84 = memref.load %arg2[%c6, %c0_44] : memref<10x3xf32, #tpu.memory_space<smem>>
    %85 = vector.broadcast %84 : f32 to vector<8x128xf32>
    %86 = arith.mulf %85, %1 : vector<8x128xf32>
    %c6_45 = arith.constant 6 : index
    %c1_46 = arith.constant 1 : index
    %87 = memref.load %arg2[%c6_45, %c1_46] : memref<10x3xf32, #tpu.memory_space<smem>>
    %88 = vector.broadcast %87 : f32 to vector<8x128xf32>
    %89 = arith.mulf %88, %3 : vector<8x128xf32>
    %90 = arith.addf %86, %89 : vector<8x128xf32>
    %c6_47 = arith.constant 6 : index
    %c2_48 = arith.constant 2 : index
    %91 = memref.load %arg2[%c6_47, %c2_48] : memref<10x3xf32, #tpu.memory_space<smem>>
    %92 = vector.broadcast %91 : f32 to vector<8x128xf32>
    %93 = arith.mulf %92, %5 : vector<8x128xf32>
    %94 = arith.addf %90, %93 : vector<8x128xf32>
    %cst_49 = arith.constant 0.000000e+00 : f32
    %95 = vector.broadcast %cst_49 : f32 to vector<8x128xf32>
    %96 = arith.maximumf %94, %95 : vector<8x128xf32>
    %c7 = arith.constant 7 : index
    %c0_50 = arith.constant 0 : index
    %97 = memref.load %arg2[%c7, %c0_50] : memref<10x3xf32, #tpu.memory_space<smem>>
    %98 = vector.broadcast %97 : f32 to vector<8x128xf32>
    %99 = arith.mulf %98, %1 : vector<8x128xf32>
    %c7_51 = arith.constant 7 : index
    %c1_52 = arith.constant 1 : index
    %100 = memref.load %arg2[%c7_51, %c1_52] : memref<10x3xf32, #tpu.memory_space<smem>>
    %101 = vector.broadcast %100 : f32 to vector<8x128xf32>
    %102 = arith.mulf %101, %3 : vector<8x128xf32>
    %103 = arith.addf %99, %102 : vector<8x128xf32>
    %c7_53 = arith.constant 7 : index
    %c2_54 = arith.constant 2 : index
    %104 = memref.load %arg2[%c7_53, %c2_54] : memref<10x3xf32, #tpu.memory_space<smem>>
    %105 = vector.broadcast %104 : f32 to vector<8x128xf32>
    %106 = arith.mulf %105, %5 : vector<8x128xf32>
    %107 = arith.addf %103, %106 : vector<8x128xf32>
    %cst_55 = arith.constant 0.000000e+00 : f32
    %108 = vector.broadcast %cst_55 : f32 to vector<8x128xf32>
    %109 = arith.maximumf %107, %108 : vector<8x128xf32>
    %c8 = arith.constant 8 : index
    %c0_56 = arith.constant 0 : index
    %110 = memref.load %arg2[%c8, %c0_56] : memref<10x3xf32, #tpu.memory_space<smem>>
    %111 = vector.broadcast %110 : f32 to vector<8x128xf32>
    %112 = arith.mulf %111, %1 : vector<8x128xf32>
    %c8_57 = arith.constant 8 : index
    %c1_58 = arith.constant 1 : index
    %113 = memref.load %arg2[%c8_57, %c1_58] : memref<10x3xf32, #tpu.memory_space<smem>>
    %114 = vector.broadcast %113 : f32 to vector<8x128xf32>
    %115 = arith.mulf %114, %3 : vector<8x128xf32>
    %116 = arith.addf %112, %115 : vector<8x128xf32>
    %c8_59 = arith.constant 8 : index
    %c2_60 = arith.constant 2 : index
    %117 = memref.load %arg2[%c8_59, %c2_60] : memref<10x3xf32, #tpu.memory_space<smem>>
    %118 = vector.broadcast %117 : f32 to vector<8x128xf32>
    %119 = arith.mulf %118, %5 : vector<8x128xf32>
    %120 = arith.addf %116, %119 : vector<8x128xf32>
    %cst_61 = arith.constant 0.000000e+00 : f32
    %121 = vector.broadcast %cst_61 : f32 to vector<8x128xf32>
    %122 = arith.maximumf %120, %121 : vector<8x128xf32>
    %c9 = arith.constant 9 : index
    %c0_62 = arith.constant 0 : index
    %123 = memref.load %arg2[%c9, %c0_62] : memref<10x3xf32, #tpu.memory_space<smem>>
    %124 = vector.broadcast %123 : f32 to vector<8x128xf32>
    %125 = arith.mulf %124, %1 : vector<8x128xf32>
    %c9_63 = arith.constant 9 : index
    %c1_64 = arith.constant 1 : index
    %126 = memref.load %arg2[%c9_63, %c1_64] : memref<10x3xf32, #tpu.memory_space<smem>>
    %127 = vector.broadcast %126 : f32 to vector<8x128xf32>
    %128 = arith.mulf %127, %3 : vector<8x128xf32>
    %129 = arith.addf %125, %128 : vector<8x128xf32>
    %c9_65 = arith.constant 9 : index
    %c2_66 = arith.constant 2 : index
    %130 = memref.load %arg2[%c9_65, %c2_66] : memref<10x3xf32, #tpu.memory_space<smem>>
    %131 = vector.broadcast %130 : f32 to vector<8x128xf32>
    %132 = arith.mulf %131, %5 : vector<8x128xf32>
    %133 = arith.addf %129, %132 : vector<8x128xf32>
    %cst_67 = arith.constant 0.000000e+00 : f32
    %134 = vector.broadcast %cst_67 : f32 to vector<8x128xf32>
    %135 = arith.maximumf %133, %134 : vector<8x128xf32>
    %c0_68 = arith.constant 0 : index
    %c0_69 = arith.constant 0 : index
    %136 = memref.load %arg3[%c0_68, %c0_69] : memref<10x10xf32, #tpu.memory_space<smem>>
    %137 = vector.broadcast %136 : f32 to vector<8x128xf32>
    %138 = arith.mulf %137, %18 : vector<8x128xf32>
    %c0_70 = arith.constant 0 : index
    %c1_71 = arith.constant 1 : index
    %139 = memref.load %arg3[%c0_70, %c1_71] : memref<10x10xf32, #tpu.memory_space<smem>>
    %140 = vector.broadcast %139 : f32 to vector<8x128xf32>
    %141 = arith.mulf %140, %31 : vector<8x128xf32>
    %142 = arith.addf %138, %141 : vector<8x128xf32>
    %c0_72 = arith.constant 0 : index
    %c2_73 = arith.constant 2 : index
    %143 = memref.load %arg3[%c0_72, %c2_73] : memref<10x10xf32, #tpu.memory_space<smem>>
    %144 = vector.broadcast %143 : f32 to vector<8x128xf32>
    %145 = arith.mulf %144, %44 : vector<8x128xf32>
    %146 = arith.addf %142, %145 : vector<8x128xf32>
    %c0_74 = arith.constant 0 : index
    %c3_75 = arith.constant 3 : index
    %147 = memref.load %arg3[%c0_74, %c3_75] : memref<10x10xf32, #tpu.memory_space<smem>>
    %148 = vector.broadcast %147 : f32 to vector<8x128xf32>
    %149 = arith.mulf %148, %57 : vector<8x128xf32>
    %150 = arith.addf %146, %149 : vector<8x128xf32>
    %c0_76 = arith.constant 0 : index
    %c4_77 = arith.constant 4 : index
    %151 = memref.load %arg3[%c0_76, %c4_77] : memref<10x10xf32, #tpu.memory_space<smem>>
    %152 = vector.broadcast %151 : f32 to vector<8x128xf32>
    %153 = arith.mulf %152, %70 : vector<8x128xf32>
    %154 = arith.addf %150, %153 : vector<8x128xf32>
    %c0_78 = arith.constant 0 : index
    %c5_79 = arith.constant 5 : index
    %155 = memref.load %arg3[%c0_78, %c5_79] : memref<10x10xf32, #tpu.memory_space<smem>>
    %156 = vector.broadcast %155 : f32 to vector<8x128xf32>
    %157 = arith.mulf %156, %83 : vector<8x128xf32>
    %158 = arith.addf %154, %157 : vector<8x128xf32>
    %c0_80 = arith.constant 0 : index
    %c6_81 = arith.constant 6 : index
    %159 = memref.load %arg3[%c0_80, %c6_81] : memref<10x10xf32, #tpu.memory_space<smem>>
    %160 = vector.broadcast %159 : f32 to vector<8x128xf32>
    %161 = arith.mulf %160, %96 : vector<8x128xf32>
    %162 = arith.addf %158, %161 : vector<8x128xf32>
    %c0_82 = arith.constant 0 : index
    %c7_83 = arith.constant 7 : index
    %163 = memref.load %arg3[%c0_82, %c7_83] : memref<10x10xf32, #tpu.memory_space<smem>>
    %164 = vector.broadcast %163 : f32 to vector<8x128xf32>
    %165 = arith.mulf %164, %109 : vector<8x128xf32>
    %166 = arith.addf %162, %165 : vector<8x128xf32>
    %c0_84 = arith.constant 0 : index
    %c8_85 = arith.constant 8 : index
    %167 = memref.load %arg3[%c0_84, %c8_85] : memref<10x10xf32, #tpu.memory_space<smem>>
    %168 = vector.broadcast %167 : f32 to vector<8x128xf32>
    %169 = arith.mulf %168, %122 : vector<8x128xf32>
    %170 = arith.addf %166, %169 : vector<8x128xf32>
    %c0_86 = arith.constant 0 : index
    %c9_87 = arith.constant 9 : index
    %171 = memref.load %arg3[%c0_86, %c9_87] : memref<10x10xf32, #tpu.memory_space<smem>>
    %172 = vector.broadcast %171 : f32 to vector<8x128xf32>
    %173 = arith.mulf %172, %135 : vector<8x128xf32>
    %174 = arith.addf %170, %173 : vector<8x128xf32>
    %cst_88 = arith.constant 0.000000e+00 : f32
    %175 = vector.broadcast %cst_88 : f32 to vector<8x128xf32>
    %176 = arith.maximumf %174, %175 : vector<8x128xf32>
    %c1_89 = arith.constant 1 : index
    %c0_90 = arith.constant 0 : index
    %177 = memref.load %arg3[%c1_89, %c0_90] : memref<10x10xf32, #tpu.memory_space<smem>>
    %178 = vector.broadcast %177 : f32 to vector<8x128xf32>
    %179 = arith.mulf %178, %18 : vector<8x128xf32>
    %c1_91 = arith.constant 1 : index
    %c1_92 = arith.constant 1 : index
    %180 = memref.load %arg3[%c1_91, %c1_92] : memref<10x10xf32, #tpu.memory_space<smem>>
    %181 = vector.broadcast %180 : f32 to vector<8x128xf32>
    %182 = arith.mulf %181, %31 : vector<8x128xf32>
    %183 = arith.addf %179, %182 : vector<8x128xf32>
    %c1_93 = arith.constant 1 : index
    %c2_94 = arith.constant 2 : index
    %184 = memref.load %arg3[%c1_93, %c2_94] : memref<10x10xf32, #tpu.memory_space<smem>>
    %185 = vector.broadcast %184 : f32 to vector<8x128xf32>
    %186 = arith.mulf %185, %44 : vector<8x128xf32>
    %187 = arith.addf %183, %186 : vector<8x128xf32>
    %c1_95 = arith.constant 1 : index
    %c3_96 = arith.constant 3 : index
    %188 = memref.load %arg3[%c1_95, %c3_96] : memref<10x10xf32, #tpu.memory_space<smem>>
    %189 = vector.broadcast %188 : f32 to vector<8x128xf32>
    %190 = arith.mulf %189, %57 : vector<8x128xf32>
    %191 = arith.addf %187, %190 : vector<8x128xf32>
    %c1_97 = arith.constant 1 : index
    %c4_98 = arith.constant 4 : index
    %192 = memref.load %arg3[%c1_97, %c4_98] : memref<10x10xf32, #tpu.memory_space<smem>>
    %193 = vector.broadcast %192 : f32 to vector<8x128xf32>
    %194 = arith.mulf %193, %70 : vector<8x128xf32>
    %195 = arith.addf %191, %194 : vector<8x128xf32>
    %c1_99 = arith.constant 1 : index
    %c5_100 = arith.constant 5 : index
    %196 = memref.load %arg3[%c1_99, %c5_100] : memref<10x10xf32, #tpu.memory_space<smem>>
    %197 = vector.broadcast %196 : f32 to vector<8x128xf32>
    %198 = arith.mulf %197, %83 : vector<8x128xf32>
    %199 = arith.addf %195, %198 : vector<8x128xf32>
    %c1_101 = arith.constant 1 : index
    %c6_102 = arith.constant 6 : index
    %200 = memref.load %arg3[%c1_101, %c6_102] : memref<10x10xf32, #tpu.memory_space<smem>>
    %201 = vector.broadcast %200 : f32 to vector<8x128xf32>
    %202 = arith.mulf %201, %96 : vector<8x128xf32>
    %203 = arith.addf %199, %202 : vector<8x128xf32>
    %c1_103 = arith.constant 1 : index
    %c7_104 = arith.constant 7 : index
    %204 = memref.load %arg3[%c1_103, %c7_104] : memref<10x10xf32, #tpu.memory_space<smem>>
    %205 = vector.broadcast %204 : f32 to vector<8x128xf32>
    %206 = arith.mulf %205, %109 : vector<8x128xf32>
    %207 = arith.addf %203, %206 : vector<8x128xf32>
    %c1_105 = arith.constant 1 : index
    %c8_106 = arith.constant 8 : index
    %208 = memref.load %arg3[%c1_105, %c8_106] : memref<10x10xf32, #tpu.memory_space<smem>>
    %209 = vector.broadcast %208 : f32 to vector<8x128xf32>
    %210 = arith.mulf %209, %122 : vector<8x128xf32>
    %211 = arith.addf %207, %210 : vector<8x128xf32>
    %c1_107 = arith.constant 1 : index
    %c9_108 = arith.constant 9 : index
    %212 = memref.load %arg3[%c1_107, %c9_108] : memref<10x10xf32, #tpu.memory_space<smem>>
    %213 = vector.broadcast %212 : f32 to vector<8x128xf32>
    %214 = arith.mulf %213, %135 : vector<8x128xf32>
    %215 = arith.addf %211, %214 : vector<8x128xf32>
    %cst_109 = arith.constant 0.000000e+00 : f32
    %216 = vector.broadcast %cst_109 : f32 to vector<8x128xf32>
    %217 = arith.maximumf %215, %216 : vector<8x128xf32>
    %c2_110 = arith.constant 2 : index
    %c0_111 = arith.constant 0 : index
    %218 = memref.load %arg3[%c2_110, %c0_111] : memref<10x10xf32, #tpu.memory_space<smem>>
    %219 = vector.broadcast %218 : f32 to vector<8x128xf32>
    %220 = arith.mulf %219, %18 : vector<8x128xf32>
    %c2_112 = arith.constant 2 : index
    %c1_113 = arith.constant 1 : index
    %221 = memref.load %arg3[%c2_112, %c1_113] : memref<10x10xf32, #tpu.memory_space<smem>>
    %222 = vector.broadcast %221 : f32 to vector<8x128xf32>
    %223 = arith.mulf %222, %31 : vector<8x128xf32>
    %224 = arith.addf %220, %223 : vector<8x128xf32>
    %c2_114 = arith.constant 2 : index
    %c2_115 = arith.constant 2 : index
    %225 = memref.load %arg3[%c2_114, %c2_115] : memref<10x10xf32, #tpu.memory_space<smem>>
    %226 = vector.broadcast %225 : f32 to vector<8x128xf32>
    %227 = arith.mulf %226, %44 : vector<8x128xf32>
    %228 = arith.addf %224, %227 : vector<8x128xf32>
    %c2_116 = arith.constant 2 : index
    %c3_117 = arith.constant 3 : index
    %229 = memref.load %arg3[%c2_116, %c3_117] : memref<10x10xf32, #tpu.memory_space<smem>>
    %230 = vector.broadcast %229 : f32 to vector<8x128xf32>
    %231 = arith.mulf %230, %57 : vector<8x128xf32>
    %232 = arith.addf %228, %231 : vector<8x128xf32>
    %c2_118 = arith.constant 2 : index
    %c4_119 = arith.constant 4 : index
    %233 = memref.load %arg3[%c2_118, %c4_119] : memref<10x10xf32, #tpu.memory_space<smem>>
    %234 = vector.broadcast %233 : f32 to vector<8x128xf32>
    %235 = arith.mulf %234, %70 : vector<8x128xf32>
    %236 = arith.addf %232, %235 : vector<8x128xf32>
    %c2_120 = arith.constant 2 : index
    %c5_121 = arith.constant 5 : index
    %237 = memref.load %arg3[%c2_120, %c5_121] : memref<10x10xf32, #tpu.memory_space<smem>>
    %238 = vector.broadcast %237 : f32 to vector<8x128xf32>
    %239 = arith.mulf %238, %83 : vector<8x128xf32>
    %240 = arith.addf %236, %239 : vector<8x128xf32>
    %c2_122 = arith.constant 2 : index
    %c6_123 = arith.constant 6 : index
    %241 = memref.load %arg3[%c2_122, %c6_123] : memref<10x10xf32, #tpu.memory_space<smem>>
    %242 = vector.broadcast %241 : f32 to vector<8x128xf32>
    %243 = arith.mulf %242, %96 : vector<8x128xf32>
    %244 = arith.addf %240, %243 : vector<8x128xf32>
    %c2_124 = arith.constant 2 : index
    %c7_125 = arith.constant 7 : index
    %245 = memref.load %arg3[%c2_124, %c7_125] : memref<10x10xf32, #tpu.memory_space<smem>>
    %246 = vector.broadcast %245 : f32 to vector<8x128xf32>
    %247 = arith.mulf %246, %109 : vector<8x128xf32>
    %248 = arith.addf %244, %247 : vector<8x128xf32>
    %c2_126 = arith.constant 2 : index
    %c8_127 = arith.constant 8 : index
    %249 = memref.load %arg3[%c2_126, %c8_127] : memref<10x10xf32, #tpu.memory_space<smem>>
    %250 = vector.broadcast %249 : f32 to vector<8x128xf32>
    %251 = arith.mulf %250, %122 : vector<8x128xf32>
    %252 = arith.addf %248, %251 : vector<8x128xf32>
    %c2_128 = arith.constant 2 : index
    %c9_129 = arith.constant 9 : index
    %253 = memref.load %arg3[%c2_128, %c9_129] : memref<10x10xf32, #tpu.memory_space<smem>>
    %254 = vector.broadcast %253 : f32 to vector<8x128xf32>
    %255 = arith.mulf %254, %135 : vector<8x128xf32>
    %256 = arith.addf %252, %255 : vector<8x128xf32>
    %cst_130 = arith.constant 0.000000e+00 : f32
    %257 = vector.broadcast %cst_130 : f32 to vector<8x128xf32>
    %258 = arith.maximumf %256, %257 : vector<8x128xf32>
    %c3_131 = arith.constant 3 : index
    %c0_132 = arith.constant 0 : index
    %259 = memref.load %arg3[%c3_131, %c0_132] : memref<10x10xf32, #tpu.memory_space<smem>>
    %260 = vector.broadcast %259 : f32 to vector<8x128xf32>
    %261 = arith.mulf %260, %18 : vector<8x128xf32>
    %c3_133 = arith.constant 3 : index
    %c1_134 = arith.constant 1 : index
    %262 = memref.load %arg3[%c3_133, %c1_134] : memref<10x10xf32, #tpu.memory_space<smem>>
    %263 = vector.broadcast %262 : f32 to vector<8x128xf32>
    %264 = arith.mulf %263, %31 : vector<8x128xf32>
    %265 = arith.addf %261, %264 : vector<8x128xf32>
    %c3_135 = arith.constant 3 : index
    %c2_136 = arith.constant 2 : index
    %266 = memref.load %arg3[%c3_135, %c2_136] : memref<10x10xf32, #tpu.memory_space<smem>>
    %267 = vector.broadcast %266 : f32 to vector<8x128xf32>
    %268 = arith.mulf %267, %44 : vector<8x128xf32>
    %269 = arith.addf %265, %268 : vector<8x128xf32>
    %c3_137 = arith.constant 3 : index
    %c3_138 = arith.constant 3 : index
    %270 = memref.load %arg3[%c3_137, %c3_138] : memref<10x10xf32, #tpu.memory_space<smem>>
    %271 = vector.broadcast %270 : f32 to vector<8x128xf32>
    %272 = arith.mulf %271, %57 : vector<8x128xf32>
    %273 = arith.addf %269, %272 : vector<8x128xf32>
    %c3_139 = arith.constant 3 : index
    %c4_140 = arith.constant 4 : index
    %274 = memref.load %arg3[%c3_139, %c4_140] : memref<10x10xf32, #tpu.memory_space<smem>>
    %275 = vector.broadcast %274 : f32 to vector<8x128xf32>
    %276 = arith.mulf %275, %70 : vector<8x128xf32>
    %277 = arith.addf %273, %276 : vector<8x128xf32>
    %c3_141 = arith.constant 3 : index
    %c5_142 = arith.constant 5 : index
    %278 = memref.load %arg3[%c3_141, %c5_142] : memref<10x10xf32, #tpu.memory_space<smem>>
    %279 = vector.broadcast %278 : f32 to vector<8x128xf32>
    %280 = arith.mulf %279, %83 : vector<8x128xf32>
    %281 = arith.addf %277, %280 : vector<8x128xf32>
    %c3_143 = arith.constant 3 : index
    %c6_144 = arith.constant 6 : index
    %282 = memref.load %arg3[%c3_143, %c6_144] : memref<10x10xf32, #tpu.memory_space<smem>>
    %283 = vector.broadcast %282 : f32 to vector<8x128xf32>
    %284 = arith.mulf %283, %96 : vector<8x128xf32>
    %285 = arith.addf %281, %284 : vector<8x128xf32>
    %c3_145 = arith.constant 3 : index
    %c7_146 = arith.constant 7 : index
    %286 = memref.load %arg3[%c3_145, %c7_146] : memref<10x10xf32, #tpu.memory_space<smem>>
    %287 = vector.broadcast %286 : f32 to vector<8x128xf32>
    %288 = arith.mulf %287, %109 : vector<8x128xf32>
    %289 = arith.addf %285, %288 : vector<8x128xf32>
    %c3_147 = arith.constant 3 : index
    %c8_148 = arith.constant 8 : index
    %290 = memref.load %arg3[%c3_147, %c8_148] : memref<10x10xf32, #tpu.memory_space<smem>>
    %291 = vector.broadcast %290 : f32 to vector<8x128xf32>
    %292 = arith.mulf %291, %122 : vector<8x128xf32>
    %293 = arith.addf %289, %292 : vector<8x128xf32>
    %c3_149 = arith.constant 3 : index
    %c9_150 = arith.constant 9 : index
    %294 = memref.load %arg3[%c3_149, %c9_150] : memref<10x10xf32, #tpu.memory_space<smem>>
    %295 = vector.broadcast %294 : f32 to vector<8x128xf32>
    %296 = arith.mulf %295, %135 : vector<8x128xf32>
    %297 = arith.addf %293, %296 : vector<8x128xf32>
    %cst_151 = arith.constant 0.000000e+00 : f32
    %298 = vector.broadcast %cst_151 : f32 to vector<8x128xf32>
    %299 = arith.maximumf %297, %298 : vector<8x128xf32>
    %c4_152 = arith.constant 4 : index
    %c0_153 = arith.constant 0 : index
    %300 = memref.load %arg3[%c4_152, %c0_153] : memref<10x10xf32, #tpu.memory_space<smem>>
    %301 = vector.broadcast %300 : f32 to vector<8x128xf32>
    %302 = arith.mulf %301, %18 : vector<8x128xf32>
    %c4_154 = arith.constant 4 : index
    %c1_155 = arith.constant 1 : index
    %303 = memref.load %arg3[%c4_154, %c1_155] : memref<10x10xf32, #tpu.memory_space<smem>>
    %304 = vector.broadcast %303 : f32 to vector<8x128xf32>
    %305 = arith.mulf %304, %31 : vector<8x128xf32>
    %306 = arith.addf %302, %305 : vector<8x128xf32>
    %c4_156 = arith.constant 4 : index
    %c2_157 = arith.constant 2 : index
    %307 = memref.load %arg3[%c4_156, %c2_157] : memref<10x10xf32, #tpu.memory_space<smem>>
    %308 = vector.broadcast %307 : f32 to vector<8x128xf32>
    %309 = arith.mulf %308, %44 : vector<8x128xf32>
    %310 = arith.addf %306, %309 : vector<8x128xf32>
    %c4_158 = arith.constant 4 : index
    %c3_159 = arith.constant 3 : index
    %311 = memref.load %arg3[%c4_158, %c3_159] : memref<10x10xf32, #tpu.memory_space<smem>>
    %312 = vector.broadcast %311 : f32 to vector<8x128xf32>
    %313 = arith.mulf %312, %57 : vector<8x128xf32>
    %314 = arith.addf %310, %313 : vector<8x128xf32>
    %c4_160 = arith.constant 4 : index
    %c4_161 = arith.constant 4 : index
    %315 = memref.load %arg3[%c4_160, %c4_161] : memref<10x10xf32, #tpu.memory_space<smem>>
    %316 = vector.broadcast %315 : f32 to vector<8x128xf32>
    %317 = arith.mulf %316, %70 : vector<8x128xf32>
    %318 = arith.addf %314, %317 : vector<8x128xf32>
    %c4_162 = arith.constant 4 : index
    %c5_163 = arith.constant 5 : index
    %319 = memref.load %arg3[%c4_162, %c5_163] : memref<10x10xf32, #tpu.memory_space<smem>>
    %320 = vector.broadcast %319 : f32 to vector<8x128xf32>
    %321 = arith.mulf %320, %83 : vector<8x128xf32>
    %322 = arith.addf %318, %321 : vector<8x128xf32>
    %c4_164 = arith.constant 4 : index
    %c6_165 = arith.constant 6 : index
    %323 = memref.load %arg3[%c4_164, %c6_165] : memref<10x10xf32, #tpu.memory_space<smem>>
    %324 = vector.broadcast %323 : f32 to vector<8x128xf32>
    %325 = arith.mulf %324, %96 : vector<8x128xf32>
    %326 = arith.addf %322, %325 : vector<8x128xf32>
    %c4_166 = arith.constant 4 : index
    %c7_167 = arith.constant 7 : index
    %327 = memref.load %arg3[%c4_166, %c7_167] : memref<10x10xf32, #tpu.memory_space<smem>>
    %328 = vector.broadcast %327 : f32 to vector<8x128xf32>
    %329 = arith.mulf %328, %109 : vector<8x128xf32>
    %330 = arith.addf %326, %329 : vector<8x128xf32>
    %c4_168 = arith.constant 4 : index
    %c8_169 = arith.constant 8 : index
    %331 = memref.load %arg3[%c4_168, %c8_169] : memref<10x10xf32, #tpu.memory_space<smem>>
    %332 = vector.broadcast %331 : f32 to vector<8x128xf32>
    %333 = arith.mulf %332, %122 : vector<8x128xf32>
    %334 = arith.addf %330, %333 : vector<8x128xf32>
    %c4_170 = arith.constant 4 : index
    %c9_171 = arith.constant 9 : index
    %335 = memref.load %arg3[%c4_170, %c9_171] : memref<10x10xf32, #tpu.memory_space<smem>>
    %336 = vector.broadcast %335 : f32 to vector<8x128xf32>
    %337 = arith.mulf %336, %135 : vector<8x128xf32>
    %338 = arith.addf %334, %337 : vector<8x128xf32>
    %cst_172 = arith.constant 0.000000e+00 : f32
    %339 = vector.broadcast %cst_172 : f32 to vector<8x128xf32>
    %340 = arith.maximumf %338, %339 : vector<8x128xf32>
    %c5_173 = arith.constant 5 : index
    %c0_174 = arith.constant 0 : index
    %341 = memref.load %arg3[%c5_173, %c0_174] : memref<10x10xf32, #tpu.memory_space<smem>>
    %342 = vector.broadcast %341 : f32 to vector<8x128xf32>
    %343 = arith.mulf %342, %18 : vector<8x128xf32>
    %c5_175 = arith.constant 5 : index
    %c1_176 = arith.constant 1 : index
    %344 = memref.load %arg3[%c5_175, %c1_176] : memref<10x10xf32, #tpu.memory_space<smem>>
    %345 = vector.broadcast %344 : f32 to vector<8x128xf32>
    %346 = arith.mulf %345, %31 : vector<8x128xf32>
    %347 = arith.addf %343, %346 : vector<8x128xf32>
    %c5_177 = arith.constant 5 : index
    %c2_178 = arith.constant 2 : index
    %348 = memref.load %arg3[%c5_177, %c2_178] : memref<10x10xf32, #tpu.memory_space<smem>>
    %349 = vector.broadcast %348 : f32 to vector<8x128xf32>
    %350 = arith.mulf %349, %44 : vector<8x128xf32>
    %351 = arith.addf %347, %350 : vector<8x128xf32>
    %c5_179 = arith.constant 5 : index
    %c3_180 = arith.constant 3 : index
    %352 = memref.load %arg3[%c5_179, %c3_180] : memref<10x10xf32, #tpu.memory_space<smem>>
    %353 = vector.broadcast %352 : f32 to vector<8x128xf32>
    %354 = arith.mulf %353, %57 : vector<8x128xf32>
    %355 = arith.addf %351, %354 : vector<8x128xf32>
    %c5_181 = arith.constant 5 : index
    %c4_182 = arith.constant 4 : index
    %356 = memref.load %arg3[%c5_181, %c4_182] : memref<10x10xf32, #tpu.memory_space<smem>>
    %357 = vector.broadcast %356 : f32 to vector<8x128xf32>
    %358 = arith.mulf %357, %70 : vector<8x128xf32>
    %359 = arith.addf %355, %358 : vector<8x128xf32>
    %c5_183 = arith.constant 5 : index
    %c5_184 = arith.constant 5 : index
    %360 = memref.load %arg3[%c5_183, %c5_184] : memref<10x10xf32, #tpu.memory_space<smem>>
    %361 = vector.broadcast %360 : f32 to vector<8x128xf32>
    %362 = arith.mulf %361, %83 : vector<8x128xf32>
    %363 = arith.addf %359, %362 : vector<8x128xf32>
    %c5_185 = arith.constant 5 : index
    %c6_186 = arith.constant 6 : index
    %364 = memref.load %arg3[%c5_185, %c6_186] : memref<10x10xf32, #tpu.memory_space<smem>>
    %365 = vector.broadcast %364 : f32 to vector<8x128xf32>
    %366 = arith.mulf %365, %96 : vector<8x128xf32>
    %367 = arith.addf %363, %366 : vector<8x128xf32>
    %c5_187 = arith.constant 5 : index
    %c7_188 = arith.constant 7 : index
    %368 = memref.load %arg3[%c5_187, %c7_188] : memref<10x10xf32, #tpu.memory_space<smem>>
    %369 = vector.broadcast %368 : f32 to vector<8x128xf32>
    %370 = arith.mulf %369, %109 : vector<8x128xf32>
    %371 = arith.addf %367, %370 : vector<8x128xf32>
    %c5_189 = arith.constant 5 : index
    %c8_190 = arith.constant 8 : index
    %372 = memref.load %arg3[%c5_189, %c8_190] : memref<10x10xf32, #tpu.memory_space<smem>>
    %373 = vector.broadcast %372 : f32 to vector<8x128xf32>
    %374 = arith.mulf %373, %122 : vector<8x128xf32>
    %375 = arith.addf %371, %374 : vector<8x128xf32>
    %c5_191 = arith.constant 5 : index
    %c9_192 = arith.constant 9 : index
    %376 = memref.load %arg3[%c5_191, %c9_192] : memref<10x10xf32, #tpu.memory_space<smem>>
    %377 = vector.broadcast %376 : f32 to vector<8x128xf32>
    %378 = arith.mulf %377, %135 : vector<8x128xf32>
    %379 = arith.addf %375, %378 : vector<8x128xf32>
    %cst_193 = arith.constant 0.000000e+00 : f32
    %380 = vector.broadcast %cst_193 : f32 to vector<8x128xf32>
    %381 = arith.maximumf %379, %380 : vector<8x128xf32>
    %c6_194 = arith.constant 6 : index
    %c0_195 = arith.constant 0 : index
    %382 = memref.load %arg3[%c6_194, %c0_195] : memref<10x10xf32, #tpu.memory_space<smem>>
    %383 = vector.broadcast %382 : f32 to vector<8x128xf32>
    %384 = arith.mulf %383, %18 : vector<8x128xf32>
    %c6_196 = arith.constant 6 : index
    %c1_197 = arith.constant 1 : index
    %385 = memref.load %arg3[%c6_196, %c1_197] : memref<10x10xf32, #tpu.memory_space<smem>>
    %386 = vector.broadcast %385 : f32 to vector<8x128xf32>
    %387 = arith.mulf %386, %31 : vector<8x128xf32>
    %388 = arith.addf %384, %387 : vector<8x128xf32>
    %c6_198 = arith.constant 6 : index
    %c2_199 = arith.constant 2 : index
    %389 = memref.load %arg3[%c6_198, %c2_199] : memref<10x10xf32, #tpu.memory_space<smem>>
    %390 = vector.broadcast %389 : f32 to vector<8x128xf32>
    %391 = arith.mulf %390, %44 : vector<8x128xf32>
    %392 = arith.addf %388, %391 : vector<8x128xf32>
    %c6_200 = arith.constant 6 : index
    %c3_201 = arith.constant 3 : index
    %393 = memref.load %arg3[%c6_200, %c3_201] : memref<10x10xf32, #tpu.memory_space<smem>>
    %394 = vector.broadcast %393 : f32 to vector<8x128xf32>
    %395 = arith.mulf %394, %57 : vector<8x128xf32>
    %396 = arith.addf %392, %395 : vector<8x128xf32>
    %c6_202 = arith.constant 6 : index
    %c4_203 = arith.constant 4 : index
    %397 = memref.load %arg3[%c6_202, %c4_203] : memref<10x10xf32, #tpu.memory_space<smem>>
    %398 = vector.broadcast %397 : f32 to vector<8x128xf32>
    %399 = arith.mulf %398, %70 : vector<8x128xf32>
    %400 = arith.addf %396, %399 : vector<8x128xf32>
    %c6_204 = arith.constant 6 : index
    %c5_205 = arith.constant 5 : index
    %401 = memref.load %arg3[%c6_204, %c5_205] : memref<10x10xf32, #tpu.memory_space<smem>>
    %402 = vector.broadcast %401 : f32 to vector<8x128xf32>
    %403 = arith.mulf %402, %83 : vector<8x128xf32>
    %404 = arith.addf %400, %403 : vector<8x128xf32>
    %c6_206 = arith.constant 6 : index
    %c6_207 = arith.constant 6 : index
    %405 = memref.load %arg3[%c6_206, %c6_207] : memref<10x10xf32, #tpu.memory_space<smem>>
    %406 = vector.broadcast %405 : f32 to vector<8x128xf32>
    %407 = arith.mulf %406, %96 : vector<8x128xf32>
    %408 = arith.addf %404, %407 : vector<8x128xf32>
    %c6_208 = arith.constant 6 : index
    %c7_209 = arith.constant 7 : index
    %409 = memref.load %arg3[%c6_208, %c7_209] : memref<10x10xf32, #tpu.memory_space<smem>>
    %410 = vector.broadcast %409 : f32 to vector<8x128xf32>
    %411 = arith.mulf %410, %109 : vector<8x128xf32>
    %412 = arith.addf %408, %411 : vector<8x128xf32>
    %c6_210 = arith.constant 6 : index
    %c8_211 = arith.constant 8 : index
    %413 = memref.load %arg3[%c6_210, %c8_211] : memref<10x10xf32, #tpu.memory_space<smem>>
    %414 = vector.broadcast %413 : f32 to vector<8x128xf32>
    %415 = arith.mulf %414, %122 : vector<8x128xf32>
    %416 = arith.addf %412, %415 : vector<8x128xf32>
    %c6_212 = arith.constant 6 : index
    %c9_213 = arith.constant 9 : index
    %417 = memref.load %arg3[%c6_212, %c9_213] : memref<10x10xf32, #tpu.memory_space<smem>>
    %418 = vector.broadcast %417 : f32 to vector<8x128xf32>
    %419 = arith.mulf %418, %135 : vector<8x128xf32>
    %420 = arith.addf %416, %419 : vector<8x128xf32>
    %cst_214 = arith.constant 0.000000e+00 : f32
    %421 = vector.broadcast %cst_214 : f32 to vector<8x128xf32>
    %422 = arith.maximumf %420, %421 : vector<8x128xf32>
    %c7_215 = arith.constant 7 : index
    %c0_216 = arith.constant 0 : index
    %423 = memref.load %arg3[%c7_215, %c0_216] : memref<10x10xf32, #tpu.memory_space<smem>>
    %424 = vector.broadcast %423 : f32 to vector<8x128xf32>
    %425 = arith.mulf %424, %18 : vector<8x128xf32>
    %c7_217 = arith.constant 7 : index
    %c1_218 = arith.constant 1 : index
    %426 = memref.load %arg3[%c7_217, %c1_218] : memref<10x10xf32, #tpu.memory_space<smem>>
    %427 = vector.broadcast %426 : f32 to vector<8x128xf32>
    %428 = arith.mulf %427, %31 : vector<8x128xf32>
    %429 = arith.addf %425, %428 : vector<8x128xf32>
    %c7_219 = arith.constant 7 : index
    %c2_220 = arith.constant 2 : index
    %430 = memref.load %arg3[%c7_219, %c2_220] : memref<10x10xf32, #tpu.memory_space<smem>>
    %431 = vector.broadcast %430 : f32 to vector<8x128xf32>
    %432 = arith.mulf %431, %44 : vector<8x128xf32>
    %433 = arith.addf %429, %432 : vector<8x128xf32>
    %c7_221 = arith.constant 7 : index
    %c3_222 = arith.constant 3 : index
    %434 = memref.load %arg3[%c7_221, %c3_222] : memref<10x10xf32, #tpu.memory_space<smem>>
    %435 = vector.broadcast %434 : f32 to vector<8x128xf32>
    %436 = arith.mulf %435, %57 : vector<8x128xf32>
    %437 = arith.addf %433, %436 : vector<8x128xf32>
    %c7_223 = arith.constant 7 : index
    %c4_224 = arith.constant 4 : index
    %438 = memref.load %arg3[%c7_223, %c4_224] : memref<10x10xf32, #tpu.memory_space<smem>>
    %439 = vector.broadcast %438 : f32 to vector<8x128xf32>
    %440 = arith.mulf %439, %70 : vector<8x128xf32>
    %441 = arith.addf %437, %440 : vector<8x128xf32>
    %c7_225 = arith.constant 7 : index
    %c5_226 = arith.constant 5 : index
    %442 = memref.load %arg3[%c7_225, %c5_226] : memref<10x10xf32, #tpu.memory_space<smem>>
    %443 = vector.broadcast %442 : f32 to vector<8x128xf32>
    %444 = arith.mulf %443, %83 : vector<8x128xf32>
    %445 = arith.addf %441, %444 : vector<8x128xf32>
    %c7_227 = arith.constant 7 : index
    %c6_228 = arith.constant 6 : index
    %446 = memref.load %arg3[%c7_227, %c6_228] : memref<10x10xf32, #tpu.memory_space<smem>>
    %447 = vector.broadcast %446 : f32 to vector<8x128xf32>
    %448 = arith.mulf %447, %96 : vector<8x128xf32>
    %449 = arith.addf %445, %448 : vector<8x128xf32>
    %c7_229 = arith.constant 7 : index
    %c7_230 = arith.constant 7 : index
    %450 = memref.load %arg3[%c7_229, %c7_230] : memref<10x10xf32, #tpu.memory_space<smem>>
    %451 = vector.broadcast %450 : f32 to vector<8x128xf32>
    %452 = arith.mulf %451, %109 : vector<8x128xf32>
    %453 = arith.addf %449, %452 : vector<8x128xf32>
    %c7_231 = arith.constant 7 : index
    %c8_232 = arith.constant 8 : index
    %454 = memref.load %arg3[%c7_231, %c8_232] : memref<10x10xf32, #tpu.memory_space<smem>>
    %455 = vector.broadcast %454 : f32 to vector<8x128xf32>
    %456 = arith.mulf %455, %122 : vector<8x128xf32>
    %457 = arith.addf %453, %456 : vector<8x128xf32>
    %c7_233 = arith.constant 7 : index
    %c9_234 = arith.constant 9 : index
    %458 = memref.load %arg3[%c7_233, %c9_234] : memref<10x10xf32, #tpu.memory_space<smem>>
    %459 = vector.broadcast %458 : f32 to vector<8x128xf32>
    %460 = arith.mulf %459, %135 : vector<8x128xf32>
    %461 = arith.addf %457, %460 : vector<8x128xf32>
    %cst_235 = arith.constant 0.000000e+00 : f32
    %462 = vector.broadcast %cst_235 : f32 to vector<8x128xf32>
    %463 = arith.maximumf %461, %462 : vector<8x128xf32>
    %c8_236 = arith.constant 8 : index
    %c0_237 = arith.constant 0 : index
    %464 = memref.load %arg3[%c8_236, %c0_237] : memref<10x10xf32, #tpu.memory_space<smem>>
    %465 = vector.broadcast %464 : f32 to vector<8x128xf32>
    %466 = arith.mulf %465, %18 : vector<8x128xf32>
    %c8_238 = arith.constant 8 : index
    %c1_239 = arith.constant 1 : index
    %467 = memref.load %arg3[%c8_238, %c1_239] : memref<10x10xf32, #tpu.memory_space<smem>>
    %468 = vector.broadcast %467 : f32 to vector<8x128xf32>
    %469 = arith.mulf %468, %31 : vector<8x128xf32>
    %470 = arith.addf %466, %469 : vector<8x128xf32>
    %c8_240 = arith.constant 8 : index
    %c2_241 = arith.constant 2 : index
    %471 = memref.load %arg3[%c8_240, %c2_241] : memref<10x10xf32, #tpu.memory_space<smem>>
    %472 = vector.broadcast %471 : f32 to vector<8x128xf32>
    %473 = arith.mulf %472, %44 : vector<8x128xf32>
    %474 = arith.addf %470, %473 : vector<8x128xf32>
    %c8_242 = arith.constant 8 : index
    %c3_243 = arith.constant 3 : index
    %475 = memref.load %arg3[%c8_242, %c3_243] : memref<10x10xf32, #tpu.memory_space<smem>>
    %476 = vector.broadcast %475 : f32 to vector<8x128xf32>
    %477 = arith.mulf %476, %57 : vector<8x128xf32>
    %478 = arith.addf %474, %477 : vector<8x128xf32>
    %c8_244 = arith.constant 8 : index
    %c4_245 = arith.constant 4 : index
    %479 = memref.load %arg3[%c8_244, %c4_245] : memref<10x10xf32, #tpu.memory_space<smem>>
    %480 = vector.broadcast %479 : f32 to vector<8x128xf32>
    %481 = arith.mulf %480, %70 : vector<8x128xf32>
    %482 = arith.addf %478, %481 : vector<8x128xf32>
    %c8_246 = arith.constant 8 : index
    %c5_247 = arith.constant 5 : index
    %483 = memref.load %arg3[%c8_246, %c5_247] : memref<10x10xf32, #tpu.memory_space<smem>>
    %484 = vector.broadcast %483 : f32 to vector<8x128xf32>
    %485 = arith.mulf %484, %83 : vector<8x128xf32>
    %486 = arith.addf %482, %485 : vector<8x128xf32>
    %c8_248 = arith.constant 8 : index
    %c6_249 = arith.constant 6 : index
    %487 = memref.load %arg3[%c8_248, %c6_249] : memref<10x10xf32, #tpu.memory_space<smem>>
    %488 = vector.broadcast %487 : f32 to vector<8x128xf32>
    %489 = arith.mulf %488, %96 : vector<8x128xf32>
    %490 = arith.addf %486, %489 : vector<8x128xf32>
    %c8_250 = arith.constant 8 : index
    %c7_251 = arith.constant 7 : index
    %491 = memref.load %arg3[%c8_250, %c7_251] : memref<10x10xf32, #tpu.memory_space<smem>>
    %492 = vector.broadcast %491 : f32 to vector<8x128xf32>
    %493 = arith.mulf %492, %109 : vector<8x128xf32>
    %494 = arith.addf %490, %493 : vector<8x128xf32>
    %c8_252 = arith.constant 8 : index
    %c8_253 = arith.constant 8 : index
    %495 = memref.load %arg3[%c8_252, %c8_253] : memref<10x10xf32, #tpu.memory_space<smem>>
    %496 = vector.broadcast %495 : f32 to vector<8x128xf32>
    %497 = arith.mulf %496, %122 : vector<8x128xf32>
    %498 = arith.addf %494, %497 : vector<8x128xf32>
    %c8_254 = arith.constant 8 : index
    %c9_255 = arith.constant 9 : index
    %499 = memref.load %arg3[%c8_254, %c9_255] : memref<10x10xf32, #tpu.memory_space<smem>>
    %500 = vector.broadcast %499 : f32 to vector<8x128xf32>
    %501 = arith.mulf %500, %135 : vector<8x128xf32>
    %502 = arith.addf %498, %501 : vector<8x128xf32>
    %cst_256 = arith.constant 0.000000e+00 : f32
    %503 = vector.broadcast %cst_256 : f32 to vector<8x128xf32>
    %504 = arith.maximumf %502, %503 : vector<8x128xf32>
    %c9_257 = arith.constant 9 : index
    %c0_258 = arith.constant 0 : index
    %505 = memref.load %arg3[%c9_257, %c0_258] : memref<10x10xf32, #tpu.memory_space<smem>>
    %506 = vector.broadcast %505 : f32 to vector<8x128xf32>
    %507 = arith.mulf %506, %18 : vector<8x128xf32>
    %c9_259 = arith.constant 9 : index
    %c1_260 = arith.constant 1 : index
    %508 = memref.load %arg3[%c9_259, %c1_260] : memref<10x10xf32, #tpu.memory_space<smem>>
    %509 = vector.broadcast %508 : f32 to vector<8x128xf32>
    %510 = arith.mulf %509, %31 : vector<8x128xf32>
    %511 = arith.addf %507, %510 : vector<8x128xf32>
    %c9_261 = arith.constant 9 : index
    %c2_262 = arith.constant 2 : index
    %512 = memref.load %arg3[%c9_261, %c2_262] : memref<10x10xf32, #tpu.memory_space<smem>>
    %513 = vector.broadcast %512 : f32 to vector<8x128xf32>
    %514 = arith.mulf %513, %44 : vector<8x128xf32>
    %515 = arith.addf %511, %514 : vector<8x128xf32>
    %c9_263 = arith.constant 9 : index
    %c3_264 = arith.constant 3 : index
    %516 = memref.load %arg3[%c9_263, %c3_264] : memref<10x10xf32, #tpu.memory_space<smem>>
    %517 = vector.broadcast %516 : f32 to vector<8x128xf32>
    %518 = arith.mulf %517, %57 : vector<8x128xf32>
    %519 = arith.addf %515, %518 : vector<8x128xf32>
    %c9_265 = arith.constant 9 : index
    %c4_266 = arith.constant 4 : index
    %520 = memref.load %arg3[%c9_265, %c4_266] : memref<10x10xf32, #tpu.memory_space<smem>>
    %521 = vector.broadcast %520 : f32 to vector<8x128xf32>
    %522 = arith.mulf %521, %70 : vector<8x128xf32>
    %523 = arith.addf %519, %522 : vector<8x128xf32>
    %c9_267 = arith.constant 9 : index
    %c5_268 = arith.constant 5 : index
    %524 = memref.load %arg3[%c9_267, %c5_268] : memref<10x10xf32, #tpu.memory_space<smem>>
    %525 = vector.broadcast %524 : f32 to vector<8x128xf32>
    %526 = arith.mulf %525, %83 : vector<8x128xf32>
    %527 = arith.addf %523, %526 : vector<8x128xf32>
    %c9_269 = arith.constant 9 : index
    %c6_270 = arith.constant 6 : index
    %528 = memref.load %arg3[%c9_269, %c6_270] : memref<10x10xf32, #tpu.memory_space<smem>>
    %529 = vector.broadcast %528 : f32 to vector<8x128xf32>
    %530 = arith.mulf %529, %96 : vector<8x128xf32>
    %531 = arith.addf %527, %530 : vector<8x128xf32>
    %c9_271 = arith.constant 9 : index
    %c7_272 = arith.constant 7 : index
    %532 = memref.load %arg3[%c9_271, %c7_272] : memref<10x10xf32, #tpu.memory_space<smem>>
    %533 = vector.broadcast %532 : f32 to vector<8x128xf32>
    %534 = arith.mulf %533, %109 : vector<8x128xf32>
    %535 = arith.addf %531, %534 : vector<8x128xf32>
    %c9_273 = arith.constant 9 : index
    %c8_274 = arith.constant 8 : index
    %536 = memref.load %arg3[%c9_273, %c8_274] : memref<10x10xf32, #tpu.memory_space<smem>>
    %537 = vector.broadcast %536 : f32 to vector<8x128xf32>
    %538 = arith.mulf %537, %122 : vector<8x128xf32>
    %539 = arith.addf %535, %538 : vector<8x128xf32>
    %c9_275 = arith.constant 9 : index
    %c9_276 = arith.constant 9 : index
    %540 = memref.load %arg3[%c9_275, %c9_276] : memref<10x10xf32, #tpu.memory_space<smem>>
    %541 = vector.broadcast %540 : f32 to vector<8x128xf32>
    %542 = arith.mulf %541, %135 : vector<8x128xf32>
    %543 = arith.addf %539, %542 : vector<8x128xf32>
    %cst_277 = arith.constant 0.000000e+00 : f32
    %544 = vector.broadcast %cst_277 : f32 to vector<8x128xf32>
    %545 = arith.maximumf %543, %544 : vector<8x128xf32>
    %c0_278 = arith.constant 0 : index
    %c0_279 = arith.constant 0 : index
    %546 = memref.load %arg4[%c0_278, %c0_279] : memref<10x10xf32, #tpu.memory_space<smem>>
    %547 = vector.broadcast %546 : f32 to vector<8x128xf32>
    %548 = arith.mulf %547, %176 : vector<8x128xf32>
    %c0_280 = arith.constant 0 : index
    %c1_281 = arith.constant 1 : index
    %549 = memref.load %arg4[%c0_280, %c1_281] : memref<10x10xf32, #tpu.memory_space<smem>>
    %550 = vector.broadcast %549 : f32 to vector<8x128xf32>
    %551 = arith.mulf %550, %217 : vector<8x128xf32>
    %552 = arith.addf %548, %551 : vector<8x128xf32>
    %c0_282 = arith.constant 0 : index
    %c2_283 = arith.constant 2 : index
    %553 = memref.load %arg4[%c0_282, %c2_283] : memref<10x10xf32, #tpu.memory_space<smem>>
    %554 = vector.broadcast %553 : f32 to vector<8x128xf32>
    %555 = arith.mulf %554, %258 : vector<8x128xf32>
    %556 = arith.addf %552, %555 : vector<8x128xf32>
    %c0_284 = arith.constant 0 : index
    %c3_285 = arith.constant 3 : index
    %557 = memref.load %arg4[%c0_284, %c3_285] : memref<10x10xf32, #tpu.memory_space<smem>>
    %558 = vector.broadcast %557 : f32 to vector<8x128xf32>
    %559 = arith.mulf %558, %299 : vector<8x128xf32>
    %560 = arith.addf %556, %559 : vector<8x128xf32>
    %c0_286 = arith.constant 0 : index
    %c4_287 = arith.constant 4 : index
    %561 = memref.load %arg4[%c0_286, %c4_287] : memref<10x10xf32, #tpu.memory_space<smem>>
    %562 = vector.broadcast %561 : f32 to vector<8x128xf32>
    %563 = arith.mulf %562, %340 : vector<8x128xf32>
    %564 = arith.addf %560, %563 : vector<8x128xf32>
    %c0_288 = arith.constant 0 : index
    %c5_289 = arith.constant 5 : index
    %565 = memref.load %arg4[%c0_288, %c5_289] : memref<10x10xf32, #tpu.memory_space<smem>>
    %566 = vector.broadcast %565 : f32 to vector<8x128xf32>
    %567 = arith.mulf %566, %381 : vector<8x128xf32>
    %568 = arith.addf %564, %567 : vector<8x128xf32>
    %c0_290 = arith.constant 0 : index
    %c6_291 = arith.constant 6 : index
    %569 = memref.load %arg4[%c0_290, %c6_291] : memref<10x10xf32, #tpu.memory_space<smem>>
    %570 = vector.broadcast %569 : f32 to vector<8x128xf32>
    %571 = arith.mulf %570, %422 : vector<8x128xf32>
    %572 = arith.addf %568, %571 : vector<8x128xf32>
    %c0_292 = arith.constant 0 : index
    %c7_293 = arith.constant 7 : index
    %573 = memref.load %arg4[%c0_292, %c7_293] : memref<10x10xf32, #tpu.memory_space<smem>>
    %574 = vector.broadcast %573 : f32 to vector<8x128xf32>
    %575 = arith.mulf %574, %463 : vector<8x128xf32>
    %576 = arith.addf %572, %575 : vector<8x128xf32>
    %c0_294 = arith.constant 0 : index
    %c8_295 = arith.constant 8 : index
    %577 = memref.load %arg4[%c0_294, %c8_295] : memref<10x10xf32, #tpu.memory_space<smem>>
    %578 = vector.broadcast %577 : f32 to vector<8x128xf32>
    %579 = arith.mulf %578, %504 : vector<8x128xf32>
    %580 = arith.addf %576, %579 : vector<8x128xf32>
    %c0_296 = arith.constant 0 : index
    %c9_297 = arith.constant 9 : index
    %581 = memref.load %arg4[%c0_296, %c9_297] : memref<10x10xf32, #tpu.memory_space<smem>>
    %582 = vector.broadcast %581 : f32 to vector<8x128xf32>
    %583 = arith.mulf %582, %545 : vector<8x128xf32>
    %584 = arith.addf %580, %583 : vector<8x128xf32>
    %cst_298 = arith.constant 0.000000e+00 : f32
    %585 = vector.broadcast %cst_298 : f32 to vector<8x128xf32>
    %586 = arith.maximumf %584, %585 : vector<8x128xf32>
    %c1_299 = arith.constant 1 : index
    %c0_300 = arith.constant 0 : index
    %587 = memref.load %arg4[%c1_299, %c0_300] : memref<10x10xf32, #tpu.memory_space<smem>>
    %588 = vector.broadcast %587 : f32 to vector<8x128xf32>
    %589 = arith.mulf %588, %176 : vector<8x128xf32>
    %c1_301 = arith.constant 1 : index
    %c1_302 = arith.constant 1 : index
    %590 = memref.load %arg4[%c1_301, %c1_302] : memref<10x10xf32, #tpu.memory_space<smem>>
    %591 = vector.broadcast %590 : f32 to vector<8x128xf32>
    %592 = arith.mulf %591, %217 : vector<8x128xf32>
    %593 = arith.addf %589, %592 : vector<8x128xf32>
    %c1_303 = arith.constant 1 : index
    %c2_304 = arith.constant 2 : index
    %594 = memref.load %arg4[%c1_303, %c2_304] : memref<10x10xf32, #tpu.memory_space<smem>>
    %595 = vector.broadcast %594 : f32 to vector<8x128xf32>
    %596 = arith.mulf %595, %258 : vector<8x128xf32>
    %597 = arith.addf %593, %596 : vector<8x128xf32>
    %c1_305 = arith.constant 1 : index
    %c3_306 = arith.constant 3 : index
    %598 = memref.load %arg4[%c1_305, %c3_306] : memref<10x10xf32, #tpu.memory_space<smem>>
    %599 = vector.broadcast %598 : f32 to vector<8x128xf32>
    %600 = arith.mulf %599, %299 : vector<8x128xf32>
    %601 = arith.addf %597, %600 : vector<8x128xf32>
    %c1_307 = arith.constant 1 : index
    %c4_308 = arith.constant 4 : index
    %602 = memref.load %arg4[%c1_307, %c4_308] : memref<10x10xf32, #tpu.memory_space<smem>>
    %603 = vector.broadcast %602 : f32 to vector<8x128xf32>
    %604 = arith.mulf %603, %340 : vector<8x128xf32>
    %605 = arith.addf %601, %604 : vector<8x128xf32>
    %c1_309 = arith.constant 1 : index
    %c5_310 = arith.constant 5 : index
    %606 = memref.load %arg4[%c1_309, %c5_310] : memref<10x10xf32, #tpu.memory_space<smem>>
    %607 = vector.broadcast %606 : f32 to vector<8x128xf32>
    %608 = arith.mulf %607, %381 : vector<8x128xf32>
    %609 = arith.addf %605, %608 : vector<8x128xf32>
    %c1_311 = arith.constant 1 : index
    %c6_312 = arith.constant 6 : index
    %610 = memref.load %arg4[%c1_311, %c6_312] : memref<10x10xf32, #tpu.memory_space<smem>>
    %611 = vector.broadcast %610 : f32 to vector<8x128xf32>
    %612 = arith.mulf %611, %422 : vector<8x128xf32>
    %613 = arith.addf %609, %612 : vector<8x128xf32>
    %c1_313 = arith.constant 1 : index
    %c7_314 = arith.constant 7 : index
    %614 = memref.load %arg4[%c1_313, %c7_314] : memref<10x10xf32, #tpu.memory_space<smem>>
    %615 = vector.broadcast %614 : f32 to vector<8x128xf32>
    %616 = arith.mulf %615, %463 : vector<8x128xf32>
    %617 = arith.addf %613, %616 : vector<8x128xf32>
    %c1_315 = arith.constant 1 : index
    %c8_316 = arith.constant 8 : index
    %618 = memref.load %arg4[%c1_315, %c8_316] : memref<10x10xf32, #tpu.memory_space<smem>>
    %619 = vector.broadcast %618 : f32 to vector<8x128xf32>
    %620 = arith.mulf %619, %504 : vector<8x128xf32>
    %621 = arith.addf %617, %620 : vector<8x128xf32>
    %c1_317 = arith.constant 1 : index
    %c9_318 = arith.constant 9 : index
    %622 = memref.load %arg4[%c1_317, %c9_318] : memref<10x10xf32, #tpu.memory_space<smem>>
    %623 = vector.broadcast %622 : f32 to vector<8x128xf32>
    %624 = arith.mulf %623, %545 : vector<8x128xf32>
    %625 = arith.addf %621, %624 : vector<8x128xf32>
    %cst_319 = arith.constant 0.000000e+00 : f32
    %626 = vector.broadcast %cst_319 : f32 to vector<8x128xf32>
    %627 = arith.maximumf %625, %626 : vector<8x128xf32>
    %c2_320 = arith.constant 2 : index
    %c0_321 = arith.constant 0 : index
    %628 = memref.load %arg4[%c2_320, %c0_321] : memref<10x10xf32, #tpu.memory_space<smem>>
    %629 = vector.broadcast %628 : f32 to vector<8x128xf32>
    %630 = arith.mulf %629, %176 : vector<8x128xf32>
    %c2_322 = arith.constant 2 : index
    %c1_323 = arith.constant 1 : index
    %631 = memref.load %arg4[%c2_322, %c1_323] : memref<10x10xf32, #tpu.memory_space<smem>>
    %632 = vector.broadcast %631 : f32 to vector<8x128xf32>
    %633 = arith.mulf %632, %217 : vector<8x128xf32>
    %634 = arith.addf %630, %633 : vector<8x128xf32>
    %c2_324 = arith.constant 2 : index
    %c2_325 = arith.constant 2 : index
    %635 = memref.load %arg4[%c2_324, %c2_325] : memref<10x10xf32, #tpu.memory_space<smem>>
    %636 = vector.broadcast %635 : f32 to vector<8x128xf32>
    %637 = arith.mulf %636, %258 : vector<8x128xf32>
    %638 = arith.addf %634, %637 : vector<8x128xf32>
    %c2_326 = arith.constant 2 : index
    %c3_327 = arith.constant 3 : index
    %639 = memref.load %arg4[%c2_326, %c3_327] : memref<10x10xf32, #tpu.memory_space<smem>>
    %640 = vector.broadcast %639 : f32 to vector<8x128xf32>
    %641 = arith.mulf %640, %299 : vector<8x128xf32>
    %642 = arith.addf %638, %641 : vector<8x128xf32>
    %c2_328 = arith.constant 2 : index
    %c4_329 = arith.constant 4 : index
    %643 = memref.load %arg4[%c2_328, %c4_329] : memref<10x10xf32, #tpu.memory_space<smem>>
    %644 = vector.broadcast %643 : f32 to vector<8x128xf32>
    %645 = arith.mulf %644, %340 : vector<8x128xf32>
    %646 = arith.addf %642, %645 : vector<8x128xf32>
    %c2_330 = arith.constant 2 : index
    %c5_331 = arith.constant 5 : index
    %647 = memref.load %arg4[%c2_330, %c5_331] : memref<10x10xf32, #tpu.memory_space<smem>>
    %648 = vector.broadcast %647 : f32 to vector<8x128xf32>
    %649 = arith.mulf %648, %381 : vector<8x128xf32>
    %650 = arith.addf %646, %649 : vector<8x128xf32>
    %c2_332 = arith.constant 2 : index
    %c6_333 = arith.constant 6 : index
    %651 = memref.load %arg4[%c2_332, %c6_333] : memref<10x10xf32, #tpu.memory_space<smem>>
    %652 = vector.broadcast %651 : f32 to vector<8x128xf32>
    %653 = arith.mulf %652, %422 : vector<8x128xf32>
    %654 = arith.addf %650, %653 : vector<8x128xf32>
    %c2_334 = arith.constant 2 : index
    %c7_335 = arith.constant 7 : index
    %655 = memref.load %arg4[%c2_334, %c7_335] : memref<10x10xf32, #tpu.memory_space<smem>>
    %656 = vector.broadcast %655 : f32 to vector<8x128xf32>
    %657 = arith.mulf %656, %463 : vector<8x128xf32>
    %658 = arith.addf %654, %657 : vector<8x128xf32>
    %c2_336 = arith.constant 2 : index
    %c8_337 = arith.constant 8 : index
    %659 = memref.load %arg4[%c2_336, %c8_337] : memref<10x10xf32, #tpu.memory_space<smem>>
    %660 = vector.broadcast %659 : f32 to vector<8x128xf32>
    %661 = arith.mulf %660, %504 : vector<8x128xf32>
    %662 = arith.addf %658, %661 : vector<8x128xf32>
    %c2_338 = arith.constant 2 : index
    %c9_339 = arith.constant 9 : index
    %663 = memref.load %arg4[%c2_338, %c9_339] : memref<10x10xf32, #tpu.memory_space<smem>>
    %664 = vector.broadcast %663 : f32 to vector<8x128xf32>
    %665 = arith.mulf %664, %545 : vector<8x128xf32>
    %666 = arith.addf %662, %665 : vector<8x128xf32>
    %cst_340 = arith.constant 0.000000e+00 : f32
    %667 = vector.broadcast %cst_340 : f32 to vector<8x128xf32>
    %668 = arith.maximumf %666, %667 : vector<8x128xf32>
    %c3_341 = arith.constant 3 : index
    %c0_342 = arith.constant 0 : index
    %669 = memref.load %arg4[%c3_341, %c0_342] : memref<10x10xf32, #tpu.memory_space<smem>>
    %670 = vector.broadcast %669 : f32 to vector<8x128xf32>
    %671 = arith.mulf %670, %176 : vector<8x128xf32>
    %c3_343 = arith.constant 3 : index
    %c1_344 = arith.constant 1 : index
    %672 = memref.load %arg4[%c3_343, %c1_344] : memref<10x10xf32, #tpu.memory_space<smem>>
    %673 = vector.broadcast %672 : f32 to vector<8x128xf32>
    %674 = arith.mulf %673, %217 : vector<8x128xf32>
    %675 = arith.addf %671, %674 : vector<8x128xf32>
    %c3_345 = arith.constant 3 : index
    %c2_346 = arith.constant 2 : index
    %676 = memref.load %arg4[%c3_345, %c2_346] : memref<10x10xf32, #tpu.memory_space<smem>>
    %677 = vector.broadcast %676 : f32 to vector<8x128xf32>
    %678 = arith.mulf %677, %258 : vector<8x128xf32>
    %679 = arith.addf %675, %678 : vector<8x128xf32>
    %c3_347 = arith.constant 3 : index
    %c3_348 = arith.constant 3 : index
    %680 = memref.load %arg4[%c3_347, %c3_348] : memref<10x10xf32, #tpu.memory_space<smem>>
    %681 = vector.broadcast %680 : f32 to vector<8x128xf32>
    %682 = arith.mulf %681, %299 : vector<8x128xf32>
    %683 = arith.addf %679, %682 : vector<8x128xf32>
    %c3_349 = arith.constant 3 : index
    %c4_350 = arith.constant 4 : index
    %684 = memref.load %arg4[%c3_349, %c4_350] : memref<10x10xf32, #tpu.memory_space<smem>>
    %685 = vector.broadcast %684 : f32 to vector<8x128xf32>
    %686 = arith.mulf %685, %340 : vector<8x128xf32>
    %687 = arith.addf %683, %686 : vector<8x128xf32>
    %c3_351 = arith.constant 3 : index
    %c5_352 = arith.constant 5 : index
    %688 = memref.load %arg4[%c3_351, %c5_352] : memref<10x10xf32, #tpu.memory_space<smem>>
    %689 = vector.broadcast %688 : f32 to vector<8x128xf32>
    %690 = arith.mulf %689, %381 : vector<8x128xf32>
    %691 = arith.addf %687, %690 : vector<8x128xf32>
    %c3_353 = arith.constant 3 : index
    %c6_354 = arith.constant 6 : index
    %692 = memref.load %arg4[%c3_353, %c6_354] : memref<10x10xf32, #tpu.memory_space<smem>>
    %693 = vector.broadcast %692 : f32 to vector<8x128xf32>
    %694 = arith.mulf %693, %422 : vector<8x128xf32>
    %695 = arith.addf %691, %694 : vector<8x128xf32>
    %c3_355 = arith.constant 3 : index
    %c7_356 = arith.constant 7 : index
    %696 = memref.load %arg4[%c3_355, %c7_356] : memref<10x10xf32, #tpu.memory_space<smem>>
    %697 = vector.broadcast %696 : f32 to vector<8x128xf32>
    %698 = arith.mulf %697, %463 : vector<8x128xf32>
    %699 = arith.addf %695, %698 : vector<8x128xf32>
    %c3_357 = arith.constant 3 : index
    %c8_358 = arith.constant 8 : index
    %700 = memref.load %arg4[%c3_357, %c8_358] : memref<10x10xf32, #tpu.memory_space<smem>>
    %701 = vector.broadcast %700 : f32 to vector<8x128xf32>
    %702 = arith.mulf %701, %504 : vector<8x128xf32>
    %703 = arith.addf %699, %702 : vector<8x128xf32>
    %c3_359 = arith.constant 3 : index
    %c9_360 = arith.constant 9 : index
    %704 = memref.load %arg4[%c3_359, %c9_360] : memref<10x10xf32, #tpu.memory_space<smem>>
    %705 = vector.broadcast %704 : f32 to vector<8x128xf32>
    %706 = arith.mulf %705, %545 : vector<8x128xf32>
    %707 = arith.addf %703, %706 : vector<8x128xf32>
    %cst_361 = arith.constant 0.000000e+00 : f32
    %708 = vector.broadcast %cst_361 : f32 to vector<8x128xf32>
    %709 = arith.maximumf %707, %708 : vector<8x128xf32>
    %c4_362 = arith.constant 4 : index
    %c0_363 = arith.constant 0 : index
    %710 = memref.load %arg4[%c4_362, %c0_363] : memref<10x10xf32, #tpu.memory_space<smem>>
    %711 = vector.broadcast %710 : f32 to vector<8x128xf32>
    %712 = arith.mulf %711, %176 : vector<8x128xf32>
    %c4_364 = arith.constant 4 : index
    %c1_365 = arith.constant 1 : index
    %713 = memref.load %arg4[%c4_364, %c1_365] : memref<10x10xf32, #tpu.memory_space<smem>>
    %714 = vector.broadcast %713 : f32 to vector<8x128xf32>
    %715 = arith.mulf %714, %217 : vector<8x128xf32>
    %716 = arith.addf %712, %715 : vector<8x128xf32>
    %c4_366 = arith.constant 4 : index
    %c2_367 = arith.constant 2 : index
    %717 = memref.load %arg4[%c4_366, %c2_367] : memref<10x10xf32, #tpu.memory_space<smem>>
    %718 = vector.broadcast %717 : f32 to vector<8x128xf32>
    %719 = arith.mulf %718, %258 : vector<8x128xf32>
    %720 = arith.addf %716, %719 : vector<8x128xf32>
    %c4_368 = arith.constant 4 : index
    %c3_369 = arith.constant 3 : index
    %721 = memref.load %arg4[%c4_368, %c3_369] : memref<10x10xf32, #tpu.memory_space<smem>>
    %722 = vector.broadcast %721 : f32 to vector<8x128xf32>
    %723 = arith.mulf %722, %299 : vector<8x128xf32>
    %724 = arith.addf %720, %723 : vector<8x128xf32>
    %c4_370 = arith.constant 4 : index
    %c4_371 = arith.constant 4 : index
    %725 = memref.load %arg4[%c4_370, %c4_371] : memref<10x10xf32, #tpu.memory_space<smem>>
    %726 = vector.broadcast %725 : f32 to vector<8x128xf32>
    %727 = arith.mulf %726, %340 : vector<8x128xf32>
    %728 = arith.addf %724, %727 : vector<8x128xf32>
    %c4_372 = arith.constant 4 : index
    %c5_373 = arith.constant 5 : index
    %729 = memref.load %arg4[%c4_372, %c5_373] : memref<10x10xf32, #tpu.memory_space<smem>>
    %730 = vector.broadcast %729 : f32 to vector<8x128xf32>
    %731 = arith.mulf %730, %381 : vector<8x128xf32>
    %732 = arith.addf %728, %731 : vector<8x128xf32>
    %c4_374 = arith.constant 4 : index
    %c6_375 = arith.constant 6 : index
    %733 = memref.load %arg4[%c4_374, %c6_375] : memref<10x10xf32, #tpu.memory_space<smem>>
    %734 = vector.broadcast %733 : f32 to vector<8x128xf32>
    %735 = arith.mulf %734, %422 : vector<8x128xf32>
    %736 = arith.addf %732, %735 : vector<8x128xf32>
    %c4_376 = arith.constant 4 : index
    %c7_377 = arith.constant 7 : index
    %737 = memref.load %arg4[%c4_376, %c7_377] : memref<10x10xf32, #tpu.memory_space<smem>>
    %738 = vector.broadcast %737 : f32 to vector<8x128xf32>
    %739 = arith.mulf %738, %463 : vector<8x128xf32>
    %740 = arith.addf %736, %739 : vector<8x128xf32>
    %c4_378 = arith.constant 4 : index
    %c8_379 = arith.constant 8 : index
    %741 = memref.load %arg4[%c4_378, %c8_379] : memref<10x10xf32, #tpu.memory_space<smem>>
    %742 = vector.broadcast %741 : f32 to vector<8x128xf32>
    %743 = arith.mulf %742, %504 : vector<8x128xf32>
    %744 = arith.addf %740, %743 : vector<8x128xf32>
    %c4_380 = arith.constant 4 : index
    %c9_381 = arith.constant 9 : index
    %745 = memref.load %arg4[%c4_380, %c9_381] : memref<10x10xf32, #tpu.memory_space<smem>>
    %746 = vector.broadcast %745 : f32 to vector<8x128xf32>
    %747 = arith.mulf %746, %545 : vector<8x128xf32>
    %748 = arith.addf %744, %747 : vector<8x128xf32>
    %cst_382 = arith.constant 0.000000e+00 : f32
    %749 = vector.broadcast %cst_382 : f32 to vector<8x128xf32>
    %750 = arith.maximumf %748, %749 : vector<8x128xf32>
    %c5_383 = arith.constant 5 : index
    %c0_384 = arith.constant 0 : index
    %751 = memref.load %arg4[%c5_383, %c0_384] : memref<10x10xf32, #tpu.memory_space<smem>>
    %752 = vector.broadcast %751 : f32 to vector<8x128xf32>
    %753 = arith.mulf %752, %176 : vector<8x128xf32>
    %c5_385 = arith.constant 5 : index
    %c1_386 = arith.constant 1 : index
    %754 = memref.load %arg4[%c5_385, %c1_386] : memref<10x10xf32, #tpu.memory_space<smem>>
    %755 = vector.broadcast %754 : f32 to vector<8x128xf32>
    %756 = arith.mulf %755, %217 : vector<8x128xf32>
    %757 = arith.addf %753, %756 : vector<8x128xf32>
    %c5_387 = arith.constant 5 : index
    %c2_388 = arith.constant 2 : index
    %758 = memref.load %arg4[%c5_387, %c2_388] : memref<10x10xf32, #tpu.memory_space<smem>>
    %759 = vector.broadcast %758 : f32 to vector<8x128xf32>
    %760 = arith.mulf %759, %258 : vector<8x128xf32>
    %761 = arith.addf %757, %760 : vector<8x128xf32>
    %c5_389 = arith.constant 5 : index
    %c3_390 = arith.constant 3 : index
    %762 = memref.load %arg4[%c5_389, %c3_390] : memref<10x10xf32, #tpu.memory_space<smem>>
    %763 = vector.broadcast %762 : f32 to vector<8x128xf32>
    %764 = arith.mulf %763, %299 : vector<8x128xf32>
    %765 = arith.addf %761, %764 : vector<8x128xf32>
    %c5_391 = arith.constant 5 : index
    %c4_392 = arith.constant 4 : index
    %766 = memref.load %arg4[%c5_391, %c4_392] : memref<10x10xf32, #tpu.memory_space<smem>>
    %767 = vector.broadcast %766 : f32 to vector<8x128xf32>
    %768 = arith.mulf %767, %340 : vector<8x128xf32>
    %769 = arith.addf %765, %768 : vector<8x128xf32>
    %c5_393 = arith.constant 5 : index
    %c5_394 = arith.constant 5 : index
    %770 = memref.load %arg4[%c5_393, %c5_394] : memref<10x10xf32, #tpu.memory_space<smem>>
    %771 = vector.broadcast %770 : f32 to vector<8x128xf32>
    %772 = arith.mulf %771, %381 : vector<8x128xf32>
    %773 = arith.addf %769, %772 : vector<8x128xf32>
    %c5_395 = arith.constant 5 : index
    %c6_396 = arith.constant 6 : index
    %774 = memref.load %arg4[%c5_395, %c6_396] : memref<10x10xf32, #tpu.memory_space<smem>>
    %775 = vector.broadcast %774 : f32 to vector<8x128xf32>
    %776 = arith.mulf %775, %422 : vector<8x128xf32>
    %777 = arith.addf %773, %776 : vector<8x128xf32>
    %c5_397 = arith.constant 5 : index
    %c7_398 = arith.constant 7 : index
    %778 = memref.load %arg4[%c5_397, %c7_398] : memref<10x10xf32, #tpu.memory_space<smem>>
    %779 = vector.broadcast %778 : f32 to vector<8x128xf32>
    %780 = arith.mulf %779, %463 : vector<8x128xf32>
    %781 = arith.addf %777, %780 : vector<8x128xf32>
    %c5_399 = arith.constant 5 : index
    %c8_400 = arith.constant 8 : index
    %782 = memref.load %arg4[%c5_399, %c8_400] : memref<10x10xf32, #tpu.memory_space<smem>>
    %783 = vector.broadcast %782 : f32 to vector<8x128xf32>
    %784 = arith.mulf %783, %504 : vector<8x128xf32>
    %785 = arith.addf %781, %784 : vector<8x128xf32>
    %c5_401 = arith.constant 5 : index
    %c9_402 = arith.constant 9 : index
    %786 = memref.load %arg4[%c5_401, %c9_402] : memref<10x10xf32, #tpu.memory_space<smem>>
    %787 = vector.broadcast %786 : f32 to vector<8x128xf32>
    %788 = arith.mulf %787, %545 : vector<8x128xf32>
    %789 = arith.addf %785, %788 : vector<8x128xf32>
    %cst_403 = arith.constant 0.000000e+00 : f32
    %790 = vector.broadcast %cst_403 : f32 to vector<8x128xf32>
    %791 = arith.maximumf %789, %790 : vector<8x128xf32>
    %c6_404 = arith.constant 6 : index
    %c0_405 = arith.constant 0 : index
    %792 = memref.load %arg4[%c6_404, %c0_405] : memref<10x10xf32, #tpu.memory_space<smem>>
    %793 = vector.broadcast %792 : f32 to vector<8x128xf32>
    %794 = arith.mulf %793, %176 : vector<8x128xf32>
    %c6_406 = arith.constant 6 : index
    %c1_407 = arith.constant 1 : index
    %795 = memref.load %arg4[%c6_406, %c1_407] : memref<10x10xf32, #tpu.memory_space<smem>>
    %796 = vector.broadcast %795 : f32 to vector<8x128xf32>
    %797 = arith.mulf %796, %217 : vector<8x128xf32>
    %798 = arith.addf %794, %797 : vector<8x128xf32>
    %c6_408 = arith.constant 6 : index
    %c2_409 = arith.constant 2 : index
    %799 = memref.load %arg4[%c6_408, %c2_409] : memref<10x10xf32, #tpu.memory_space<smem>>
    %800 = vector.broadcast %799 : f32 to vector<8x128xf32>
    %801 = arith.mulf %800, %258 : vector<8x128xf32>
    %802 = arith.addf %798, %801 : vector<8x128xf32>
    %c6_410 = arith.constant 6 : index
    %c3_411 = arith.constant 3 : index
    %803 = memref.load %arg4[%c6_410, %c3_411] : memref<10x10xf32, #tpu.memory_space<smem>>
    %804 = vector.broadcast %803 : f32 to vector<8x128xf32>
    %805 = arith.mulf %804, %299 : vector<8x128xf32>
    %806 = arith.addf %802, %805 : vector<8x128xf32>
    %c6_412 = arith.constant 6 : index
    %c4_413 = arith.constant 4 : index
    %807 = memref.load %arg4[%c6_412, %c4_413] : memref<10x10xf32, #tpu.memory_space<smem>>
    %808 = vector.broadcast %807 : f32 to vector<8x128xf32>
    %809 = arith.mulf %808, %340 : vector<8x128xf32>
    %810 = arith.addf %806, %809 : vector<8x128xf32>
    %c6_414 = arith.constant 6 : index
    %c5_415 = arith.constant 5 : index
    %811 = memref.load %arg4[%c6_414, %c5_415] : memref<10x10xf32, #tpu.memory_space<smem>>
    %812 = vector.broadcast %811 : f32 to vector<8x128xf32>
    %813 = arith.mulf %812, %381 : vector<8x128xf32>
    %814 = arith.addf %810, %813 : vector<8x128xf32>
    %c6_416 = arith.constant 6 : index
    %c6_417 = arith.constant 6 : index
    %815 = memref.load %arg4[%c6_416, %c6_417] : memref<10x10xf32, #tpu.memory_space<smem>>
    %816 = vector.broadcast %815 : f32 to vector<8x128xf32>
    %817 = arith.mulf %816, %422 : vector<8x128xf32>
    %818 = arith.addf %814, %817 : vector<8x128xf32>
    %c6_418 = arith.constant 6 : index
    %c7_419 = arith.constant 7 : index
    %819 = memref.load %arg4[%c6_418, %c7_419] : memref<10x10xf32, #tpu.memory_space<smem>>
    %820 = vector.broadcast %819 : f32 to vector<8x128xf32>
    %821 = arith.mulf %820, %463 : vector<8x128xf32>
    %822 = arith.addf %818, %821 : vector<8x128xf32>
    %c6_420 = arith.constant 6 : index
    %c8_421 = arith.constant 8 : index
    %823 = memref.load %arg4[%c6_420, %c8_421] : memref<10x10xf32, #tpu.memory_space<smem>>
    %824 = vector.broadcast %823 : f32 to vector<8x128xf32>
    %825 = arith.mulf %824, %504 : vector<8x128xf32>
    %826 = arith.addf %822, %825 : vector<8x128xf32>
    %c6_422 = arith.constant 6 : index
    %c9_423 = arith.constant 9 : index
    %827 = memref.load %arg4[%c6_422, %c9_423] : memref<10x10xf32, #tpu.memory_space<smem>>
    %828 = vector.broadcast %827 : f32 to vector<8x128xf32>
    %829 = arith.mulf %828, %545 : vector<8x128xf32>
    %830 = arith.addf %826, %829 : vector<8x128xf32>
    %cst_424 = arith.constant 0.000000e+00 : f32
    %831 = vector.broadcast %cst_424 : f32 to vector<8x128xf32>
    %832 = arith.maximumf %830, %831 : vector<8x128xf32>
    %c7_425 = arith.constant 7 : index
    %c0_426 = arith.constant 0 : index
    %833 = memref.load %arg4[%c7_425, %c0_426] : memref<10x10xf32, #tpu.memory_space<smem>>
    %834 = vector.broadcast %833 : f32 to vector<8x128xf32>
    %835 = arith.mulf %834, %176 : vector<8x128xf32>
    %c7_427 = arith.constant 7 : index
    %c1_428 = arith.constant 1 : index
    %836 = memref.load %arg4[%c7_427, %c1_428] : memref<10x10xf32, #tpu.memory_space<smem>>
    %837 = vector.broadcast %836 : f32 to vector<8x128xf32>
    %838 = arith.mulf %837, %217 : vector<8x128xf32>
    %839 = arith.addf %835, %838 : vector<8x128xf32>
    %c7_429 = arith.constant 7 : index
    %c2_430 = arith.constant 2 : index
    %840 = memref.load %arg4[%c7_429, %c2_430] : memref<10x10xf32, #tpu.memory_space<smem>>
    %841 = vector.broadcast %840 : f32 to vector<8x128xf32>
    %842 = arith.mulf %841, %258 : vector<8x128xf32>
    %843 = arith.addf %839, %842 : vector<8x128xf32>
    %c7_431 = arith.constant 7 : index
    %c3_432 = arith.constant 3 : index
    %844 = memref.load %arg4[%c7_431, %c3_432] : memref<10x10xf32, #tpu.memory_space<smem>>
    %845 = vector.broadcast %844 : f32 to vector<8x128xf32>
    %846 = arith.mulf %845, %299 : vector<8x128xf32>
    %847 = arith.addf %843, %846 : vector<8x128xf32>
    %c7_433 = arith.constant 7 : index
    %c4_434 = arith.constant 4 : index
    %848 = memref.load %arg4[%c7_433, %c4_434] : memref<10x10xf32, #tpu.memory_space<smem>>
    %849 = vector.broadcast %848 : f32 to vector<8x128xf32>
    %850 = arith.mulf %849, %340 : vector<8x128xf32>
    %851 = arith.addf %847, %850 : vector<8x128xf32>
    %c7_435 = arith.constant 7 : index
    %c5_436 = arith.constant 5 : index
    %852 = memref.load %arg4[%c7_435, %c5_436] : memref<10x10xf32, #tpu.memory_space<smem>>
    %853 = vector.broadcast %852 : f32 to vector<8x128xf32>
    %854 = arith.mulf %853, %381 : vector<8x128xf32>
    %855 = arith.addf %851, %854 : vector<8x128xf32>
    %c7_437 = arith.constant 7 : index
    %c6_438 = arith.constant 6 : index
    %856 = memref.load %arg4[%c7_437, %c6_438] : memref<10x10xf32, #tpu.memory_space<smem>>
    %857 = vector.broadcast %856 : f32 to vector<8x128xf32>
    %858 = arith.mulf %857, %422 : vector<8x128xf32>
    %859 = arith.addf %855, %858 : vector<8x128xf32>
    %c7_439 = arith.constant 7 : index
    %c7_440 = arith.constant 7 : index
    %860 = memref.load %arg4[%c7_439, %c7_440] : memref<10x10xf32, #tpu.memory_space<smem>>
    %861 = vector.broadcast %860 : f32 to vector<8x128xf32>
    %862 = arith.mulf %861, %463 : vector<8x128xf32>
    %863 = arith.addf %859, %862 : vector<8x128xf32>
    %c7_441 = arith.constant 7 : index
    %c8_442 = arith.constant 8 : index
    %864 = memref.load %arg4[%c7_441, %c8_442] : memref<10x10xf32, #tpu.memory_space<smem>>
    %865 = vector.broadcast %864 : f32 to vector<8x128xf32>
    %866 = arith.mulf %865, %504 : vector<8x128xf32>
    %867 = arith.addf %863, %866 : vector<8x128xf32>
    %c7_443 = arith.constant 7 : index
    %c9_444 = arith.constant 9 : index
    %868 = memref.load %arg4[%c7_443, %c9_444] : memref<10x10xf32, #tpu.memory_space<smem>>
    %869 = vector.broadcast %868 : f32 to vector<8x128xf32>
    %870 = arith.mulf %869, %545 : vector<8x128xf32>
    %871 = arith.addf %867, %870 : vector<8x128xf32>
    %cst_445 = arith.constant 0.000000e+00 : f32
    %872 = vector.broadcast %cst_445 : f32 to vector<8x128xf32>
    %873 = arith.maximumf %871, %872 : vector<8x128xf32>
    %c8_446 = arith.constant 8 : index
    %c0_447 = arith.constant 0 : index
    %874 = memref.load %arg4[%c8_446, %c0_447] : memref<10x10xf32, #tpu.memory_space<smem>>
    %875 = vector.broadcast %874 : f32 to vector<8x128xf32>
    %876 = arith.mulf %875, %176 : vector<8x128xf32>
    %c8_448 = arith.constant 8 : index
    %c1_449 = arith.constant 1 : index
    %877 = memref.load %arg4[%c8_448, %c1_449] : memref<10x10xf32, #tpu.memory_space<smem>>
    %878 = vector.broadcast %877 : f32 to vector<8x128xf32>
    %879 = arith.mulf %878, %217 : vector<8x128xf32>
    %880 = arith.addf %876, %879 : vector<8x128xf32>
    %c8_450 = arith.constant 8 : index
    %c2_451 = arith.constant 2 : index
    %881 = memref.load %arg4[%c8_450, %c2_451] : memref<10x10xf32, #tpu.memory_space<smem>>
    %882 = vector.broadcast %881 : f32 to vector<8x128xf32>
    %883 = arith.mulf %882, %258 : vector<8x128xf32>
    %884 = arith.addf %880, %883 : vector<8x128xf32>
    %c8_452 = arith.constant 8 : index
    %c3_453 = arith.constant 3 : index
    %885 = memref.load %arg4[%c8_452, %c3_453] : memref<10x10xf32, #tpu.memory_space<smem>>
    %886 = vector.broadcast %885 : f32 to vector<8x128xf32>
    %887 = arith.mulf %886, %299 : vector<8x128xf32>
    %888 = arith.addf %884, %887 : vector<8x128xf32>
    %c8_454 = arith.constant 8 : index
    %c4_455 = arith.constant 4 : index
    %889 = memref.load %arg4[%c8_454, %c4_455] : memref<10x10xf32, #tpu.memory_space<smem>>
    %890 = vector.broadcast %889 : f32 to vector<8x128xf32>
    %891 = arith.mulf %890, %340 : vector<8x128xf32>
    %892 = arith.addf %888, %891 : vector<8x128xf32>
    %c8_456 = arith.constant 8 : index
    %c5_457 = arith.constant 5 : index
    %893 = memref.load %arg4[%c8_456, %c5_457] : memref<10x10xf32, #tpu.memory_space<smem>>
    %894 = vector.broadcast %893 : f32 to vector<8x128xf32>
    %895 = arith.mulf %894, %381 : vector<8x128xf32>
    %896 = arith.addf %892, %895 : vector<8x128xf32>
    %c8_458 = arith.constant 8 : index
    %c6_459 = arith.constant 6 : index
    %897 = memref.load %arg4[%c8_458, %c6_459] : memref<10x10xf32, #tpu.memory_space<smem>>
    %898 = vector.broadcast %897 : f32 to vector<8x128xf32>
    %899 = arith.mulf %898, %422 : vector<8x128xf32>
    %900 = arith.addf %896, %899 : vector<8x128xf32>
    %c8_460 = arith.constant 8 : index
    %c7_461 = arith.constant 7 : index
    %901 = memref.load %arg4[%c8_460, %c7_461] : memref<10x10xf32, #tpu.memory_space<smem>>
    %902 = vector.broadcast %901 : f32 to vector<8x128xf32>
    %903 = arith.mulf %902, %463 : vector<8x128xf32>
    %904 = arith.addf %900, %903 : vector<8x128xf32>
    %c8_462 = arith.constant 8 : index
    %c8_463 = arith.constant 8 : index
    %905 = memref.load %arg4[%c8_462, %c8_463] : memref<10x10xf32, #tpu.memory_space<smem>>
    %906 = vector.broadcast %905 : f32 to vector<8x128xf32>
    %907 = arith.mulf %906, %504 : vector<8x128xf32>
    %908 = arith.addf %904, %907 : vector<8x128xf32>
    %c8_464 = arith.constant 8 : index
    %c9_465 = arith.constant 9 : index
    %909 = memref.load %arg4[%c8_464, %c9_465] : memref<10x10xf32, #tpu.memory_space<smem>>
    %910 = vector.broadcast %909 : f32 to vector<8x128xf32>
    %911 = arith.mulf %910, %545 : vector<8x128xf32>
    %912 = arith.addf %908, %911 : vector<8x128xf32>
    %cst_466 = arith.constant 0.000000e+00 : f32
    %913 = vector.broadcast %cst_466 : f32 to vector<8x128xf32>
    %914 = arith.maximumf %912, %913 : vector<8x128xf32>
    %c9_467 = arith.constant 9 : index
    %c0_468 = arith.constant 0 : index
    %915 = memref.load %arg4[%c9_467, %c0_468] : memref<10x10xf32, #tpu.memory_space<smem>>
    %916 = vector.broadcast %915 : f32 to vector<8x128xf32>
    %917 = arith.mulf %916, %176 : vector<8x128xf32>
    %c9_469 = arith.constant 9 : index
    %c1_470 = arith.constant 1 : index
    %918 = memref.load %arg4[%c9_469, %c1_470] : memref<10x10xf32, #tpu.memory_space<smem>>
    %919 = vector.broadcast %918 : f32 to vector<8x128xf32>
    %920 = arith.mulf %919, %217 : vector<8x128xf32>
    %921 = arith.addf %917, %920 : vector<8x128xf32>
    %c9_471 = arith.constant 9 : index
    %c2_472 = arith.constant 2 : index
    %922 = memref.load %arg4[%c9_471, %c2_472] : memref<10x10xf32, #tpu.memory_space<smem>>
    %923 = vector.broadcast %922 : f32 to vector<8x128xf32>
    %924 = arith.mulf %923, %258 : vector<8x128xf32>
    %925 = arith.addf %921, %924 : vector<8x128xf32>
    %c9_473 = arith.constant 9 : index
    %c3_474 = arith.constant 3 : index
    %926 = memref.load %arg4[%c9_473, %c3_474] : memref<10x10xf32, #tpu.memory_space<smem>>
    %927 = vector.broadcast %926 : f32 to vector<8x128xf32>
    %928 = arith.mulf %927, %299 : vector<8x128xf32>
    %929 = arith.addf %925, %928 : vector<8x128xf32>
    %c9_475 = arith.constant 9 : index
    %c4_476 = arith.constant 4 : index
    %930 = memref.load %arg4[%c9_475, %c4_476] : memref<10x10xf32, #tpu.memory_space<smem>>
    %931 = vector.broadcast %930 : f32 to vector<8x128xf32>
    %932 = arith.mulf %931, %340 : vector<8x128xf32>
    %933 = arith.addf %929, %932 : vector<8x128xf32>
    %c9_477 = arith.constant 9 : index
    %c5_478 = arith.constant 5 : index
    %934 = memref.load %arg4[%c9_477, %c5_478] : memref<10x10xf32, #tpu.memory_space<smem>>
    %935 = vector.broadcast %934 : f32 to vector<8x128xf32>
    %936 = arith.mulf %935, %381 : vector<8x128xf32>
    %937 = arith.addf %933, %936 : vector<8x128xf32>
    %c9_479 = arith.constant 9 : index
    %c6_480 = arith.constant 6 : index
    %938 = memref.load %arg4[%c9_479, %c6_480] : memref<10x10xf32, #tpu.memory_space<smem>>
    %939 = vector.broadcast %938 : f32 to vector<8x128xf32>
    %940 = arith.mulf %939, %422 : vector<8x128xf32>
    %941 = arith.addf %937, %940 : vector<8x128xf32>
    %c9_481 = arith.constant 9 : index
    %c7_482 = arith.constant 7 : index
    %942 = memref.load %arg4[%c9_481, %c7_482] : memref<10x10xf32, #tpu.memory_space<smem>>
    %943 = vector.broadcast %942 : f32 to vector<8x128xf32>
    %944 = arith.mulf %943, %463 : vector<8x128xf32>
    %945 = arith.addf %941, %944 : vector<8x128xf32>
    %c9_483 = arith.constant 9 : index
    %c8_484 = arith.constant 8 : index
    %946 = memref.load %arg4[%c9_483, %c8_484] : memref<10x10xf32, #tpu.memory_space<smem>>
    %947 = vector.broadcast %946 : f32 to vector<8x128xf32>
    %948 = arith.mulf %947, %504 : vector<8x128xf32>
    %949 = arith.addf %945, %948 : vector<8x128xf32>
    %c9_485 = arith.constant 9 : index
    %c9_486 = arith.constant 9 : index
    %950 = memref.load %arg4[%c9_485, %c9_486] : memref<10x10xf32, #tpu.memory_space<smem>>
    %951 = vector.broadcast %950 : f32 to vector<8x128xf32>
    %952 = arith.mulf %951, %545 : vector<8x128xf32>
    %953 = arith.addf %949, %952 : vector<8x128xf32>
    %cst_487 = arith.constant 0.000000e+00 : f32
    %954 = vector.broadcast %cst_487 : f32 to vector<8x128xf32>
    %955 = arith.maximumf %953, %954 : vector<8x128xf32>
    %c0_488 = arith.constant 0 : index
    %c0_489 = arith.constant 0 : index
    %956 = memref.load %arg5[%c0_488, %c0_489] : memref<1x10xf32, #tpu.memory_space<smem>>
    %957 = vector.broadcast %956 : f32 to vector<8x128xf32>
    %958 = arith.mulf %957, %586 : vector<8x128xf32>
    %c0_490 = arith.constant 0 : index
    %c1_491 = arith.constant 1 : index
    %959 = memref.load %arg5[%c0_490, %c1_491] : memref<1x10xf32, #tpu.memory_space<smem>>
    %960 = vector.broadcast %959 : f32 to vector<8x128xf32>
    %961 = arith.mulf %960, %627 : vector<8x128xf32>
    %962 = arith.addf %958, %961 : vector<8x128xf32>
    %c0_492 = arith.constant 0 : index
    %c2_493 = arith.constant 2 : index
    %963 = memref.load %arg5[%c0_492, %c2_493] : memref<1x10xf32, #tpu.memory_space<smem>>
    %964 = vector.broadcast %963 : f32 to vector<8x128xf32>
    %965 = arith.mulf %964, %668 : vector<8x128xf32>
    %966 = arith.addf %962, %965 : vector<8x128xf32>
    %c0_494 = arith.constant 0 : index
    %c3_495 = arith.constant 3 : index
    %967 = memref.load %arg5[%c0_494, %c3_495] : memref<1x10xf32, #tpu.memory_space<smem>>
    %968 = vector.broadcast %967 : f32 to vector<8x128xf32>
    %969 = arith.mulf %968, %709 : vector<8x128xf32>
    %970 = arith.addf %966, %969 : vector<8x128xf32>
    %c0_496 = arith.constant 0 : index
    %c4_497 = arith.constant 4 : index
    %971 = memref.load %arg5[%c0_496, %c4_497] : memref<1x10xf32, #tpu.memory_space<smem>>
    %972 = vector.broadcast %971 : f32 to vector<8x128xf32>
    %973 = arith.mulf %972, %750 : vector<8x128xf32>
    %974 = arith.addf %970, %973 : vector<8x128xf32>
    %c0_498 = arith.constant 0 : index
    %c5_499 = arith.constant 5 : index
    %975 = memref.load %arg5[%c0_498, %c5_499] : memref<1x10xf32, #tpu.memory_space<smem>>
    %976 = vector.broadcast %975 : f32 to vector<8x128xf32>
    %977 = arith.mulf %976, %791 : vector<8x128xf32>
    %978 = arith.addf %974, %977 : vector<8x128xf32>
    %c0_500 = arith.constant 0 : index
    %c6_501 = arith.constant 6 : index
    %979 = memref.load %arg5[%c0_500, %c6_501] : memref<1x10xf32, #tpu.memory_space<smem>>
    %980 = vector.broadcast %979 : f32 to vector<8x128xf32>
    %981 = arith.mulf %980, %832 : vector<8x128xf32>
    %982 = arith.addf %978, %981 : vector<8x128xf32>
    %c0_502 = arith.constant 0 : index
    %c7_503 = arith.constant 7 : index
    %983 = memref.load %arg5[%c0_502, %c7_503] : memref<1x10xf32, #tpu.memory_space<smem>>
    %984 = vector.broadcast %983 : f32 to vector<8x128xf32>
    %985 = arith.mulf %984, %873 : vector<8x128xf32>
    %986 = arith.addf %982, %985 : vector<8x128xf32>
    %c0_504 = arith.constant 0 : index
    %c8_505 = arith.constant 8 : index
    %987 = memref.load %arg5[%c0_504, %c8_505] : memref<1x10xf32, #tpu.memory_space<smem>>
    %988 = vector.broadcast %987 : f32 to vector<8x128xf32>
    %989 = arith.mulf %988, %914 : vector<8x128xf32>
    %990 = arith.addf %986, %989 : vector<8x128xf32>
    %c0_506 = arith.constant 0 : index
    %c9_507 = arith.constant 9 : index
    %991 = memref.load %arg5[%c0_506, %c9_507] : memref<1x10xf32, #tpu.memory_space<smem>>
    %992 = vector.broadcast %991 : f32 to vector<8x128xf32>
    %993 = arith.mulf %992, %955 : vector<8x128xf32>
    %994 = arith.addf %990, %993 : vector<8x128xf32>
    %c0_508 = arith.constant 0 : index
    %c0_509 = arith.constant 0 : index
    %995 = vector.load %arg6[%c0_508, %c0_509] : memref<8x128xf32, #tpu.memory_space<vmem>>, vector<8x128xf32>
    tpu.vector_store %arg6[%c0_508, %c0_509], %994 {strides = array<i32>} : memref<8x128xf32, #tpu.memory_space<vmem>>, vector<8x128xf32>,
    return
  }
  func.func @transform_0(%arg0: i32) -> (i32, i32, i32) {
    %c0_i32 = arith.constant 0 : i32
    %c0_i32_0 = arith.constant 0 : i32
    %c0_i32_1 = arith.constant 0 : i32
    return %c0_i32, %arg0, %c0_i32_0 : i32, i32, i32
  }
  func.func @transform_1(%arg0: i32) -> (i32, i32) {
    %c0_i32 = arith.constant 0 : i32
    %c0_i32_0 = arith.constant 0 : i32
    %c0_i32_1 = arith.constant 0 : i32
    return %c0_i32, %c0_i32_0 : i32, i32
  }
  func.func @transform_2(%arg0: i32) -> (i32, i32) {
    %c0_i32 = arith.constant 0 : i32
    %c0_i32_0 = arith.constant 0 : i32
    %c0_i32_1 = arith.constant 0 : i32
    return %c0_i32, %c0_i32_0 : i32, i32
  }
  func.func @transform_3(%arg0: i32) -> (i32, i32) {
    %c0_i32 = arith.constant 0 : i32
    %c0_i32_0 = arith.constant 0 : i32
    %c0_i32_1 = arith.constant 0 : i32
    return %c0_i32, %c0_i32_0 : i32, i32
  }
  func.func @transform_4(%arg0: i32) -> (i32, i32) {
    %c0_i32 = arith.constant 0 : i32
    %c0_i32_0 = arith.constant 0 : i32
    %c0_i32_1 = arith.constant 0 : i32
    return %c0_i32, %c0_i32_0 : i32, i32
  }
  func.func @transform_5(%arg0: i32) -> (i32, i32) {
    %c0_i32 = arith.constant 0 : i32
    %c0_i32_0 = arith.constant 0 : i32
    return %arg0, %c0_i32 : i32, i32
  }
}

</mosaic_0001>

<bundles_post_ra>
// kernel: tpu_custom_call.1
= control target key start
LH: loop header
LB: loop body
LE: loop exit
PB: predicated region body
PF: predicated region fallthrough
CT: control target
= control target key end

     0   :  { %s2508_s0 = inlined_call_operand.hbm [shape: f32[3,8,128], index: 0, kind: input, shape index: {}]   ;;  %s2509_s1 = inlined_call_operand.vmem [shape: f32[10,3], index: 1, kind: input, shape index: {}]   ;;  %s2510_s2 = inlined_call_operand.vmem [shape: f32[10,10], index: 2, kind: input, shape index: {}]   ;;  %s2511_s3 = inlined_call_operand.hbm [shape: f32[10,10], index: 3, kind: input, shape index: {}]   ;;  %s2512_s4 = inlined_call_operand.vmem [shape: f32[1,10], index: 4, kind: input, shape index: {}]   ;;  %s2513_s5 = inlined_call_operand.hbm [shape: f32[8,128], index: 5, kind: output, shape index: {}]  }
   0x1   :  { %2514 = sst [smem:[#allocation54_spill]] %s2513_s5 }
   0x2   :  { %10 = vsyncpa [#allocation3], 0 }
   0x3   :  { %11 = vsyncpa [#allocation6], 0 }
   0x4   :  { %12 = vsyncpa [#allocation9], 0 }
   0x5   :  { %13 = vsyncpa [#allocation5], 0 }
   0x6   :  { %14 = vsyncpa [#allocation4], 0  ;;  %s43_s20 = sshll.u32 %s2510_s2, 4  ;;  %s19_s23 = sshll.u32 %s2508_s0, 4  ;;  %s44_s20 = int_to_ptr.vmem [resolvable:$true] %s43_s20  ;;  %s20_s23 = int_to_ptr.hbm [resolvable:$true] %s19_s23 }
   0x7   :  { %s1428_s24 = smov [#allocation8]   ;;  %s1429_s25 = smov 128  }
   0x8   :  { %s1430_s26 = smov 8   ;;  %s1431_s27 = smov [#allocation2]  }
   0x9   :  { %49 = dma.vmem_to_smem %s44_s20, 256, %s1428_s24, [#allocation9], %s1429_s25, %s1429_s25, %s1430_s26  }
   0xa   :  { %s21_s28 = sshll.u32 %s1431_s27, 4  ;;  %s32_s6 = sshll.u32 %s2509_s1, 4  ;;  %s22_s28 = int_to_ptr.vmem [resolvable:$true] %s21_s28  ;;  %s33_s6 = int_to_ptr.vmem [resolvable:$true] %s32_s6 }
   0xb   :  { %27 = dma.hbm_to_vmem [thread:$0]  %s20_s23, 384, %s22_s28, [#allocation3], %s1429_s25, %s1429_s25, %s1430_s26  }
   0xc   :  { %s54_s8 = sshll.u32 %s2511_s3, 4  ;;  %s1432_s9 = smov [#allocation7]   ;;  %s55_s8 = int_to_ptr.hbm [resolvable:$true] %s54_s8 }
   0xd   :  { %38 = dma.vmem_to_smem %s33_s6, 256, %s1432_s9, [#allocation6], %s1429_s25, %s1429_s25, %s1430_s26  }
   0xe   :  { %s1433_s0 = smov [#allocation10]   ;;  %s66_s12 = sshll.u32 %s2512_s4, 4  ;;  %s67_s12 = int_to_ptr.vmem [resolvable:$true] %s66_s12 }
   0xf   :  { %60 = dma.hbm_to_smem %s55_s8, 256, %s1433_s0, [#allocation5], %s1429_s25, %s1429_s25, %s1430_s26  }
  0x10   :  { %s1434_s13 = smov [#allocation11]  }
  0x11   :  { %69 = dma.vmem_to_smem %s67_s12, 16, %s1434_s13, [#allocation9]  }
  0x12   :  { %1416 = dma.done.wait [#allocation3], 384  }
  0x13   :  { %1417 = vsyncadd [#allocation3], 4294966912 }
  0x14   :  { %1418 = dma.done.wait [#allocation6], 256  }
  0x15   :  { %1419 = vsyncadd [#allocation6], 4294967040 }
  0x16   :  { %1420 = dma.done.wait [#allocation9], 256  }
  0x17   :  { %1421 = vsyncadd [#allocation9], 4294967040 }
  0x18   :  { %1422 = dma.done.wait [#allocation5], 256  }
  0x19   :  { %1423 = vsyncadd [#allocation5], 4294967040 }
  0x1a   :  { %1424 = dma.done.wait [#allocation9], 16  }
  0x1b   :  { %1425 = vsyncadd [#allocation9], 4294967280 }
  0x1c   :  { %90 = sfence }
  0x1d   :  { %s1481_s1 = sld [smem:[#allocation7]]  ;;  %v1603_v0 = vld [vmem:[#allocation2] sm:$0xff]  ;;  %v1605_v1 = vld [vmem:[#allocation2 + $0x8] sm:$0xff]  ;;  %v1613_v4 = vld [vmem:[#allocation2 + $0x10] sm:$0xff] }
  0x1e   :  { %s1483_s3 = sld [smem:[#allocation7 + $0x1]] }
  0x1f   :  { %s1485_s14 = sld [smem:[#allocation7 + $0x2]] }
  0x20   :  { %s1487_s4 = sld [smem:[#allocation7 + $0x80]] }
  0x21   :  { %s1489_s15 = sld [smem:[#allocation7 + $0x81]] }
  0x22   :  { %s1491_s16 = sld [smem:[#allocation7 + $0x82]] }
  0x23   :  { %s1493_s17 = sld [smem:[#allocation7 + $0x100]]  ;;  %v97_v2 = vstv %s1481_s1 }
  0x24   :  { %s1495_s18 = sld [smem:[#allocation7 + $0x101]]  ;;  %v100_v3 = vstv %s1483_s3  ;;  %v98_v6 = vmul.f32 %v97_v2, %v1603_v0 }
  0x25   :  { %s1497_s19 = sld [smem:[#allocation7 + $0x102]]  ;;  %v104_v5 = vstv %s1485_s14  ;;  %v101_v7 = vmul.f32 %v100_v3, %v1605_v1 }
  0x26   :  { %s1499_s20 = sld [smem:[#allocation7 + $0x180]]  ;;  %v109_v8 = vstv %s1487_s4  ;;  %v105_v14 = vmul.f32 %v104_v5, %v1613_v4 }
  0x27   :  { %s1501_s21 = sld [smem:[#allocation7 + $0x181]]  ;;  %v112_v9 = vstv %s1489_s15  ;;  %v110_v16 = vmul.f32 %v109_v8, %v1603_v0  ;;  %v102_v24 = vadd.f32 %v101_v7, %v98_v6 }
  0x28   :  { %s1503_s22 = sld [smem:[#allocation7 + $0x182]]  ;;  %v113_v17 = vmul.f32 %v112_v9, %v1605_v1  ;;  %v116_v18 = vstv %s1491_s16 }
  0x29   :  { %s1505_s23 = sld [smem:[#allocation7 + $0x200]]  ;;  %v121_v10 = vstv %s1493_s17  ;;  %v117_v33 = vmul.f32 %v116_v18, %v1613_v4  ;;  %v106_v47 = vadd.f32 %v105_v14, %v102_v24 }
  0x2a   :  { %s1507_s24 = sld [smem:[#allocation7 + $0x201]]  ;;  %v124_v11 = vstv %s1495_s18  ;;  %v122_v20 = vmul.f32 %v121_v10, %v1603_v0  ;;  %v114_v32 = vadd.f32 %v113_v17, %v110_v16 }
  0x2b   :  { %s1509_s25 = sld [smem:[#allocation7 + $0x202]]  ;;  %v125_v21 = vmul.f32 %v124_v11, %v1605_v1  ;;  %v128_v25 = vstv %s1497_s19  ;;  %v1689_v59 = vmax.f32 %v106_v47, 0.0 }
  0x2c   :  { %s1511_s26 = sld [smem:[#allocation7 + $0x280]]  ;;  %v133_v12 = vstv %s1499_s20  ;;  %v129_v37 = vmul.f32 %v128_v25, %v1613_v4  ;;  %v118_v48 = vadd.f32 %v117_v33, %v114_v32 }
  0x2d   :  { %s1513_s27 = sld [smem:[#allocation7 + $0x281]]  ;;  %v136_v13 = vstv %s1501_s21  ;;  %v134_v22 = vmul.f32 %v133_v12, %v1603_v0  ;;  %v126_v36 = vadd.f32 %v125_v21, %v122_v20 }
  0x2e   :  { %s1515_s28 = sld [smem:[#allocation7 + $0x282]]  ;;  %v137_v23 = vmul.f32 %v136_v13, %v1605_v1  ;;  %v140_v26 = vstv %s1503_s22  ;;  %v1691_v60 = vmax.f32 %v118_v48, 0.0 }
  0x2f   :  { %s1517_s29 = sld [smem:[#allocation7 + $0x300]]  ;;  %v145_v15 = vstv %s1505_s23  ;;  %v141_v39 = vmul.f32 %v140_v26, %v1613_v4  ;;  %v130_v50 = vadd.f32 %v129_v37, %v126_v36 }
  0x30   :  { %s1519_s30 = sld [smem:[#allocation7 + $0x301]]  ;;  %v148_v19 = vstv %s1507_s24  ;;  %v146_v27 = vmul.f32 %v145_v15, %v1603_v0  ;;  %v138_v38 = vadd.f32 %v137_v23, %v134_v22 }
  0x31   :  { %s1521_s6 = sld [smem:[#allocation7 + $0x302]]  ;;  %v149_v28 = vmul.f32 %v148_v19, %v1605_v1  ;;  %v152_v29 = vstv %s1509_s25  ;;  %v1701_v3 = vmax.f32 %v130_v50, 0.0 }
  0x32   :  { %s1523_s2 = sld [smem:[#allocation7 + $0x380]]  ;;  %v157_v30 = vstv %s1511_s26  ;;  %v153_v40 = vmul.f32 %v152_v29, %v1613_v4  ;;  %v142_v51 = vadd.f32 %v141_v39, %v138_v38 }
  0x33   :  { %s1525_s7 = sld [smem:[#allocation7 + $0x381]]  ;;  %v160_v31 = vstv %s1513_s27  ;;  %v158_v41 = vmul.f32 %v157_v30, %v1603_v0  ;;  %v150_v43 = vadd.f32 %v149_v28, %v146_v27 }
  0x34   :  { %s1527_s8 = sld [smem:[#allocation7 + $0x382]]  ;;  %v161_v42 = vmul.f32 %v160_v31, %v1605_v1  ;;  %v164_v44 = vstv %s1515_s28  ;;  %v1703_v5 = vmax.f32 %v142_v51, 0.0 }
  0x35   :  { %s1529_s9 = sld [smem:[#allocation7 + $0x400]]  ;;  %v169_v34 = vstv %s1517_s29  ;;  %v165_v53 = vmul.f32 %v164_v44, %v1613_v4  ;;  %v154_v56 = vadd.f32 %v153_v40, %v150_v43 }
  0x36   :  { %s1531_s0 = sld [smem:[#allocation7 + $0x401]]  ;;  %v172_v35 = vstv %s1519_s30  ;;  %v170_v45 = vmul.f32 %v169_v34, %v1603_v0  ;;  %v162_v52 = vadd.f32 %v161_v42, %v158_v41 }
  0x37   :  { %2515 = sst [smem:[#allocation19_spill]] %s1521_s6  ;;  %v173_v46 = vmul.f32 %v172_v35, %v1605_v1  ;;  %v1708_v8 = vmax.f32 %v154_v56, 0.0 }
  0x38   :  { %2516 = sst [smem:[#allocation20_spill]] %s1523_s2  ;;  %v166_v6 = vadd.f32 %v165_v53, %v162_v52 }
  0x39   :  { %2517 = sst [smem:[#allocation21_spill]] %s1525_s7  ;;  %v174_v57 = vadd.f32 %v173_v46, %v170_v45 }
  0x3a   :  { %2518 = sst [smem:[#allocation22_spill]] %s1527_s8  ;;  %v1725_v20 = vmax.f32 %v166_v6, 0.0 }
  0x3b   :  { %2519 = sst [smem:[#allocation23_spill]] %s1529_s9 }
  0x3c   :  { %2520 = sst [smem:[#allocation24_spill]] %s1531_s0 }
  0x3d   :  { %s1533_s10 = sld [smem:[#allocation7 + $0x402]] }
  0x3e   :  { %s1535_s11 = sld [smem:[#allocation7 + $0x480]] }
  0x3f   :  { %s1537_s12 = sld [smem:[#allocation7 + $0x481]] }
  0x40   :  { %s1539_s13 = sld [smem:[#allocation7 + $0x482]] }
  0x41   :  { %s1541_s5 = sld [smem:[#allocation8]] }
  0x42   :  { %s1543_s6 = sld [smem:[#allocation8 + $0x1]] }
  0x43   :  { %2521 = sst [smem:[#allocation25_spill]] %s1533_s10 }
  0x44   :  { %2522 = sst [smem:[#allocation26_spill]] %s1535_s11 }
  0x45   :  { %2523 = sst [smem:[#allocation27_spill]] %s1537_s12 }
  0x46   :  { %2524 = sst [smem:[#allocation28_spill]] %s1539_s13 }
  0x47   :  { %2525 = sst [smem:[#allocation29_spill]] %s1541_s5 }
  0x48   :  { %2526 = sst [smem:[#allocation30_spill]] %s1543_s6 }
  0x49   :  { %s1545_s2 = sld [smem:[#allocation8 + $0x2]] }
  0x4a   :  { %s1547_s7 = sld [smem:[#allocation8 + $0x3]] }
  0x4b   :  { %s1549_s8 = sld [smem:[#allocation8 + $0x4]] }
  0x4c   :  { %s1551_s9 = sld [smem:[#allocation8 + $0x5]] }
  0x4d   :  { %s1553_s0 = sld [smem:[#allocation8 + $0x6]] }
  0x4e   :  { %s1555_s10 = sld [smem:[#allocation8 + $0x7]] }
  0x4f   :  { %2527 = sst [smem:[#allocation31_spill]] %s1545_s2 }
  0x50   :  { %2528 = sst [smem:[#allocation32_spill]] %s1547_s7 }
  0x51   :  { %2529 = sst [smem:[#allocation33_spill]] %s1549_s8 }
  0x52   :  { %2530 = sst [smem:[#allocation34_spill]] %s1551_s9 }
  0x53   :  { %2531 = sst [smem:[#allocation35_spill]] %s1553_s0 }
  0x54   :  { %2532 = sst [smem:[#allocation36_spill]] %s1555_s10 }
  0x55   :  { %s1557_s11 = sld [smem:[#allocation8 + $0x8]] }
  0x56   :  { %s1559_s12 = sld [smem:[#allocation8 + $0x9]] }
  0x57   :  { %s1561_s13 = sld [smem:[#allocation8 + $0x80]] }
  0x58   :  { %s1563_s5 = sld [smem:[#allocation8 + $0x81]] }
  0x59   :  { %s1565_s6 = sld [smem:[#allocation8 + $0x82]] }
  0x5a   :  { %s1567_s2 = sld [smem:[#allocation8 + $0x83]] }
  0x5b   :  { %2533 = sst [smem:[#allocation37_spill]] %s1557_s11 }
  0x5c   :  { %2534 = sst [smem:[#allocation38_spill]] %s1559_s12 }
  0x5d   :  { %s1569_s7 = sld [smem:[#allocation8 + $0x84]]  ;;  %v257_v10 = vstv %s1561_s13 }
  0x5e   :  { %2535 = sst [smem:[#allocation39_spill]] %s1563_s5  ;;  %v258_v22 = vmul.f32 %v257_v10, %v1689_v59 }
  0x5f   :  { %2536 = sst [smem:[#allocation40_spill]] %s1565_s6 }
  0x60   :  { %2537 = sst [smem:[#allocation41_spill]] %s1567_s2 }
  0x61   :  { %s1571_s8 = sld [smem:[#allocation8 + $0x85]] }
  0x62   :  { %s1573_s9 = sld [smem:[#allocation8 + $0x86]] }
  0x63   :  { %2538 = sst [smem:[#allocation42_spill]] %s1569_s7 }
  0x64   :  { %s1575_s0 = sld [smem:[#allocation8 + $0x87]] }
  0x65   :  { %s1577_s11 = sld [smem:[#allocation8 + $0x88]] }
  0x66   :  { %s1579_s12 = sld [smem:[#allocation8 + $0x89]] }
  0x67   :  { %2539 = sst [smem:[#allocation43_spill]] %s1571_s8 }
  0x68   :  { %2540 = sst [smem:[#allocation44_spill]] %s1573_s9 }
  0x69   :  { %s1581_s10 = sld [smem:[#allocation8 + $0x100]] }
  0x6a   :  { %2541 = sst [smem:[#allocation45_spill]] %s1575_s0 }
  0x6b   :  { %2542 = sst [smem:[#allocation46_spill]] %s1577_s11 }
  0x6c   :  { %2543 = sst [smem:[#allocation47_spill]] %s1579_s12 }
  0x6d   :  { %s1583_s5 = sld [smem:[#allocation8 + $0x101]] }
  0x6e   :  { %s1585_s6 = sld [smem:[#allocation8 + $0x102]] }
  0x6f   :  { %s1587_s7 = sld [smem:[#allocation8 + $0x103]]  ;;  %v297_v14 = vstv %s1581_s10 }
  0x70   :  { %s1589_s8 = sld [smem:[#allocation8 + $0x104]]  ;;  %v298_v26 = vmul.f32 %v297_v14, %v1689_v59 }
  0x71   :  { %s1591_s9 = sld [smem:[#allocation8 + $0x105]] }
  0x72   :  { %s1593_s0 = sld [smem:[#allocation8 + $0x106]] }
  0x73   :  { %2544 = sst [smem:[#allocation48_spill]] %s1583_s5 }
  0x74   :  { %s1595_s11 = sld [smem:[#allocation8 + $0x107]]  ;;  %v304_v31 = vstv %s1585_s6 }
  0x75   :  { %s1597_s12 = sld [smem:[#allocation8 + $0x108]]  ;;  %v305_v41 = vmul.f32 %v304_v31, %v1701_v3  ;;  %v308_v47 = vstv %s1587_s7 }
  0x76   :  { %s1599_s2 = sld [smem:[#allocation8 + $0x109]]  ;;  %v312_v6 = vstv %s1589_s8 }
  0x77   :  { %s1601_s5 = sld [smem:[#allocation8 + $0x180]] }
  0x78   :  { %2545 = sst [smem:[#allocation49_spill]] %s1593_s0 }
  0x79   :  { %s1609_s0 = sld [smem:[#allocation8 + $0x181]] }
  0x7a   :  { %2546 = sst [smem:[#allocation50_spill]] %s1595_s11 }
  0x7b   :  { %s1611_s11 = sld [smem:[#allocation8 + $0x182]] }
  0x7c   :  { %2547 = sst [smem:[#allocation51_spill]] %s1599_s2 }
  0x7d   :  { %s1616_s2 = sld [smem:[#allocation8 + $0x183]]  ;;  %v337_v42 = vstv %s1601_s5 }
  0x7e   :  { %s1622_s1 = sld [smem:[#allocation8 + $0x184]] }
  0x7f   :  { %s1628_s3 = sld [smem:[#allocation8 + $0x185]]  ;;  %v340_v43 = vstv %s1609_s0 }
  0x80   :  { %s1632_s14 = sld [smem:[#allocation8 + $0x186]] }
  0x81   :  { %s1638_s4 = sld [smem:[#allocation8 + $0x187]] }
  0x82   :  { %s1644_s15 = sld [smem:[#allocation8 + $0x188]] }
  0x83   :  { %s1649_s16 = sld [smem:[#allocation8 + $0x189]] }
  0x84   :  { %s1655_s17 = sld [smem:[#allocation8 + $0x200]] }
  0x85   :  { %s1660_s18 = sld [smem:[#allocation8 + $0x201]] }
  0x86   :  { %s2550_s19 = sld [smem:[#allocation19_spill]] }
  0x87   :  { %s1664_s20 = sld [smem:[#allocation8 + $0x202]] }
  0x88   :  { %2548 = sst [smem:[#allocation52_spill]] %s1644_s15 }
  0x89   :  { %2549 = sst [smem:[#allocation53_spill]] %s1649_s16 }
  0x8a   :  { %s2551_s21 = sld [smem:[#allocation20_spill]] }
  0x8b   :  { %s1669_s22 = sld [smem:[#allocation8 + $0x203]] }
  0x8c   :  { %s2552_s23 = sld [smem:[#allocation21_spill]]  ;;  %v176_v49 = vstv %s2550_s19 }
  0x8d   :  { %s1674_s24 = sld [smem:[#allocation8 + $0x204]]  ;;  %v177_v58 = vmul.f32 %v176_v49, %v1613_v4 }
  0x8e   :  { %s1677_s25 = sld [smem:[#allocation8 + $0x205]] }
  0x8f   :  { %s2554_s26 = sld [smem:[#allocation29_spill]]  ;;  %v178_v9 = vadd.f32 %v177_v58, %v174_v57  ;;  %v309_v58 = vmul.f32 %v308_v47, %v1703_v5 }
  0x90   :  { %s1679_s27 = sld [smem:[#allocation8 + $0x206]]  ;;  %v181_v54 = vstv %s2551_s21 }
  0x91   :  { %s2556_s29 = sld [smem:[#allocation30_spill]]  ;;  %v182_v61 = vmul.f32 %v181_v54, %v1603_v0  ;;  %v1743_v32 = vmax.f32 %v178_v9, 0.0  ;;  %v338_v54 = vmul.f32 %v337_v42, %v1689_v59 }
  0x92   :  { %v184_v55 = vstv %s2552_s23  ;;  %s1684_s28 = sld [smem:[#allocation8 + $0x207]] }
  0x93   :  { %s2558_s30 = sld [smem:[#allocation22_spill]]  ;;  %v185_v62 = vmul.f32 %v184_v55, %v1605_v1  ;;  %v341_v55 = vmul.f32 %v340_v43, %v1691_v60 }
  0x94   :  { %2553 = sst [smem:[#allocation19_spill]] %s1677_s25 }
  0x95   :  { %s1687_s19 = sld [smem:[#allocation8 + $0x208]]  ;;  %v217_v63 = vstv %s2554_s26  ;;  %v186_v16 = vadd.f32 %v185_v62, %v182_v61  ;;  %v344_v61 = vstv %s1611_s11 }
  0x96   :  { %2555 = sst [smem:[#allocation20_spill]] %s1679_s27  ;;  %v218_v12 = vmul.f32 %v217_v63, %v1689_v59  ;;  %v345_v14 = vmul.f32 %v344_v61, %v1701_v3 }
  0x97   :  { %s2560_s16 = sld [smem:[#allocation39_spill]]  ;;  %v220_v2 = vstv %s2556_s29 }
  0x98   :  { %2557 = sst [smem:[#allocation21_spill]] %s1684_s28  ;;  %v221_v13 = vmul.f32 %v220_v2, %v1691_v60 }
  0x99   :  { %s1693_s27 = sld [smem:[#allocation8 + $0x209]]  ;;  %v188_v7 = vstv %s2558_s30 }
  0x9a   :  { %s2562_s21 = sld [smem:[#allocation48_spill]]  ;;  %v189_v17 = vmul.f32 %v188_v7, %v1613_v4  ;;  %v222_v29 = vadd.f32 %v221_v13, %v218_v12  ;;  %v342_v13 = vadd.f32 %v341_v55, %v338_v54 }
  0x9b   :  { %2559 = sst [smem:[#allocation29_spill]] %s1687_s19 }
  0x9c   :  { %s1699_s23 = sld [smem:[#allocation8 + $0x280]]  ;;  %v190_v33 = vadd.f32 %v189_v17, %v186_v16  ;;  %v348_v17 = vstv %s1616_s2 }
  0x9d   :  { %s2564_s19 = sld [smem:[#allocation23_spill]]  ;;  %v260_v11 = vstv %s2560_s16 }
  0x9e   :  { %s2565_s28 = sld [smem:[#allocation31_spill]]  ;;  %v261_v23 = vmul.f32 %v260_v11, %v1691_v60  ;;  %v1779_v62 = vmax.f32 %v190_v33, 0.0  ;;  %v377_v33 = vstv %s1655_s17 }
  0x9f   :  { %2561 = sst [smem:[#allocation30_spill]] %s1693_s27 }
  0xa0   :  { %s1706_s25 = sld [smem:[#allocation8 + $0x281]]  ;;  %v300_v15 = vstv %s2562_s21  ;;  %v262_v37 = vadd.f32 %v261_v23, %v258_v22  ;;  %v316_v22 = vstv %s1591_s9 }
  0xa1   :  { %s2566_s27 = sld [smem:[#allocation24_spill]]  ;;  %v301_v27 = vmul.f32 %v300_v15, %v1691_v60  ;;  %v317_v31 = vmul.f32 %v316_v22, %v1725_v20 }
  0xa2   :  { %2563 = sst [smem:[#allocation22_spill]] %s1699_s23 }
  0xa3   :  { %s1712_s26 = sld [smem:[#allocation8 + $0x282]]  ;;  %v193_v18 = vstv %s2564_s19  ;;  %v302_v40 = vadd.f32 %v301_v27, %v298_v26 }
  0xa4   :  { %s2567_s29 = sld [smem:[#allocation25_spill]]  ;;  %v224_v19 = vstv %s2565_s28  ;;  %v194_v28 = vmul.f32 %v193_v18, %v1603_v0 }
  0xa5   :  { %s2568_s15 = sld [smem:[#allocation40_spill]]  ;;  %v225_v30 = vmul.f32 %v224_v19, %v1701_v3  ;;  %v306_v57 = vadd.f32 %v305_v41, %v302_v40 }
  0xa6   :  { %s1718_s23 = sld [smem:[#allocation8 + $0x283]] }
  0xa7   :  { %s1723_s13 = sld [smem:[#allocation8 + $0x284]]  ;;  %v196_v21 = vstv %s2566_s27  ;;  %v226_v45 = vadd.f32 %v225_v30, %v222_v29  ;;  %v310_v16 = vadd.f32 %v309_v58, %v306_v57  ;;  %v352_v29 = vstv %s1622_s1 }
  0xa8   :  { %s2569_s16 = sld [smem:[#allocation32_spill]]  ;;  %v197_v34 = vmul.f32 %v196_v21, %v1605_v1  ;;  %v353_v42 = vmul.f32 %v352_v29, %v1708_v8 }
  0xa9   :  { %s1730_s10 = sld [smem:[#allocation8 + $0x285]] }
  0xaa   :  { %v200_v24 = vstv %s2567_s29  ;;  %s2570_s30 = sld [smem:[#allocation41_spill]]  ;;  %v198_v48 = vadd.f32 %v197_v34, %v194_v28  ;;  %v346_v28 = vadd.f32 %v345_v14, %v342_v13  ;;  %v380_v34 = vstv %s1660_s18 }
  0xab   :  { %v264_v25 = vstv %s2568_s15  ;;  %s1736_s28 = sld [smem:[#allocation8 + $0x286]]  ;;  %v201_v36 = vmul.f32 %v200_v24, %v1613_v4  ;;  %v328_v14 = vstv %s1597_s12 }
  0xac   :  { %s1741_s27 = sld [smem:[#allocation8 + $0x287]]  ;;  %v265_v38 = vmul.f32 %v264_v25, %v1701_v3 }
  0xad   :  { %s2573_s19 = sld [smem:[#allocation26_spill]]  ;;  %v202_v15 = vadd.f32 %v201_v36, %v198_v48 }
  0xae   :  { %v228_v35 = vstv %s2569_s16  ;;  %s1747_s15 = sld [smem:[#allocation8 + $0x288]]  ;;  %v266_v52 = vadd.f32 %v265_v38, %v262_v37 }
  0xaf   :  { %s2575_s21 = sld [smem:[#allocation27_spill]]  ;;  %v229_v46 = vmul.f32 %v228_v35, %v1703_v5  ;;  %v1818_v35 = vmax.f32 %v202_v15, 0.0 }
  0xb0   :  { %s2576_s29 = sld [smem:[#allocation33_spill]]  ;;  %v268_v39 = vstv %s2570_s30 }
  0xb1   :  { %2571 = sst [smem:[#allocation39_spill]] %s1736_s28  ;;  %v269_v51 = vmul.f32 %v268_v39, %v1703_v5  ;;  %v230_v63 = vadd.f32 %v229_v46, %v226_v45  ;;  %v378_v45 = vmul.f32 %v377_v33, %v1689_v59  ;;  %v381_v46 = vmul.f32 %v380_v34, %v1691_v60 }
  0xb2   :  { %2572 = sst [smem:[#allocation48_spill]] %s1741_s27  ;;  %v420_v33 = vstv %s1706_s25 }
  0xb3   :  { %s1752_s6 = sld [smem:[#allocation8 + $0x289]]  ;;  %v205_v44 = vstv %s2573_s19  ;;  %v270_v11 = vadd.f32 %v269_v51, %v266_v52 }
  0xb4   :  { %2574 = sst [smem:[#allocation23_spill]] %s1747_s15  ;;  %v206_v56 = vmul.f32 %v205_v44, %v1603_v0  ;;  %v356_v44 = vstv %s1628_s3 }
  0xb5   :  { %s2578_s27 = sld [smem:[#allocation42_spill]]  ;;  %v208_v49 = vstv %s2575_s21  ;;  %v357_v58 = vmul.f32 %v356_v44, %v1725_v20  ;;  %v421_v44 = vmul.f32 %v420_v33, %v1691_v60 }
  0xb6   :  { %s1757_s28 = sld [smem:[#allocation8 + $0x300]]  ;;  %v232_v50 = vstv %s2576_s29  ;;  %v209_v7 = vmul.f32 %v208_v49, %v1605_v1  ;;  %v313_v1 = vmul.f32 %v312_v6, %v1708_v8 }
  0xb7   :  { %s1762_s16 = sld [smem:[#allocation8 + $0x301]]  ;;  %v233_v2 = vmul.f32 %v232_v50, %v1708_v8  ;;  %v384_v50 = vstv %s1664_s20 }
  0xb8   :  { %s1767_s30 = sld [smem:[#allocation8 + $0x302]]  ;;  %v210_v23 = vadd.f32 %v209_v7, %v206_v56  ;;  %v314_v30 = vadd.f32 %v313_v1, %v310_v16  ;;  %v385_v6 = vmul.f32 %v384_v50, %v1701_v3 }
  0xb9   :  { %2577 = sst [smem:[#allocation31_spill]] %s1752_s6  ;;  %v234_v19 = vadd.f32 %v233_v2, %v230_v63  ;;  %v360_v63 = vstv %s1632_s14  ;;  %v382_v2 = vadd.f32 %v381_v46, %v378_v45 }
  0xba   :  { %s2579_s5 = sld [smem:[#allocation28_spill]]  ;;  %v318_v48 = vadd.f32 %v317_v31, %v314_v30 }
  0xbb   :  { %v272_v53 = vstv %s2578_s27  ;;  %s2580_s0 = sld [smem:[#allocation34_spill]] }
  0xbc   :  { %s1772_s19 = sld [smem:[#allocation8 + $0x303]]  ;;  %v273_v10 = vmul.f32 %v272_v53, %v1708_v8 }
  0xbd   :  { %s2581_s7 = sld [smem:[#allocation43_spill]] }
  0xbe   :  { %s1777_s21 = sld [smem:[#allocation8 + $0x304]]  ;;  %v274_v27 = vadd.f32 %v273_v10, %v270_v11  ;;  %v388_v10 = vstv %s1669_s22 }
  0xbf   :  { %s1783_s27 = sld [smem:[#allocation8 + $0x305]]  ;;  %v389_v22 = vmul.f32 %v388_v10, %v1703_v5 }
  0xc0   :  { %v212_v9 = vstv %s2579_s5  ;;  %s1789_s29 = sld [smem:[#allocation8 + $0x306]] }
  0xc1   :  { %v236_v0 = vstv %s2580_s0  ;;  %s2582_s11 = sld [smem:[#allocation35_spill]]  ;;  %v213_v18 = vmul.f32 %v212_v9, %v1613_v4  ;;  %v349_v4 = vmul.f32 %v348_v17, %v1703_v5  ;;  %v361_v17 = vmul.f32 %v360_v63, %v1743_v32 }
  0xc2   :  { %s2583_s6 = sld [smem:[#allocation44_spill]]  ;;  %v237_v21 = vmul.f32 %v236_v0, %v1725_v20 }
  0xc3   :  { %v276_v12 = vstv %s2581_s7  ;;  %s1793_s15 = sld [smem:[#allocation8 + $0x307]]  ;;  %v350_v43 = vadd.f32 %v349_v4, %v346_v28  ;;  %v214_v51 = vadd.f32 %v213_v18, %v210_v23 }
  0xc4   :  { %s1797_s8 = sld [smem:[#allocation8 + $0x308]]  ;;  %v277_v25 = vmul.f32 %v276_v12, %v1725_v20  ;;  %v238_v36 = vadd.f32 %v237_v21, %v234_v19  ;;  %v364_v19 = vstv %s1638_s4  ;;  %v386_v21 = vadd.f32 %v385_v6, %v382_v2 }
  0xc5   :  { %s1802_s5 = sld [smem:[#allocation8 + $0x309]]  ;;  %v354_v61 = vadd.f32 %v353_v42, %v350_v43  ;;  %v1857_v11 = vmax.f32 %v214_v51, 0.0  ;;  %v365_v30 = vmul.f32 %v364_v19, %v1779_v62  ;;  %v428_v2 = vstv %s1718_s23 }
  0xc6   :  { %s2587_s0 = sld [smem:[#allocation49_spill]]  ;;  %v278_v47 = vadd.f32 %v277_v25, %v274_v27  ;;  %v329_v25 = vmul.f32 %v328_v14, %v1818_v35 }
  0xc7   :  { %v240_v24 = vstv %s2582_s11  ;;  %s1807_s7 = sld [smem:[#allocation8 + $0x380]]  ;;  %v358_v18 = vadd.f32 %v357_v58, %v354_v61  ;;  %v460_v58 = vstv %s1762_s16 }
  0xc8   :  { %v280_v26 = vstv %s2583_s6  ;;  %s2588_s2 = sld [smem:[#allocation36_spill]]  ;;  %v241_v37 = vmul.f32 %v240_v24, %v1743_v32  ;;  %v461_v14 = vmul.f32 %v460_v58, %v1691_v60 }
  0xc9   :  { %2584 = sst [smem:[#allocation24_spill]] %s1793_s15  ;;  %v281_v40 = vmul.f32 %v280_v26, %v1743_v32  ;;  %v392_v26 = vstv %s1674_s24  ;;  %v362_v34 = vadd.f32 %v361_v17, %v358_v18  ;;  %v464_v17 = vstv %s1767_s30 }
  0xca   :  { %2585 = sst [smem:[#allocation25_spill]] %s1797_s8  ;;  %v242_v52 = vadd.f32 %v241_v37, %v238_v36  ;;  %v390_v37 = vadd.f32 %v389_v22, %v386_v21  ;;  %v432_v22 = vstv %s1723_s13 }
  0xcb   :  { %2586 = sst [smem:[#allocation40_spill]] %s1802_s5  ;;  %v282_v7 = vadd.f32 %v281_v40, %v278_v47  ;;  %v424_v47 = vstv %s1712_s26  ;;  %v433_v33 = vmul.f32 %v432_v22, %v1708_v8 }
  0xcc   :  { %s2589_s8 = sld [smem:[#allocation45_spill]]  ;;  %v320_v38 = vstv %s2587_s0 }
  0xcd   :  { %s1811_s15 = sld [smem:[#allocation8 + $0x381]]  ;;  %v321_v49 = vmul.f32 %v320_v38, %v1743_v32  ;;  %v393_v38 = vmul.f32 %v392_v26, %v1708_v8 }
  0xce   :  { %s1816_s9 = sld [smem:[#allocation8 + $0x382]]  ;;  %v244_v39 = vstv %s2588_s2 }
  0xcf   :  { %s1822_s6 = sld [smem:[#allocation8 + $0x383]]  ;;  %v245_v53 = vmul.f32 %v244_v39, %v1779_v62  ;;  %v322_v9 = vadd.f32 %v321_v49, %v318_v48  ;;  %v366_v48 = vadd.f32 %v365_v30, %v362_v34  ;;  %v394_v49 = vadd.f32 %v393_v38, %v390_v37 }
  0xd0   :  { %s2590_s1 = sld [smem:[#allocation50_spill]]  ;;  %v468_v34 = vstv %s1772_s19 }
  0xd1   :  { %s1828_s17 = sld [smem:[#allocation8 + $0x384]]  ;;  %v246_v12 = vadd.f32 %v245_v53, %v242_v52 }
  0xd2   :  { %v284_v41 = vstv %s2589_s8  ;;  %s2591_s18 = sld [smem:[#allocation37_spill]] }
  0xd3   :  { %s2592_s11 = sld [smem:[#allocation46_spill]]  ;;  %v285_v56 = vmul.f32 %v284_v41, %v1779_v62  ;;  %v500_v26 = vstv %s1811_s15 }
  0xd4   :  { %s1833_s0 = sld [smem:[#allocation8 + $0x385]] }
  0xd5   :  { %s1837_s8 = sld [smem:[#allocation8 + $0x386]]  ;;  %v286_v23 = vadd.f32 %v285_v56, %v282_v7  ;;  %v425_v56 = vmul.f32 %v424_v47, %v1701_v3 }
  0xd6   :  { %v324_v54 = vstv %s2590_s1  ;;  %s1841_s3 = sld [smem:[#allocation8 + $0x387]] }
  0xd7   :  { %s1847_s2 = sld [smem:[#allocation8 + $0x388]]  ;;  %v325_v0 = vmul.f32 %v324_v54, %v1779_v62 }
  0xd8   :  { %v248_v55 = vstv %s2591_s18  ;;  %s2596_s20 = sld [smem:[#allocation38_spill]] }
  0xd9   :  { %v288_v57 = vstv %s2592_s11  ;;  %s2597_s5 = sld [smem:[#allocation47_spill]]  ;;  %v249_v13 = vmul.f32 %v248_v55, %v1818_v35  ;;  %v326_v24 = vadd.f32 %v325_v0, %v322_v9 }
  0xda   :  { %s1855_s1 = sld [smem:[#allocation8 + $0x400]]  ;;  %v289_v16 = vmul.f32 %v288_v57, %v1818_v35  ;;  %v457_v57 = vstv %s1757_s28 }
  0xdb   :  { %2593 = sst [smem:[#allocation32_spill]] %s1837_s8  ;;  %v250_v27 = vadd.f32 %v249_v13, %v246_v12  ;;  %v330_v40 = vadd.f32 %v329_v25, %v326_v24  ;;  %v458_v13 = vmul.f32 %v457_v57, %v1689_v59  ;;  %v497_v25 = vstv %s1807_s7 }
  0xdc   :  { %2594 = sst [smem:[#allocation41_spill]] %s1841_s3  ;;  %v290_v39 = vadd.f32 %v289_v16, %v286_v23  ;;  %v498_v38 = vmul.f32 %v497_v25, %v1689_v59  ;;  %v508_v57 = vstv %s1822_s6 }
  0xdd   :  { %2595 = sst [smem:[#allocation26_spill]] %s1847_s2 }
  0xde   :  { %s1851_s8 = sld [smem:[#allocation8 + $0x389]]  ;;  %v252_v15 = vstv %s2596_s20 }
  0xdf   :  { %s1861_s14 = sld [smem:[#allocation8 + $0x401]]  ;;  %v292_v1 = vstv %s2597_s5  ;;  %v253_v28 = vmul.f32 %v252_v15, %v1857_v11 }
  0xe0   :  { %s2599_s18 = sld [smem:[#allocation51_spill]]  ;;  %v293_v29 = vmul.f32 %v292_v1, %v1857_v11  ;;  %v429_v1 = vmul.f32 %v428_v2, %v1703_v5 }
  0xe1   :  { %s1867_s11 = sld [smem:[#allocation8 + $0x402]]  ;;  %v254_v52 = vadd.f32 %v253_v28, %v250_v27  ;;  %v462_v27 = vadd.f32 %v461_v14, %v458_v13  ;;  %v465_v28 = vmul.f32 %v464_v17, %v1701_v3  ;;  %v509_v17 = vmul.f32 %v508_v57, %v1703_v5 }
  0xe2   :  { %s2600_s22 = sld [smem:[#allocation22_spill]]  ;;  %v294_v53 = vadd.f32 %v293_v29, %v290_v39  ;;  %v501_v39 = vmul.f32 %v500_v26, %v1691_v60 }
  0xe3   :  { %s2601_s12 = sld [smem:[#allocation52_spill]]  ;;  %v1924_v10 = vmax.f32 %v254_v52, 0.0 }
  0xe4   :  { %2598 = sst [smem:[#allocation27_spill]] %s1851_s8  ;;  %v1926_v12 = vmax.f32 %v294_v53, 0.0  ;;  %v502_v52 = vadd.f32 %v501_v39, %v498_v38 }
  0xe5   :  { %s1871_s8 = sld [smem:[#allocation8 + $0x403]]  ;;  %v540_v29 = vstv %s1861_s14 }
  0xe6   :  { %s1875_s5 = sld [smem:[#allocation8 + $0x404]]  ;;  %v332_v4 = vstv %s2599_s18 }
  0xe7   :  { %s2602_s20 = sld [smem:[#allocation19_spill]]  ;;  %v333_v41 = vmul.f32 %v332_v4, %v1857_v11  ;;  %v537_v4 = vstv %s1855_s1  ;;  %v544_v47 = vstv %s1867_s11 }
  0xe8   :  { %s1879_s4 = sld [smem:[#allocation8 + $0x405]]  ;;  %v417_v31 = vstv %s2600_s22 }
  0xe9   :  { %s2604_s2 = sld [smem:[#allocation53_spill]]  ;;  %v368_v36 = vstv %s2601_s12  ;;  %v418_v43 = vmul.f32 %v417_v31, %v1689_v59  ;;  %v334_v54 = vadd.f32 %v333_v41, %v330_v40  ;;  %v504_v41 = vstv %s1816_s9 }
  0xea   :  { %s1885_s3 = sld [smem:[#allocation8 + $0x406]]  ;;  %v369_v45 = vmul.f32 %v368_v36, %v1818_v35  ;;  %v436_v36 = vstv %s1730_s10  ;;  %v505_v53 = vmul.f32 %v504_v41, %v1701_v3 }
  0xeb   :  { %s1889_s24 = sld [smem:[#allocation8 + $0x407]]  ;;  %v422_v55 = vadd.f32 %v421_v44, %v418_v43  ;;  %v1932_v15 = vmax.f32 %v334_v54, 0.0  ;;  %v541_v43 = vmul.f32 %v540_v29, %v1691_v60 }
  0xec   :  { %s2606_s18 = sld [smem:[#allocation20_spill]]  ;;  %v370_v6 = vadd.f32 %v369_v45, %v366_v48  ;;  %v466_v45 = vadd.f32 %v465_v28, %v462_v27  ;;  %v552_v25 = vstv %s1875_s5  ;;  %v480_v27 = vstv %s1789_s29 }
  0xed   :  { %v396_v42 = vstv %s2602_s20  ;;  %s1897_s25 = sld [smem:[#allocation8 + $0x409]]  ;;  %v426_v16 = vadd.f32 %v425_v56, %v422_v55  ;;  %v553_v39 = vmul.f32 %v552_v25, %v1708_v8  ;;  %v481_v41 = vmul.f32 %v480_v27, %v1743_v32 }
  0xee   :  { %2603 = sst [smem:[#allocation33_spill]] %s1879_s4  ;;  %v397_v50 = vmul.f32 %v396_v42, %v1725_v20  ;;  %v538_v42 = vmul.f32 %v537_v4, %v1689_v59 }
  0xef   :  { %s1893_s4 = sld [smem:[#allocation8 + $0x408]]  ;;  %v372_v46 = vstv %s2604_s2  ;;  %v430_v31 = vadd.f32 %v429_v1, %v426_v16  ;;  %v506_v1 = vadd.f32 %v505_v53, %v502_v52 }
  0xf0   :  { %s1902_s22 = sld [smem:[#allocation8 + $0x480]]  ;;  %v373_v61 = vmul.f32 %v372_v46, %v1857_v11  ;;  %v398_v7 = vadd.f32 %v397_v50, %v394_v49  ;;  %v469_v46 = vmul.f32 %v468_v34, %v1703_v5  ;;  %v437_v49 = vmul.f32 %v436_v36, %v1725_v20 }
  0xf1   :  { %2605 = sst [smem:[#allocation42_spill]] %s1889_s24  ;;  %v434_v48 = vadd.f32 %v433_v33, %v430_v31  ;;  %v542_v58 = vadd.f32 %v541_v43, %v538_v42  ;;  %v510_v31 = vadd.f32 %v509_v17, %v506_v1 }
  0xf2   :  { %v400_v51 = vstv %s2606_s18  ;;  %s1906_s12 = sld [smem:[#allocation8 + $0x481]]  ;;  %v374_v23 = vadd.f32 %v373_v61, %v370_v6  ;;  %v545_v61 = vmul.f32 %v544_v47, %v1701_v3  ;;  %v470_v2 = vadd.f32 %v469_v46, %v466_v45 }
  0xf3   :  { %2608 = sst [smem:[#allocation34_spill]] %s1897_s25  ;;  %v401_v63 = vmul.f32 %v400_v51, %v1743_v32  ;;  %v472_v51 = vstv %s1777_s21 }
  0xf4   :  { %s2609_s20 = sld [smem:[#allocation21_spill]]  ;;  %v1966_v40 = vmax.f32 %v374_v23, 0.0  ;;  %v473_v6 = vmul.f32 %v472_v51, %v1708_v8  ;;  %v546_v22 = vadd.f32 %v545_v61, %v542_v58 }
  0xf5   :  { %2607 = sst [smem:[#allocation28_spill]] %s1893_s4  ;;  %v402_v24 = vadd.f32 %v401_v63, %v398_v7  ;;  %v548_v7 = vstv %s1871_s8 }
  0xf6   :  { %s2610_s4 = sld [smem:[#allocation29_spill]]  ;;  %v577_v54 = vstv %s1902_s22  ;;  %v474_v23 = vadd.f32 %v473_v6, %v470_v2 }
  0xf7   :  { %s1908_s25 = sld [smem:[#allocation8 + $0x482]]  ;;  %v578_v13 = vmul.f32 %v577_v54, %v1689_v59  ;;  %v549_v59 = vmul.f32 %v548_v7, %v1703_v5 }
  0xf8   :  { %s1913_s26 = sld [smem:[#allocation8 + $0x483]]  ;;  %v580_v55 = vstv %s1906_s12 }
  0xf9   :  { %s1918_s2 = sld [smem:[#allocation8 + $0x484]]  ;;  %v581_v14 = vmul.f32 %v580_v55, %v1691_v60  ;;  %v550_v38 = vadd.f32 %v549_v59, %v546_v22  ;;  %v560_v55 = vstv %s1885_s3 }
  0xfa   :  { %s2611_s18 = sld [smem:[#allocation30_spill]]  ;;  %v404_v9 = vstv %s2609_s20 }
  0xfb   :  { %s1922_s24 = sld [smem:[#allocation8 + $0x485]]  ;;  %v405_v18 = vmul.f32 %v404_v9, %v1779_v62  ;;  %v438_v9 = vadd.f32 %v437_v49, %v434_v48  ;;  %v582_v28 = vadd.f32 %v581_v14, %v578_v13  ;;  %v554_v53 = vadd.f32 %v553_v39, %v550_v38 }
  0xfc   :  { %v408_v0 = vstv %s2610_s4  ;;  %s1930_s23 = sld [smem:[#allocation8 + $0x486]]  ;;  %v561_v14 = vmul.f32 %v560_v55, %v1743_v32 }
  0xfd   :  { %s1936_s28 = sld [smem:[#allocation8 + $0x487]]  ;;  %v409_v19 = vmul.f32 %v408_v0, %v1818_v35  ;;  %v406_v44 = vadd.f32 %v405_v18, %v402_v24  ;;  %v476_v0 = vstv %s1783_s27  ;;  %v584_v18 = vstv %s1908_s25 }
  0xfe   :  { %s1942_s16 = sld [smem:[#allocation8 + $0x488]]  ;;  %v477_v24 = vmul.f32 %v476_v0, %v1725_v20  ;;  %v585_v4 = vmul.f32 %v584_v18, %v1701_v3  ;;  %v588_v34 = vstv %s1913_s26 }
  0xff   :  { %s2612_s4 = sld [smem:[#allocation39_spill]]  ;;  %v410_v63 = vadd.f32 %v409_v19, %v406_v44  ;;  %v589_v46 = vmul.f32 %v588_v34, %v1703_v5 }
 0x100   :  { %v412_v21 = vstv %s2611_s18  ;;  %s1946_s20 = sld [smem:[#allocation8 + $0x489]]  ;;  %v478_v3 = vadd.f32 %v477_v24, %v474_v23  ;;  %v586_v45 = vadd.f32 %v585_v4, %v582_v28 }
 0x101   :  { %s1951_s30 = sld [smem:[#allocation10]]  ;;  %v1954_v30 = vmul.f32 %v412_v21, %v1857_v11  ;;  %v512_v21 = vstv %s1828_s17  ;;  %v596_v0 = vstv %s1922_s24 }
 0x102   :  { %s1958_s13 = sld [smem:[#allocation10 + $0x1]]  ;;  %v513_v33 = vmul.f32 %v512_v21, %v1708_v8  ;;  %v482_v5 = vadd.f32 %v481_v41, %v478_v3 }
 0x103   :  { %s1964_s15 = sld [smem:[#allocation10 + $0x2]]  ;;  %v414_v29 = vadd.f32 %v1954_v30, %v410_v63  ;;  %v590_v63 = vadd.f32 %v589_v46, %v586_v45 }
 0x104   :  { %s1971_s19 = sld [smem:[#allocation10 + $0x3]]  ;;  %v514_v48 = vadd.f32 %v513_v33, %v510_v31 }
 0x105   :  { %v440_v37 = vstv %s2612_s4  ;;  %s2613_s10 = sld [smem:[#allocation48_spill]]  ;;  %v2039_v47 = vmax.f32 %v414_v29, 0.0 }
 0x106   :  { %s1975_s7 = sld [smem:[#allocation10 + $0x4]]  ;;  %v441_v50 = vmul.f32 %v440_v37, %v1743_v32  ;;  %v516_v37 = vstv %s1833_s0 }
 0x107   :  { %s1980_s9 = sld [smem:[#allocation10 + $0x5]]  ;;  %v517_v49 = vmul.f32 %v516_v37, %v1725_v20 }
 0x108   :  { %s1985_s1 = sld [smem:[#allocation10 + $0x6]]  ;;  %v442_v26 = vadd.f32 %v441_v50, %v438_v9  ;;  %v592_v50 = vstv %s1918_s2  ;;  %v620_v57 = vstv %s1958_s13 }
 0x109   :  { %s1990_s14 = sld [smem:[#allocation10 + $0x7]]  ;;  %v593_v2 = vmul.f32 %v592_v50, %v1708_v8  ;;  %v518_v6 = vadd.f32 %v517_v49, %v514_v48  ;;  %v621_v1 = vmul.f32 %v620_v57, %v1926_v12 }
 0x10a   :  { %s2614_s11 = sld [smem:[#allocation23_spill]]  ;;  %v628_v34 = vstv %s1971_s19 }
 0x10b   :  { %v444_v56 = vstv %s2613_s10  ;;  %s1994_s21 = sld [smem:[#allocation10 + $0x8]]  ;;  %v594_v59 = vadd.f32 %v593_v2, %v590_v63  ;;  %v629_v46 = vmul.f32 %v628_v34, %v1966_v40 }
 0x10c   :  { %s2615_s22 = sld [smem:[#allocation31_spill]]  ;;  %v445_v16 = vmul.f32 %v444_v56, %v1779_v62  ;;  %v617_v56 = vstv %s1951_s30  ;;  %v632_v48 = vstv %s1975_s7 }
 0x10d   :  { %s1999_s6 = sld [smem:[#allocation10 + $0x9]]  ;;  %v633_v63 = vmul.f32 %v632_v48, %v2039_v47 }
 0x10e   :  { %s2004_s8 = sld [smem:[#allocation10 + $0x80]]  ;;  %v446_v43 = vadd.f32 %v445_v16, %v442_v26  ;;  %v618_v16 = vmul.f32 %v617_v56, %v1924_v10  ;;  %v600_v26 = vstv %s1930_s23 }
 0x10f   :  { %s2009_s27 = sld [smem:[#allocation10 + $0x81]]  ;;  %v601_v37 = vmul.f32 %v600_v26, %v1743_v32 }
 0x110   :  { %v448_v19 = vstv %s2614_s11  ;;  %s2014_s12 = sld [smem:[#allocation10 + $0x82]]  ;;  %v622_v4 = vadd.f32 %v621_v1, %v618_v16 }
 0x111   :  { %s2616_s25 = sld [smem:[#allocation24_spill]]  ;;  %v449_v36 = vmul.f32 %v448_v19, %v1818_v35  ;;  %v624_v19 = vstv %s1964_s15 }
 0x112   :  { %v452_v60 = vstv %s2615_s22  ;;  %s2617_s17 = sld [smem:[#allocation33_spill]]  ;;  %v625_v29 = vmul.f32 %v624_v19, %v1932_v15 }
 0x113   :  { %s2018_s18 = sld [smem:[#allocation10 + $0x83]]  ;;  %v453_v44 = vmul.f32 %v452_v60, %v1857_v11  ;;  %v450_v58 = vadd.f32 %v449_v36, %v446_v43  ;;  %v597_v60 = vmul.f32 %v596_v0, %v1725_v20 }
 0x114   :  { %s2023_s4 = sld [smem:[#allocation10 + $0x84]]  ;;  %v657_v38 = vstv %s2004_s8  ;;  %v626_v45 = vadd.f32 %v625_v29, %v622_v4 }
 0x115   :  { %s2028_s29 = sld [smem:[#allocation10 + $0x85]]  ;;  %v454_v21 = vadd.f32 %v453_v44, %v450_v58  ;;  %v598_v36 = vadd.f32 %v597_v60, %v594_v59  ;;  %v660_v39 = vstv %s2009_s27  ;;  %v658_v49 = vmul.f32 %v657_v38, %v1924_v10 }
 0x116   :  { %s2618_s5 = sld [smem:[#allocation32_spill]]  ;;  %v661_v50 = vmul.f32 %v660_v39, %v1926_v12 }
 0x117   :  { %v484_v30 = vstv %s2616_s25  ;;  %s2033_s10 = sld [smem:[#allocation10 + $0x86]] }
 0x118   :  { %v556_v42 = vstv %s2617_s17  ;;  %s2037_s0 = sld [smem:[#allocation10 + $0x87]]  ;;  %v485_v51 = vmul.f32 %v484_v30, %v1779_v62 }
 0x119   :  { %s2619_s26 = sld [smem:[#allocation25_spill]]  ;;  %v557_v54 = vmul.f32 %v556_v42, %v1725_v20  ;;  %v604_v42 = vstv %s1936_s28 }
 0x11a   :  { %s2043_s11 = sld [smem:[#allocation10 + $0x88]]  ;;  %v486_v8 = vadd.f32 %v485_v51, %v482_v5  ;;  %v602_v51 = vadd.f32 %v601_v37, %v598_v36  ;;  %v2117_v5 = vmax.f32 %v454_v21, 0.0  ;;  %v640_v21 = vstv %s1985_s1 }
 0x11b   :  { %s2621_s22 = sld [smem:[#allocation41_spill]]  ;;  %v558_v13 = vadd.f32 %v557_v54, %v554_v53  ;;  %v608_v53 = vstv %s1942_s16  ;;  %v664_v54 = vstv %s2014_s12  ;;  %v672_v26 = vstv %s2023_s4 }
 0x11c   :  { %v520_v52 = vstv %s2618_s5  ;;  %s2048_s25 = sld [smem:[#allocation10 + $0x89]]  ;;  %v609_v2 = vmul.f32 %v608_v53, %v1818_v35  ;;  %v673_v34 = vmul.f32 %v672_v26, %v2039_v47 }
 0x11d   :  { %s2053_s17 = sld [smem:[#allocation10 + $0x100]]  ;;  %v521_v7 = vmul.f32 %v520_v52, %v1743_v32  ;;  %v562_v27 = vadd.f32 %v561_v14, %v558_v13  ;;  %v605_v52 = vmul.f32 %v604_v42, %v1779_v62  ;;  %v668_v13 = vstv %s2018_s18 }
 0x11e   :  { %s2622_s2 = sld [smem:[#allocation42_spill]]  ;;  %v669_v59 = vmul.f32 %v668_v13, %v1966_v40  ;;  %v680_v53 = vstv %s2033_s10 }
 0x11f   :  { %v488_v61 = vstv %s2619_s26  ;;  %s2057_s5 = sld [smem:[#allocation10 + $0x101]]  ;;  %v522_v23 = vadd.f32 %v521_v7, %v518_v6  ;;  %v636_v6 = vstv %s1980_s9  ;;  %v662_v7 = vadd.f32 %v661_v50, %v658_v49 }
 0x120   :  { %2620 = sst [smem:[#allocation43_spill]] %s2043_s11  ;;  %v489_v17 = vmul.f32 %v488_v61, %v1818_v35  ;;  %v606_v0 = vadd.f32 %v605_v52, %v602_v51  ;;  %v637_v19 = vmul.f32 %v636_v6, %v2117_v5 }
 0x121   :  { %s2623_s11 = sld [smem:[#allocation40_spill]]  ;;  %v524_v9 = vstv %s2621_s22 }
 0x122   :  { %s2062_s3 = sld [smem:[#allocation10 + $0x102]]  ;;  %v525_v24 = vmul.f32 %v524_v9, %v1779_v62  ;;  %v490_v20 = vadd.f32 %v489_v17, %v486_v8  ;;  %v665_v9 = vmul.f32 %v664_v54, %v1932_v15  ;;  %v612_v17 = vstv %s1946_s20 }
 0x123   :  { %s2624_s30 = sld [smem:[#allocation26_spill]]  ;;  %v697_v14 = vstv %s2053_s17 }
 0x124   :  { %s2067_s13 = sld [smem:[#allocation10 + $0x103]]  ;;  %v564_v18 = vstv %s2622_s2  ;;  %v526_v3 = vadd.f32 %v525_v24, %v522_v23  ;;  %v698_v60 = vmul.f32 %v697_v14, %v1924_v10  ;;  %v610_v24 = vadd.f32 %v609_v2, %v606_v0 }
 0x125   :  { %s2072_s26 = sld [smem:[#allocation10 + $0x104]]  ;;  %v565_v28 = vmul.f32 %v564_v18, %v1779_v62  ;;  %v630_v62 = vadd.f32 %v629_v46, %v626_v45  ;;  %v700_v16 = vstv %s2057_s5 }
 0x126   :  { %s2625_s24 = sld [smem:[#allocation28_spill]]  ;;  %v701_v23 = vmul.f32 %v700_v16, %v1926_v12 }
 0x127   :  { %v492_v22 = vstv %s2623_s11  ;;  %s2076_s22 = sld [smem:[#allocation10 + $0x105]]  ;;  %v566_v43 = vadd.f32 %v565_v28, %v562_v27  ;;  %v634_v18 = vadd.f32 %v633_v63, %v630_v62  ;;  %v652_v62 = vstv %s1999_s6 }
 0x128   :  { %s2081_s2 = sld [smem:[#allocation10 + $0x106]]  ;;  %v493_v31 = vmul.f32 %v492_v22, %v1857_v11  ;;  %v666_v22 = vadd.f32 %v665_v9, %v662_v7  ;;  %v704_v27 = vstv %s2062_s3  ;;  %v702_v36 = vadd.f32 %v701_v23, %v698_v60 }
 0x129   :  { %v528_v25 = vstv %s2624_s30  ;;  %s2627_s15 = sld [smem:[#allocation27_spill]]  ;;  %v638_v29 = vadd.f32 %v637_v19, %v634_v18  ;;  %v705_v37 = vmul.f32 %v704_v27, %v1932_v15  ;;  %v684_v63 = vstv %s2037_s0 }
 0x12a   :  { %s2085_s11 = sld [smem:[#allocation10 + $0x107]]  ;;  %v529_v41 = vmul.f32 %v528_v25, %v1818_v35  ;;  %v494_v55 = vadd.f32 %v493_v31, %v490_v20  ;;  %v613_v25 = vmul.f32 %v612_v17, %v1857_v11  ;;  %v644_v20 = vstv %s1990_s14 }
 0x12b   :  { %s2090_s30 = sld [smem:[#allocation10 + $0x108]]  ;;  %v706_v49 = vadd.f32 %v705_v37, %v702_v36  ;;  %v712_v54 = vstv %s2072_s26  ;;  %v692_v23 = vstv %s2048_s25 }
 0x12c   :  { %v568_v33 = vstv %s2625_s24  ;;  %s2628_s23 = sld [smem:[#allocation34_spill]]  ;;  %v530_v56 = vadd.f32 %v529_v41, %v526_v3  ;;  %v2136_v1 = vmax.f32 %v494_v55, 0.0  ;;  %v614_v39 = vadd.f32 %v613_v25, %v610_v24 }
 0x12d   :  { %s2100_s24 = sld [smem:[#allocation10 + $0x180]]  ;;  %v569_v44 = vmul.f32 %v568_v33, %v1818_v35  ;;  %v676_v3 = vstv %s2028_s29  ;;  %v708_v41 = vstv %s2067_s13  ;;  %v713_v0 = vmul.f32 %v712_v54, %v2039_v47 }
 0x12e   :  { %2626 = sst [smem:[#allocation35_spill]] %s2081_s2  ;;  %v641_v4 = vmul.f32 %v640_v21, %v2136_v1  ;;  %v677_v48 = vmul.f32 %v676_v3, %v2117_v5  ;;  %v709_v50 = vmul.f32 %v708_v41, %v1966_v40  ;;  %v2188_v51 = vmax.f32 %v614_v39, 0.0 }
 0x12f   :  { %s2095_s2 = sld [smem:[#allocation10 + $0x109]]  ;;  %v532_v30 = vstv %s2627_s15  ;;  %v570_v58 = vadd.f32 %v569_v44, %v566_v43  ;;  %v681_v7 = vmul.f32 %v680_v53, %v2136_v1  ;;  %v716_v13 = vstv %s2076_s22 }
 0x130   :  { %s2104_s19 = sld [smem:[#allocation10 + $0x181]]  ;;  %v533_v57 = vmul.f32 %v532_v30, %v1857_v11  ;;  %v648_v30 = vstv %s1994_s21  ;;  %v642_v44 = vadd.f32 %v641_v4, %v638_v29  ;;  %v710_v9 = vadd.f32 %v709_v50, %v706_v49 }
 0x131   :  { %s2110_s8 = sld [smem:[#allocation10 + $0x182]]  ;;  %v717_v25 = vmul.f32 %v716_v13, %v2117_v5 }
 0x132   :  { %v572_v32 = vstv %s2628_s23  ;;  %s2115_s28 = sld [smem:[#allocation10 + $0x183]]  ;;  %v534_v8 = vadd.f32 %v533_v57, %v530_v56  ;;  %v714_v24 = vadd.f32 %v713_v0, %v710_v9 }
 0x133   :  { %s2120_s7 = sld [smem:[#allocation10 + $0x184]]  ;;  %v573_v61 = vmul.f32 %v572_v32, %v1857_v11  ;;  %v737_v31 = vstv %s2100_s24  ;;  %v670_v11 = vadd.f32 %v669_v59, %v666_v22 }
 0x134   :  { %s2124_s16 = sld [smem:[#allocation10 + $0x185]]  ;;  %v2155_v28 = vmax.f32 %v534_v8, 0.0  ;;  %v738_v42 = vmul.f32 %v737_v31, %v1924_v10  ;;  %v653_v8 = vmul.f32 %v652_v62, %v2188_v51 }
 0x135   :  { %s2129_s27 = sld [smem:[#allocation10 + $0x186]]  ;;  %v574_v35 = vadd.f32 %v573_v61, %v570_v58  ;;  %v674_v32 = vadd.f32 %v673_v34, %v670_v11 }
 0x136   :  { %s2134_s12 = sld [smem:[#allocation10 + $0x187]]  ;;  %v740_v33 = vstv %s2104_s19  ;;  %v645_v45 = vmul.f32 %v644_v20, %v2155_v28  ;;  %v685_v21 = vmul.f32 %v684_v63, %v2155_v28  ;;  %v732_v63 = vstv %s2095_s2 }
 0x137   :  { %s2139_s15 = sld [smem:[#allocation10 + $0x188]]  ;;  %v2169_v38 = vmax.f32 %v574_v35, 0.0  ;;  %v741_v43 = vmul.f32 %v740_v33, %v1926_v12  ;;  %v744_v46 = vstv %s2110_s8  ;;  %v678_v6 = vadd.f32 %v677_v48, %v674_v32 }
 0x138   :  { %s2143_s9 = sld [smem:[#allocation10 + $0x189]]  ;;  %v745_v56 = vmul.f32 %v744_v46, %v1932_v15  ;;  %v646_v61 = vadd.f32 %v645_v45, %v642_v44  ;;  %v748_v2 = vstv %s2115_s28  ;;  %v693_v32 = vmul.f32 %v692_v23, %v2188_v51 }
 0x139   :  { %s2148_s20 = sld [smem:[#allocation10 + $0x200]]  ;;  %v649_v52 = vmul.f32 %v648_v30, %v2169_v38  ;;  %v742_v55 = vadd.f32 %v741_v43, %v738_v42  ;;  %v749_v35 = vmul.f32 %v748_v2, %v1966_v40  ;;  %v752_v59 = vstv %s2120_s7 }
 0x13a   :  { %s2153_s1 = sld [smem:[#allocation10 + $0x201]]  ;;  %v682_v60 = vadd.f32 %v681_v7, %v678_v6  ;;  %v753_v33 = vmul.f32 %v752_v59, %v2039_v47  ;;  %v756_v36 = vstv %s2124_s16  ;;  %v724_v30 = vstv %s2085_s11 }
 0x13b   :  { %s2158_s18 = sld [smem:[#allocation10 + $0x202]]  ;;  %v746_v17 = vadd.f32 %v745_v56, %v742_v55  ;;  %v650_v19 = vadd.f32 %v649_v52, %v646_v61  ;;  %v718_v43 = vadd.f32 %v717_v25, %v714_v24  ;;  %v757_v49 = vmul.f32 %v756_v36, %v2117_v5 }
 0x13c   :  { %s2163_s17 = sld [smem:[#allocation10 + $0x203]]  ;;  %v686_v3 = vadd.f32 %v685_v21, %v682_v60  ;;  %v760_v53 = vstv %s2129_s27  ;;  %v764_v0 = vstv %s2134_s12 }
 0x13d   :  { %s2167_s4 = sld [smem:[#allocation10 + $0x204]]  ;;  %v750_v31 = vadd.f32 %v749_v35, %v746_v17  ;;  %v2238_v34 = vadd.f32 %v653_v8, %v650_v19  ;;  %v761_v9 = vmul.f32 %v760_v53, %v2136_v1  ;;  %v765_v25 = vmul.f32 %v764_v0, %v2155_v28 }
 0x13e   :  { %s2173_s5 = sld [smem:[#allocation10 + $0x205]] }
 0x13f   :  { %s2178_s14 = sld [smem:[#allocation10 + $0x206]]  ;;  %v777_v57 = vstv %s2148_s20  ;;  %v754_v48 = vadd.f32 %v753_v33, %v750_v31  ;;  %v655_v52 = vmax.f32 %v2238_v34, 0.0  ;;  %v2305_v33 = vmul.f32 %v732_v63, %v2188_v51 }
 0x140   :  { %s2182_s3 = sld [smem:[#allocation10 + $0x207]]  ;;  %v780_v58 = vstv %s2153_s1  ;;  %v778_v14 = vmul.f32 %v777_v57, %v1924_v10  ;;  %v725_v57 = vmul.f32 %v724_v30, %v2155_v28 }
 0x141   :  { %s2186_s21 = sld [smem:[#allocation10 + $0x208]]  ;;  %v781_v16 = vmul.f32 %v780_v58, %v1926_v12  ;;  %v784_v18 = vstv %s2158_s18  ;;  %v728_v58 = vstv %s2090_s30  ;;  %v758_v7 = vadd.f32 %v757_v49, %v754_v48 }
 0x142   :  { %s2193_s29 = sld [smem:[#allocation10 + $0x209]]  ;;  %v785_v27 = vmul.f32 %v784_v18, %v1932_v15  ;;  %v788_v11 = vstv %s2163_s17 }
 0x143   :  { %s2198_s13 = sld [smem:[#allocation10 + $0x280]]  ;;  %v782_v26 = vadd.f32 %v781_v16, %v778_v14  ;;  %v789_v46 = vmul.f32 %v788_v11, %v1966_v40  ;;  %v792_v50 = vstv %s2167_s4 }
 0x144   :  { %s2203_s23 = sld [smem:[#allocation10 + $0x281]]  ;;  %v793_v6 = vmul.f32 %v792_v50, %v2039_v47  ;;  %v796_v13 = vstv %s2173_s5 }
 0x145   :  { %s2629_s10 = sld [smem:[#allocation43_spill]]  ;;  %v786_v45 = vadd.f32 %v785_v27, %v782_v26  ;;  %v797_v60 = vmul.f32 %v796_v13, %v2117_v5  ;;  %v768_v26 = vstv %s2139_s15  ;;  %v800_v27 = vstv %s2178_s14 }
 0x146   :  { %s2207_s26 = sld [smem:[#allocation10 + $0x282]] }
 0x147   :  { %s2212_s6 = sld [smem:[#allocation10 + $0x283]]  ;;  %v790_v2 = vadd.f32 %v789_v46, %v786_v45 }
 0x148   :  { %s2217_s0 = sld [smem:[#allocation10 + $0x284]] }
 0x149   :  { %s2630_s24 = sld [smem:[#allocation35_spill]]  ;;  %v817_v4 = vstv %s2198_s13  ;;  %v794_v59 = vadd.f32 %v793_v6, %v790_v2 }
 0x14a   :  { %s2222_s22 = sld [smem:[#allocation10 + $0x285]]  ;;  %v820_v29 = vstv %s2203_s23  ;;  %v818_v37 = vmul.f32 %v817_v4, %v1924_v10  ;;  %v762_v4 = vadd.f32 %v761_v9, %v758_v7 }
 0x14b   :  { %v688_v22 = vstv %s2629_s10  ;;  %s2226_s19 = sld [smem:[#allocation10 + $0x286]]  ;;  %v821_v39 = vmul.f32 %v820_v29, %v1926_v12  ;;  %v772_v29 = vstv %s2143_s9 }
 0x14c   :  { %s2231_s8 = sld [smem:[#allocation10 + $0x287]]  ;;  %v689_v41 = vmul.f32 %v688_v22, %v2169_v38  ;;  %v824_v42 = vstv %s2207_s26  ;;  %v729_v22 = vmul.f32 %v728_v58, %v2169_v38  ;;  %v2321_v45 = vmul.f32 %v772_v29, %v2188_v51 }
 0x14d   :  { %s2236_s25 = sld [smem:[#allocation10 + $0x288]]  ;;  %v822_v54 = vadd.f32 %v821_v39, %v818_v37  ;;  %v825_v55 = vmul.f32 %v824_v42, %v1932_v15  ;;  %v828_v61 = vstv %s2212_s6  ;;  %v798_v39 = vadd.f32 %v797_v60, %v794_v59 }
 0x14e   :  { %s2243_s28 = sld [smem:[#allocation10 + $0x289]]  ;;  %v690_v56 = vadd.f32 %v689_v41, %v686_v3  ;;  %v829_v16 = vmul.f32 %v828_v61, %v1966_v40  ;;  %v832_v18 = vstv %s2217_s0  ;;  %v801_v3 = vmul.f32 %v800_v27, %v2136_v1 }
 0x14f   :  { %v720_v20 = vstv %s2630_s24  ;;  %s2248_s7 = sld [smem:[#allocation10 + $0x300]]  ;;  %v826_v14 = vadd.f32 %v825_v55, %v822_v54  ;;  %v833_v31 = vmul.f32 %v832_v18, %v2039_v47  ;;  %v804_v41 = vstv %s2182_s3 }
 0x150   :  { %v721_v44 = vmul.f32 %v720_v20, %v2136_v1  ;;  %s2252_s16 = sld [smem:[#allocation10 + $0x301]]  ;;  %v2283_v35 = vadd.f32 %v693_v32, %v690_v56  ;;  %v836_v11 = vstv %s2222_s22  ;;  %v766_v46 = vadd.f32 %v765_v25, %v762_v4 }
 0x151   :  { %s2257_s11 = sld [smem:[#allocation10 + $0x302]]  ;;  %v830_v20 = vadd.f32 %v829_v16, %v826_v14  ;;  %v837_v48 = vmul.f32 %v836_v11, %v2117_v5  ;;  %v840_v49 = vstv %s2226_s19  ;;  %v805_v50 = vmul.f32 %v804_v41, %v2155_v28 }
 0x152   :  { %s2262_s20 = sld [smem:[#allocation10 + $0x303]]  ;;  %v722_v62 = vadd.f32 %v721_v44, %v718_v43  ;;  %v695_v42 = vmax.f32 %v2283_v35, 0.0  ;;  %v769_v44 = vmul.f32 %v768_v26, %v2169_v38  ;;  %v802_v56 = vadd.f32 %v801_v3, %v798_v39 }
 0x153   :  { %s2267_s1 = sld [smem:[#allocation10 + $0x304]]  ;;  %v834_v32 = vadd.f32 %v833_v31, %v830_v20  ;;  %v844_v63 = vstv %s2231_s8  ;;  %v812_v59 = vstv %s2193_s29  ;;  %v848_v60 = vstv %s2236_s25 }
 0x154   :  { %s2271_s27 = sld [smem:[#allocation10 + $0x305]]  ;;  %v726_v24 = vadd.f32 %v725_v57, %v722_v62  ;;  %v808_v57 = vstv %s2186_s21  ;;  %v841_v62 = vmul.f32 %v840_v49, %v2136_v1  ;;  %v806_v18 = vadd.f32 %v805_v50, %v802_v56 }
 0x155   :  { %s2276_s18 = sld [smem:[#allocation10 + $0x306]]  ;;  %v857_v8 = vstv %s2248_s7  ;;  %v838_v7 = vadd.f32 %v837_v48, %v834_v32  ;;  %v845_v26 = vmul.f32 %v844_v63, %v2155_v28  ;;  %v852_v27 = vstv %s2243_s28 }
 0x156   :  { %v860_v17 = vstv %s2252_s16  ;;  %s2281_s2 = sld [smem:[#allocation10 + $0x307]]  ;;  %v858_v19 = vmul.f32 %v857_v8, %v1924_v10  ;;  %v2317_v43 = vadd.f32 %v729_v22, %v726_v24  ;;  %v770_v29 = vadd.f32 %v769_v44, %v766_v46 }
 0x157   :  { %v861_v21 = vmul.f32 %v860_v17, %v1926_v12  ;;  %s2288_s30 = sld [smem:[#allocation10 + $0x308]]  ;;  %v864_v23 = vstv %s2257_s11  ;;  %v842_v25 = vadd.f32 %v841_v62, %v838_v7  ;;  %v849_v39 = vmul.f32 %v848_v60, %v2169_v38 }
 0x158   :  { %s2293_s12 = sld [smem:[#allocation10 + $0x309]]  ;;  %v865_v37 = vmul.f32 %v864_v23, %v1932_v15  ;;  %v868_v30 = vstv %s2262_s20  ;;  %v853_v41 = vmul.f32 %v852_v27, %v2188_v51 }
 0x159   :  { %s2298_s17 = sld [smem:[#allocation10 + $0x380]]  ;;  %v862_v36 = vadd.f32 %v861_v21, %v858_v19  ;;  %v869_v54 = vmul.f32 %v868_v30, %v1966_v40  ;;  %v872_v55 = vstv %s2267_s1  ;;  %v809_v19 = vmul.f32 %v808_v57, %v2169_v38 }
 0x15a   :  { %s2302_s4 = sld [smem:[#allocation10 + $0x381]]  ;;  %v873_v9 = vmul.f32 %v872_v55, %v2039_v47  ;;  %v876_v21 = vstv %s2271_s27  ;;  %v846_v32 = vadd.f32 %v845_v26, %v842_v25 }
 0x15b   :  { %s2309_s15 = sld [smem:[#allocation10 + $0x382]]  ;;  %v866_v53 = vadd.f32 %v865_v37, %v862_v36  ;;  %v877_v31 = vmul.f32 %v876_v21, %v2117_v5  ;;  %v810_v36 = vadd.f32 %v809_v19, %v806_v18  ;;  %v813_v37 = vmul.f32 %v812_v59, %v2188_v51 }
 0x15c   :  { %s2314_s9 = sld [smem:[#allocation10 + $0x383]]  ;;  %v880_v3 = vstv %s2276_s18  ;;  %v884_v48 = vstv %s2281_s2  ;;  %v2413_v19 = vadd.f32 %v2305_v33, %v2317_v43  ;;  %v2416_v21 = vadd.f32 %v2321_v45, %v770_v29 }
 0x15d   :  { %s2323_s5 = sld [smem:[#allocation10 + $0x384]]  ;;  %v870_v14 = vadd.f32 %v869_v54, %v866_v53  ;;  %v881_v54 = vmul.f32 %v880_v3, %v2136_v1  ;;  %v2426_v33 = vadd.f32 %v813_v37, %v810_v36 }
 0x15e   :  { %s2327_s14 = sld [smem:[#allocation10 + $0x385]]  ;;  %v892_v26 = vstv %s2293_s12 }
 0x15f   :  { %s2332_s3 = sld [smem:[#allocation10 + $0x386]]  ;;  %v897_v58 = vstv %s2298_s17  ;;  %v874_v20 = vadd.f32 %v873_v9, %v870_v14  ;;  %v850_v9 = vadd.f32 %v849_v39, %v846_v32 }
 0x160   :  { %v900_v61 = vstv %s2302_s4  ;;  %s2337_s13 = sld [smem:[#allocation10 + $0x387]]  ;;  %v898_v2 = vmul.f32 %v897_v58, %v1924_v10 }
 0x161   :  { %v901_v6 = vmul.f32 %v900_v61, %v1926_v12  ;;  %s2343_s23 = sld [smem:[#allocation10 + $0x388]]  ;;  %v904_v0 = vstv %s2309_s15  ;;  %v878_v53 = vadd.f32 %v877_v31, %v874_v20  ;;  %v2428_v43 = vadd.f32 %v853_v41, %v850_v9 }
 0x162   :  { %v908_v13 = vstv %s2314_s9  ;;  %s2348_s21 = sld [smem:[#allocation10 + $0x389]]  ;;  %v905_v8 = vmul.f32 %v904_v0, %v1932_v15  ;;  %v885_v0 = vmul.f32 %v884_v48, %v2155_v28 }
 0x163   :  { %v902_v16 = vadd.f32 %v901_v6, %v898_v2  ;;  %v909_v17 = vmul.f32 %v908_v13, %v1966_v40  ;;  %s2352_s10 = sld [smem:[#allocation10 + $0x400]]  ;;  %v912_v22 = vstv %s2323_s5 }
 0x164   :  { %s2357_s26 = sld [smem:[#allocation10 + $0x401]]  ;;  %v913_v24 = vmul.f32 %v912_v22, %v2039_v47  ;;  %v916_v4 = vstv %s2327_s14 }
 0x165   :  { %v906_v23 = vadd.f32 %v905_v8, %v902_v16  ;;  %s2362_s6 = sld [smem:[#allocation10 + $0x402]]  ;;  %v917_v44 = vmul.f32 %v916_v4, %v2117_v5  ;;  %v920_v46 = vstv %s2332_s3  ;;  %v882_v16 = vadd.f32 %v881_v54, %v878_v53 }
 0x166   :  { %s2367_s0 = sld [smem:[#allocation10 + $0x403]]  ;;  %v921_v57 = vmul.f32 %v920_v46, %v2136_v1  ;;  %v924_v58 = vstv %s2337_s13  ;;  %v888_v8 = vstv %s2288_s30 }
 0x167   :  { %v910_v11 = vadd.f32 %v909_v17, %v906_v23  ;;  %s2370_s29 = sld [smem:[#allocation10 + $0x404]]  ;;  %v925_v22 = vmul.f32 %v924_v58, %v2155_v28  ;;  %v928_v23 = vstv %s2343_s23  ;;  %v889_v45 = vmul.f32 %v888_v8, %v2169_v38 }
 0x168   :  { %s2375_s24 = sld [smem:[#allocation10 + $0x405]]  ;;  %v886_v27 = vadd.f32 %v885_v0, %v882_v16  ;;  %v929_v31 = vmul.f32 %v928_v23, %v2169_v38 }
 0x169   :  { %v914_v30 = vadd.f32 %v913_v24, %v910_v11  ;;  %s2380_s22 = sld [smem:[#allocation10 + $0x406]]  ;;  %v937_v49 = vstv %s2352_s10  ;;  %v932_v11 = vstv %s2348_s21  ;;  %s1435_s21 = smov [#allocation12]  }
 0x16a   :  { %v940_v50 = vstv %s2357_s26  ;;  %s2385_s19 = sld [smem:[#allocation10 + $0x407]]  ;;  %v938_v55 = vmul.f32 %v937_v49, %v1924_v10  ;;  %v933_v58 = vmul.f32 %v932_v11, %v2188_v51  ;;  %s1061_s10 = sshll.u32 %s1435_s21, 4  ;;  %s1062_s10 = int_to_ptr.vmem [resolvable:$true] %s1061_s10 }
 0x16b   :  { %v941_v56 = vmul.f32 %v940_v50, %v1926_v12  ;;  %s2390_s8 = sld [smem:[#allocation10 + $0x408]]  ;;  %v944_v61 = vstv %s2362_s6  ;;  %v918_v63 = vadd.f32 %v917_v44, %v914_v30 }
 0x16c   :  { %v948_v62 = vstv %s2367_s0  ;;  %s2396_s25 = sld [smem:[#allocation10 + $0x409]]  ;;  %v945_v6 = vmul.f32 %v944_v61, %v1932_v15 }
 0x16d   :  { %v942_v2 = vadd.f32 %v941_v56, %v938_v55  ;;  %v949_v7 = vmul.f32 %v948_v62, %v1966_v40  ;;  %s2400_s28 = sld [smem:[#allocation10 + $0x480]]  ;;  %v952_v13 = vstv %s2370_s29  ;;  %v922_v60 = vadd.f32 %v921_v57, %v918_v63 }
 0x16e   :  { %v956_v14 = vstv %s2375_s24  ;;  %s2405_s7 = sld [smem:[#allocation10 + $0x481]]  ;;  %v953_v18 = vmul.f32 %v952_v13, %v2039_v47  ;;  %v855_v13 = vmax.f32 %v2428_v43, 0.0 }
 0x16f   :  { %v946_v17 = vadd.f32 %v945_v6, %v942_v2  ;;  %s2409_s16 = sld [smem:[#allocation10 + $0x482]]  ;;  %v960_v59 = vstv %s2380_s22  ;;  %v957_v25 = vmul.f32 %v956_v14, %v2117_v5  ;;  %v926_v39 = vadd.f32 %v925_v22, %v922_v60 }
 0x170   :  { %s2420_s11 = sld [smem:[#allocation10 + $0x483]]  ;;  %v961_v29 = vmul.f32 %v960_v59, %v2136_v1  ;;  %v964_v20 = vstv %s2385_s19  ;;  %v775_v6 = vmax.f32 %v2416_v21, 0.0 }
 0x171   :  { %v950_v24 = vadd.f32 %v949_v7, %v946_v17  ;;  %s2424_s20 = sld [smem:[#allocation10 + $0x484]]  ;;  %v965_v44 = vmul.f32 %v964_v20, %v2155_v28  ;;  %v968_v46 = vstv %s2390_s8  ;;  %v930_v57 = vadd.f32 %v929_v31, %v926_v39 }
 0x172   :  { %s2432_s1 = sld [smem:[#allocation10 + $0x485]]  ;;  %v969_v63 = vmul.f32 %v968_v46, %v2169_v38  ;;  %v972_v7 = vstv %s2396_s25 }
 0x173   :  { %v954_v4 = vadd.f32 %v953_v18, %v950_v24  ;;  %s2436_s27 = sld [smem:[#allocation10 + $0x486]]  ;;  %v977_v36 = vstv %s2400_s28  ;;  %v934_v8 = vadd.f32 %v933_v58, %v930_v57  ;;  %v973_v21 = vmul.f32 %v972_v7, %v2188_v51 }
 0x174   :  { %v980_v37 = vstv %s2405_s7  ;;  %s2442_s18 = sld [smem:[#allocation10 + $0x487]]  ;;  %v978_v41 = vmul.f32 %v977_v36, %v1924_v10  ;;  %v890_v10 = vadd.f32 %v889_v45, %v886_v27 }
 0x175   :  { %v958_v3 = vadd.f32 %v957_v25, %v954_v4  ;;  %v981_v30 = vmul.f32 %v980_v37, %v1926_v12  ;;  %s2446_s2 = sld [smem:[#allocation10 + $0x488]]  ;;  %v984_v32 = vstv %s2409_s16  ;;  %v893_v12 = vmul.f32 %v892_v26, %v2188_v51 }
 0x176   :  { %v988_v48 = vstv %s2420_s11  ;;  %s2452_s30 = sld [smem:[#allocation10 + $0x489]]  ;;  %v985_v53 = vmul.f32 %v984_v32, %v1932_v15  ;;  %v935_v36 = vmax.f32 %v934_v8, 0.0 }
 0x177   :  { %v962_v49 = vadd.f32 %v961_v29, %v958_v3  ;;  %v982_v50 = vadd.f32 %v981_v30, %v978_v41  ;;  %v989_v54 = vmul.f32 %v988_v48, %v1966_v40  ;;  %s2456_s12 = sld [smem:[#allocation11]]  ;;  %v992_v55 = vstv %s2424_s20 }
 0x178   :  { %v996_v56 = vstv %s2432_s1  ;;  %s2461_s17 = sld [smem:[#allocation11 + $0x1]]  ;;  %v993_v15 = vmul.f32 %v992_v55, %v2039_v47  ;;  %v735_v40 = vmax.f32 %v2413_v19, 0.0  ;;  %v815_v47 = vmax.f32 %v2426_v33, 0.0 }
 0x179   :  { %v986_v61 = vadd.f32 %v985_v53, %v982_v50  ;;  %s2465_s4 = sld [smem:[#allocation11 + $0x2]]  ;;  %v966_v62 = vadd.f32 %v965_v44, %v962_v49  ;;  %v1000_v2 = vstv %s2436_s27  ;;  %v997_v0 = vmul.f32 %v996_v56, %v2117_v5 }
 0x17a   :  { %s2470_s15 = sld [smem:[#allocation11 + $0x3]]  ;;  %v894_v14 = vadd.f32 %v893_v12, %v890_v10  ;;  %v1004_v16 = vstv %s2442_s18  ;;  %v1001_v18 = vmul.f32 %v1000_v2, %v2136_v1 }
 0x17b   :  { %v990_v9 = vadd.f32 %v989_v54, %v986_v61  ;;  %s2475_s9 = sld [smem:[#allocation11 + $0x4]]  ;;  %v1008_v19 = vstv %s2446_s2  ;;  %v970_v5 = vadd.f32 %v969_v63, %v966_v62  ;;  %v1005_v23 = vmul.f32 %v1004_v16, %v2155_v28 }
 0x17c   :  { %s2480_s5 = sld [smem:[#allocation11 + $0x5]]  ;;  %v1009_v25 = vmul.f32 %v1008_v19, %v2169_v38  ;;  %v1012_v33 = vstv %s2452_s30  ;;  %v895_v20 = vmax.f32 %v894_v14, 0.0 }
 0x17d   :  { %v994_v17 = vadd.f32 %v993_v15, %v990_v9  ;;  %s2484_s14 = sld [smem:[#allocation11 + $0x6]]  ;;  %v1017_v22 = vstv %s2456_s12  ;;  %v974_v28 = vadd.f32 %v973_v21, %v970_v5  ;;  %v1013_v35 = vmul.f32 %v1012_v33, %v2188_v51 }
 0x17e   :  { %v1020_v59 = vstv %s2461_s17  ;;  %s2489_s3 = sld [smem:[#allocation11 + $0x7]]  ;;  %v1018_v24 = vmul.f32 %v1017_v22, %v655_v52 }
 0x17f   :  { %v998_v60 = vadd.f32 %v997_v0, %v994_v17  ;;  %v1021_v1 = vmul.f32 %v1020_v59, %v695_v42  ;;  %v1024_v43 = vstv %s2465_s4  ;;  %s1310_s13 = sld [smem:[#allocation11 + $0x8]]  ;;  %v975_v30 = vmax.f32 %v974_v28, 0.0 }
 0x180   :  { %v1028_v45 = vstv %s2470_s15  ;;  %v1025_v4 = vmul.f32 %v1024_v43, %v735_v40  ;;  %s1311_s23 = sld [smem:[#allocation11 + $0x9]] }
 0x181   :  { %v1002_v26 = vadd.f32 %v1001_v18, %v998_v60  ;;  %v1022_v27 = vadd.f32 %v1021_v1, %v1018_v24  ;;  %v1029_v29 = vmul.f32 %v1028_v45, %v775_v6  ;;  %v1032_v31 = vstv %s2475_s9  ;;  %s2631_s0 = sld [smem:[#allocation54_spill]] }
 0x182   :  { %v1036_v34 = vstv %s2480_s5  ;;  %v1033_v38 = vmul.f32 %v1032_v31, %v815_v47 }
 0x183   :  { %v1006_v52 = vadd.f32 %v1005_v23, %v1002_v26  ;;  %v1026_v42 = vadd.f32 %v1025_v4, %v1022_v27  ;;  %v1040_v11 = vstv %s2484_s14  ;;  %v1037_v3 = vmul.f32 %v1036_v34, %v855_v13 }
 0x184   :  { %v1044_v41 = vstv %s2489_s3  ;;  %v1041_v32 = vmul.f32 %v1040_v11, %v895_v20 }
 0x185   :  { %v1010_v37 = vadd.f32 %v1009_v25, %v1006_v52  ;;  %v1030_v39 = vadd.f32 %v1029_v29, %v1026_v42  ;;  %v1048_v48 = vstv %s1310_s13  ;;  %v1045_v53 = vmul.f32 %v1044_v41, %v935_v36 }
 0x186   :  { %v1052_v54 = vstv %s1311_s23  ;;  %v1049_v12 = vmul.f32 %v1048_v48, %v975_v30 }
 0x187   :  { %v1014_v44 = vadd.f32 %v1013_v35, %v1010_v37  ;;  %v1034_v46 = vadd.f32 %v1033_v38, %v1030_v39  ;;  %s1063_s29 = sshll.u32 %s2631_s0, 4  ;;  %s1064_s29 = int_to_ptr.hbm [resolvable:$true] %s1063_s29 }
 0x189   :  { %v1015_v49 = vmax.f32 %v1014_v44, 0.0  ;;  %v1038_v50 = vadd.f32 %v1037_v3, %v1034_v46 }
 0x18b   :  { %v1042_v10 = vadd.f32 %v1041_v32, %v1038_v50  ;;  %v1053_v55 = vmul.f32 %v1052_v54, %v1015_v49 }
 0x18d   :  { %v1046_v51 = vadd.f32 %v1045_v53, %v1042_v10 }
 0x18f   :  { %v1050_v56 = vadd.f32 %v1049_v12, %v1046_v51 }
 0x191   :  { %v1054_v57 = vadd.f32 %v1053_v55, %v1050_v56 }
 0x193   :  { %1055 = vst [vmem:[#allocation12] sm:$0xff] %v1054_v57 }
 0x194   :  { %1066 = dma.vmem_to_hbm [thread:$0]  %s1062_s10, 128, %s1064_s29, [#allocation4]  }
 0x195   :  { %1426 = dma.done.wait [#allocation4], 128  }
 0x196   :  { %1427 = vsyncadd [#allocation4], 4294967168 }
 0x197   :  { %1071 = vsyncpa [#allocation3], 1 }
 0x198   :  { %1072 = vsyncpa [#allocation4], 1 }
 0x199   :  { %1073 = vsyncpa [#allocation5], 1 }
 0x19a   :  { %1074 = vsyncpa [#allocation6], 1 }
 0x19b   :  { %1075 = vsyncpa [#allocation9], 1 }

</bundles_post_ra>
